<compile_context>
chip_gen: v7x
topology: tpu7x:2x2x1
jax: 0.10.0
libtpu: 0.0.40
codegen_flags: <defaults>
</compile_context>

<pallas_src>
import functools

import jax
import jax.numpy as jnp
from jax import lax
from jax.experimental import pallas as pl
from jax.experimental.pallas import tpu as pltpu

EMBEDDING_DIM = 64
HIDDEN_DIM = 128
VOCAB_SIZE = 1000  # max(vocab.values()) in the reference script


def _lstm_fc_kernel(tokens_ref, table_hbm, whh_ref, wfc_ref, bfc_ref,
                    out_ref, gx_buf, sems, *, hidden_dim, seq_len, batch):
    """Fused embedding-gather + LSTM recurrence + FC head.

    tokens_ref: SMEM (B, T) int32    -- scalar-prefetched token ids
    table_hbm:  HBM  (V+1, 4H) f32   -- emb @ W_ih^T + (b_ih+b_hh), cols [i,f,o,g]
    whh_ref:    VMEM (H, 4H) bf16    -- W_hh^T, cols [i,f,o,g]
    wfc_ref:    VMEM (1, H) f32
    bfc_ref:    VMEM (1, 1) f32
    out_ref:    VMEM (B, 1) f32
    gx_buf:     VMEM (B, T, 4H) f32 scratch (gathered input projections)
    sems:       DMA semaphores (T, B)
    """
    H = hidden_dim
    T = seq_len
    B = batch

    # Issue all token-row gather DMAs up front, t-major so timestep 0's rows
    # land first; each copy is one 4H row (~2 KB) HBM -> VMEM.
    for t in range(T):
        for b in range(B):
            tok = tokens_ref[b, t]
            pltpu.make_async_copy(
                table_hbm.at[pl.ds(tok, 1), :],
                gx_buf.at[b, pl.ds(t, 1), :],
                sems.at[t, b],
            ).start()

    h = jnp.zeros((B, H), jnp.float32)
    c = jnp.zeros((B, H), jnp.float32)

    # T = 8, fully unrolled; the recurrence is inherently serial.
    for t in range(T):
        # Only wait for the current timestep's rows: later gathers overlap
        # this step's compute.
        for b in range(B):
            pltpu.make_async_copy(
                table_hbm.at[pl.ds(0, 1), :],
                gx_buf.at[b, pl.ds(t, 1), :],
                sems.at[t, b],
            ).wait()

        gx_t = gx_buf[:, t, :]                                   # (B, 4H) f32

        # Only the h-dependent matmul sits on the serial critical path.
        # W_hh is re-read from VMEM per step (cheap vld; plenty of slot slack)
        # rather than held in ~32 vregs across the whole unrolled loop.
        gates = jnp.dot(h.astype(jnp.bfloat16), whh_ref[...],
                        preferred_element_type=jnp.float32) + gx_t

        # Gate columns pre-permuted to [i, f, o, g]: one fused sigmoid
        # (tanh identity, single EUP op per element) + one tanh.
        sig = 0.5 * (jnp.tanh(0.5 * gates[:, :3 * H]) + 1.0)     # (B, 3H)
        i_g = sig[:, 0 * H:1 * H]
        f_g = sig[:, 1 * H:2 * H]
        o_g = sig[:, 2 * H:3 * H]
        g_g = jnp.tanh(gates[:, 3 * H:4 * H])

        c = f_g * c + i_g * g_g
        h = o_g * jnp.tanh(c)

    # Final FC (H -> 1) as VPU multiply + lane reduction (avoids a lane-sparse
    # N=1 MXU matmul).
    out_ref[...] = (jnp.sum(h * wfc_ref[...], axis=-1, keepdims=True)
                    + bfc_ref[...])


def number_model_forward(tokens, kparams):
    """tokens: int32 (B, T). Returns float32 (B,), matching the PyTorch model."""
    proj_table = kparams["proj_table"]      # (V+1, 4H) f32
    w_hh_t = kparams["w_hh_t_bf16"]         # (H, 4H) bf16
    w_fc_row = kparams["w_fc_row"]          # (1, H) f32
    b_fc = kparams["b_fc"]                  # (1, 1) f32

    B, T = tokens.shape
    H = w_hh_t.shape[0]

    kernel = functools.partial(_lstm_fc_kernel, hidden_dim=H, seq_len=T,
                               batch=B)

    grid_spec = pltpu.PrefetchScalarGridSpec(
        num_scalar_prefetch=1,                 # tokens -> SMEM
        grid=(1,),
        in_specs=[
            pl.BlockSpec(memory_space=pl.ANY),                    # proj_table (HBM)
            pl.BlockSpec((H, 4 * H), lambda i, tok: (0, 0)),      # W_hh^T (VMEM)
            pl.BlockSpec((1, H), lambda i, tok: (0, 0)),          # W_fc row
            pl.BlockSpec((1, 1), lambda i, tok: (0, 0)),          # b_fc
        ],
        out_specs=pl.BlockSpec((B, 1), lambda i, tok: (0, 0)),
        scratch_shapes=[
            pltpu.VMEM((B, T, 4 * H), jnp.float32),               # gathered gx
            pltpu.SemaphoreType.DMA((T, B)),
        ],
    )

    out = pl.pallas_call(
        kernel,
        out_shape=jax.ShapeDtypeStruct((B, 1), jnp.float32),
        grid_spec=grid_spec,
        compiler_params=pltpu.CompilerParams(
            dimension_semantics=("arbitrary",)),
    )(tokens.astype(jnp.int32), proj_table, w_hh_t, w_fc_row, b_fc)

    return out[:, 0]  # squeeze(1)


def make_params(key, vocab_size=VOCAB_SIZE, embedding_dim=EMBEDDING_DIM,
                hidden_dim=HIDDEN_DIM):
    """Raw PyTorch-layout parameters (f32)."""
    k_emb, k_wih, k_whh, k_bih, k_bhh, k_wfc, k_bfc = jax.random.split(key, 7)
    scale = 0.1

    emb = scale * jax.random.normal(k_emb, (vocab_size + 1, embedding_dim),
                                    jnp.float32)
    emb = emb.at[0].set(0.0)  # padding_idx=0 -> zero row

    w_ih = scale * jax.random.normal(k_wih, (4 * hidden_dim, embedding_dim),
                                     jnp.float32)
    w_hh = scale * jax.random.normal(k_whh, (4 * hidden_dim, hidden_dim),
                                     jnp.float32)
    b_ih = scale * jax.random.normal(k_bih, (4 * hidden_dim,), jnp.float32)
    b_hh = scale * jax.random.normal(k_bhh, (4 * hidden_dim,), jnp.float32)

    w_fc = scale * jax.random.normal(k_wfc, (1, hidden_dim), jnp.float32)
    b_fc = scale * jax.random.normal(k_bfc, (1,), jnp.float32)

    return {"embedding": emb, "w_ih": w_ih, "w_hh": w_hh,
            "b_ih": b_ih, "b_hh": b_hh, "w_fc": w_fc, "b_fc": b_fc}


def prepare_kernel_params(raw, hidden_dim=HIDDEN_DIM):
    """Fold embedding + W_ih + biases into one gather table, permute gate
    columns from PyTorch's [i, f, g, o] to [i, f, o, g], pre-transpose/cast
    W_hh to bf16 for the MXU."""
    H = hidden_dim
    emb = raw["embedding"]                                    # (V+1, E)
    bias = raw["b_ih"] + raw["b_hh"]                          # (4H,)
    proj_table = emb @ raw["w_ih"].T + bias[None, :]          # (V+1, 4H)
    w_hh_t = raw["w_hh"].T                                    # (H, 4H)

    perm = jnp.concatenate([
        jnp.arange(0 * H, 1 * H),   # i
        jnp.arange(1 * H, 2 * H),   # f
        jnp.arange(3 * H, 4 * H),   # o
        jnp.arange(2 * H, 3 * H),   # g
    ])
    return {
        "proj_table": proj_table[:, perm].astype(jnp.float32),
        "w_hh_t_bf16": w_hh_t[:, perm].astype(jnp.bfloat16),
        "w_fc_row": raw["w_fc"].astype(jnp.float32),          # (1, H)
        "b_fc": raw["b_fc"].reshape(1, 1).astype(jnp.float32),
    }


def _reference_forward(tokens, raw):
    """Pure-JAX f32 reference matching the PyTorch forward (original gate order)."""
    emb = raw["embedding"]
    x = jnp.take(emb, tokens, axis=0)                          # (B, T, E)
    B, T, _ = x.shape
    H = HIDDEN_DIM
    w_ih_t = raw["w_ih"].T
    w_hh_t = raw["w_hh"].T
    bias = (raw["b_ih"] + raw["b_hh"])[None, :]

    def step(carry, x_t):
        h, c = carry
        gates = x_t @ w_ih_t + h @ w_hh_t + bias
        i_g = jax.nn.sigmoid(gates[:, 0 * H:1 * H])
        f_g = jax.nn.sigmoid(gates[:, 1 * H:2 * H])
        g_g = jnp.tanh(gates[:, 2 * H:3 * H])
        o_g = jax.nn.sigmoid(gates[:, 3 * H:4 * H])
        c_new = f_g * c + i_g * g_g
        h_new = o_g * jnp.tanh(c_new)
        return (h_new, c_new), None

    h0 = jnp.zeros((B, H), jnp.float32)
    c0 = jnp.zeros((B, H), jnp.float32)
    (h_final, _), _ = lax.scan(step, (h0, c0), jnp.transpose(x, (1, 0, 2)))
    return (h_final @ raw["w_fc"].T + raw["b_fc"][None, :])[:, 0]


if __name__ == "__main__":
    key = jax.random.PRNGKey(0)
    k_params, k_tokens = jax.random.split(key)

    raw_params = make_params(k_params)
    kparams = prepare_kernel_params(raw_params)

    B, T = 2, 8
    tokens = jax.random.randint(k_tokens, (B, T), 0, VOCAB_SIZE + 1,
                                dtype=jnp.int32)
    # Exercise the padding token (index 0): its embedding row is zero but the
    # LSTM biases still apply (proj_table[0] == b_ih + b_hh), as in PyTorch.
    tokens = tokens.at[0, 3].set(0)

    out = number_model_forward(tokens, kparams)
    jax.block_until_ready(out)
    assert out.shape == (B,) and out.dtype == jnp.float32
    assert bool(jnp.all(jnp.isfinite(out)))

    # Loose tolerance: bf16 MXU operands (h cast per step) give ~1e-3-level
    # differences over the T=8 recurrence vs. the pure-f32 reference.
    ref = _reference_forward(tokens, raw_params)
    assert bool(jnp.allclose(out, ref, rtol=2e-2, atol=2e-2)), (out, ref)

    print("KERNEL_OK")
</pallas_src>

<mosaic_0001>
module attributes {stable_mosaic.version = 11 : i64} {
  func.func @_lstm_fc_kernel(%arg0: i32, %arg1: memref<2x8xi32, #tpu.memory_space<smem>>, %arg2: memref<1001x512xf32, #tpu.memory_space<any>>, %arg3: memref<128x512xbf16, #tpu.memory_space<vmem>>, %arg4: memref<1x128xf32, #tpu.memory_space<vmem>>, %arg5: memref<1x1xf32, #tpu.memory_space<vmem>>, %arg6: memref<2x1xf32, #tpu.memory_space<vmem>>, %arg7: memref<2x8x512xf32, #tpu.memory_space<vmem>>, %arg8: memref<8x2x!tpu.dma_semaphore, #tpu.memory_space<semaphore_mem>>) attributes {dimension_semantics = [#tpu.dimension_semantics<arbitrary>], iteration_bounds = array<i64: 1>, scalar_prefetch = 1 : i64, scratch_operands = 2 : i64, tpu.core_type = #tpu.core_type<tc>, window_params = [{}, {pipeline_mode = #tpu.pipeline_mode<synchronous>, transform_indices = @transform_1, window_bounds = array<i64: 128, 512>}, {pipeline_mode = #tpu.pipeline_mode<synchronous>, transform_indices = @transform_2, window_bounds = array<i64: 1, 128>}, {pipeline_mode = #tpu.pipeline_mode<synchronous>, transform_indices = @transform_3, window_bounds = array<i64: 1, 1>}, {pipeline_mode = #tpu.pipeline_mode<synchronous>, transform_indices = @transform_4, window_bounds = array<i64: 2, 1>}]} {
    %c0 = arith.constant 0 : index
    %c0_0 = arith.constant 0 : index
    %0 = memref.load %arg1[%c0, %c0_0] : memref<2x8xi32, #tpu.memory_space<smem>>
    %c0_i32 = arith.constant 0 : i32
    %c0_i32_1 = arith.constant 0 : i32
    %c0_i32_2 = arith.constant 0 : i32
    %c0_i32_3 = arith.constant 0 : i32
    %1 = tpu.memref_slice %arg2[%0, %c0_i32_3] : memref<1001x512xf32, #tpu.memory_space<any>> -> memref<1x512xf32, #tpu.memory_space<any>>
    %c0_i32_4 = arith.constant 0 : i32
    %c0_i32_5 = arith.constant 0 : i32
    %2 = tpu.memref_slice %arg7[%c0_i32, %c0_i32_4, %c0_i32_5] : memref<2x8x512xf32, #tpu.memory_space<vmem>> -> memref<1x1x512xf32, #tpu.memory_space<vmem>>
    %3 = tpu.memref_squeeze %2 : memref<1x1x512xf32, #tpu.memory_space<vmem>> -> memref<1x512xf32, #tpu.memory_space<vmem>>
    %4 = tpu.memref_slice %arg8[%c0_i32_1, %c0_i32_2] : memref<8x2x!tpu.dma_semaphore, #tpu.memory_space<semaphore_mem>> -> memref<1x1x!tpu.dma_semaphore, #tpu.memory_space<semaphore_mem>>
    %5 = tpu.memref_squeeze %4 : memref<1x1x!tpu.dma_semaphore, #tpu.memory_space<semaphore_mem>> -> memref<!tpu.dma_semaphore, #tpu.memory_space<semaphore_mem>>
    tpu.enqueue_dma source(%1 : memref<1x512xf32, #tpu.memory_space<any>>) target(%3 : memref<1x512xf32, #tpu.memory_space<vmem>>) target_semaphore(%5 : memref<!tpu.dma_semaphore, #tpu.memory_space<semaphore_mem>>)
    %c1 = arith.constant 1 : index
    %c0_6 = arith.constant 0 : index
    %6 = memref.load %arg1[%c1, %c0_6] : memref<2x8xi32, #tpu.memory_space<smem>>
    %c1_i32 = arith.constant 1 : i32
    %c0_i32_7 = arith.constant 0 : i32
    %c1_i32_8 = arith.constant 1 : i32
    %c0_i32_9 = arith.constant 0 : i32
    %7 = tpu.memref_slice %arg2[%6, %c0_i32_9] : memref<1001x512xf32, #tpu.memory_space<any>> -> memref<1x512xf32, #tpu.memory_space<any>>
    %c0_i32_10 = arith.constant 0 : i32
    %c0_i32_11 = arith.constant 0 : i32
    %8 = tpu.memref_slice %arg7[%c1_i32, %c0_i32_10, %c0_i32_11] : memref<2x8x512xf32, #tpu.memory_space<vmem>> -> memref<1x1x512xf32, #tpu.memory_space<vmem>>
    %9 = tpu.memref_squeeze %8 : memref<1x1x512xf32, #tpu.memory_space<vmem>> -> memref<1x512xf32, #tpu.memory_space<vmem>>
    %10 = tpu.memref_slice %arg8[%c0_i32_7, %c1_i32_8] : memref<8x2x!tpu.dma_semaphore, #tpu.memory_space<semaphore_mem>> -> memref<1x1x!tpu.dma_semaphore, #tpu.memory_space<semaphore_mem>>
    %11 = tpu.memref_squeeze %10 : memref<1x1x!tpu.dma_semaphore, #tpu.memory_space<semaphore_mem>> -> memref<!tpu.dma_semaphore, #tpu.memory_space<semaphore_mem>>
    tpu.enqueue_dma source(%7 : memref<1x512xf32, #tpu.memory_space<any>>) target(%9 : memref<1x512xf32, #tpu.memory_space<vmem>>) target_semaphore(%11 : memref<!tpu.dma_semaphore, #tpu.memory_space<semaphore_mem>>)
    %c0_12 = arith.constant 0 : index
    %c1_13 = arith.constant 1 : index
    %12 = memref.load %arg1[%c0_12, %c1_13] : memref<2x8xi32, #tpu.memory_space<smem>>
    %c0_i32_14 = arith.constant 0 : i32
    %c1_i32_15 = arith.constant 1 : i32
    %c0_i32_16 = arith.constant 0 : i32
    %c0_i32_17 = arith.constant 0 : i32
    %13 = tpu.memref_slice %arg2[%12, %c0_i32_17] : memref<1001x512xf32, #tpu.memory_space<any>> -> memref<1x512xf32, #tpu.memory_space<any>>
    %c1_i32_18 = arith.constant 1 : i32
    %c0_i32_19 = arith.constant 0 : i32
    %14 = tpu.memref_slice %arg7[%c0_i32_14, %c1_i32_18, %c0_i32_19] : memref<2x8x512xf32, #tpu.memory_space<vmem>> -> memref<1x1x512xf32, #tpu.memory_space<vmem>>
    %15 = tpu.memref_squeeze %14 : memref<1x1x512xf32, #tpu.memory_space<vmem>> -> memref<1x512xf32, #tpu.memory_space<vmem>>
    %16 = tpu.memref_slice %arg8[%c1_i32_15, %c0_i32_16] : memref<8x2x!tpu.dma_semaphore, #tpu.memory_space<semaphore_mem>> -> memref<1x1x!tpu.dma_semaphore, #tpu.memory_space<semaphore_mem>>
    %17 = tpu.memref_squeeze %16 : memref<1x1x!tpu.dma_semaphore, #tpu.memory_space<semaphore_mem>> -> memref<!tpu.dma_semaphore, #tpu.memory_space<semaphore_mem>>
    tpu.enqueue_dma source(%13 : memref<1x512xf32, #tpu.memory_space<any>>) target(%15 : memref<1x512xf32, #tpu.memory_space<vmem>>) target_semaphore(%17 : memref<!tpu.dma_semaphore, #tpu.memory_space<semaphore_mem>>)
    %c1_20 = arith.constant 1 : index
    %c1_21 = arith.constant 1 : index
    %18 = memref.load %arg1[%c1_20, %c1_21] : memref<2x8xi32, #tpu.memory_space<smem>>
    %c1_i32_22 = arith.constant 1 : i32
    %c1_i32_23 = arith.constant 1 : i32
    %c1_i32_24 = arith.constant 1 : i32
    %c0_i32_25 = arith.constant 0 : i32
    %19 = tpu.memref_slice %arg2[%18, %c0_i32_25] : memref<1001x512xf32, #tpu.memory_space<any>> -> memref<1x512xf32, #tpu.memory_space<any>>
    %c1_i32_26 = arith.constant 1 : i32
    %c0_i32_27 = arith.constant 0 : i32
    %20 = tpu.memref_slice %arg7[%c1_i32_22, %c1_i32_26, %c0_i32_27] : memref<2x8x512xf32, #tpu.memory_space<vmem>> -> memref<1x1x512xf32, #tpu.memory_space<vmem>>
    %21 = tpu.memref_squeeze %20 : memref<1x1x512xf32, #tpu.memory_space<vmem>> -> memref<1x512xf32, #tpu.memory_space<vmem>>
    %22 = tpu.memref_slice %arg8[%c1_i32_23, %c1_i32_24] : memref<8x2x!tpu.dma_semaphore, #tpu.memory_space<semaphore_mem>> -> memref<1x1x!tpu.dma_semaphore, #tpu.memory_space<semaphore_mem>>
    %23 = tpu.memref_squeeze %22 : memref<1x1x!tpu.dma_semaphore, #tpu.memory_space<semaphore_mem>> -> memref<!tpu.dma_semaphore, #tpu.memory_space<semaphore_mem>>
    tpu.enqueue_dma source(%19 : memref<1x512xf32, #tpu.memory_space<any>>) target(%21 : memref<1x512xf32, #tpu.memory_space<vmem>>) target_semaphore(%23 : memref<!tpu.dma_semaphore, #tpu.memory_space<semaphore_mem>>)
    %c0_28 = arith.constant 0 : index
    %c2 = arith.constant 2 : index
    %24 = memref.load %arg1[%c0_28, %c2] : memref<2x8xi32, #tpu.memory_space<smem>>
    %c0_i32_29 = arith.constant 0 : i32
    %c2_i32 = arith.constant 2 : i32
    %c0_i32_30 = arith.constant 0 : i32
    %c0_i32_31 = arith.constant 0 : i32
    %25 = tpu.memref_slice %arg2[%24, %c0_i32_31] : memref<1001x512xf32, #tpu.memory_space<any>> -> memref<1x512xf32, #tpu.memory_space<any>>
    %c2_i32_32 = arith.constant 2 : i32
    %c0_i32_33 = arith.constant 0 : i32
    %26 = tpu.memref_slice %arg7[%c0_i32_29, %c2_i32_32, %c0_i32_33] : memref<2x8x512xf32, #tpu.memory_space<vmem>> -> memref<1x1x512xf32, #tpu.memory_space<vmem>>
    %27 = tpu.memref_squeeze %26 : memref<1x1x512xf32, #tpu.memory_space<vmem>> -> memref<1x512xf32, #tpu.memory_space<vmem>>
    %28 = tpu.memref_slice %arg8[%c2_i32, %c0_i32_30] : memref<8x2x!tpu.dma_semaphore, #tpu.memory_space<semaphore_mem>> -> memref<1x1x!tpu.dma_semaphore, #tpu.memory_space<semaphore_mem>>
    %29 = tpu.memref_squeeze %28 : memref<1x1x!tpu.dma_semaphore, #tpu.memory_space<semaphore_mem>> -> memref<!tpu.dma_semaphore, #tpu.memory_space<semaphore_mem>>
    tpu.enqueue_dma source(%25 : memref<1x512xf32, #tpu.memory_space<any>>) target(%27 : memref<1x512xf32, #tpu.memory_space<vmem>>) target_semaphore(%29 : memref<!tpu.dma_semaphore, #tpu.memory_space<semaphore_mem>>)
    %c1_34 = arith.constant 1 : index
    %c2_35 = arith.constant 2 : index
    %30 = memref.load %arg1[%c1_34, %c2_35] : memref<2x8xi32, #tpu.memory_space<smem>>
    %c1_i32_36 = arith.constant 1 : i32
    %c2_i32_37 = arith.constant 2 : i32
    %c1_i32_38 = arith.constant 1 : i32
    %c0_i32_39 = arith.constant 0 : i32
    %31 = tpu.memref_slice %arg2[%30, %c0_i32_39] : memref<1001x512xf32, #tpu.memory_space<any>> -> memref<1x512xf32, #tpu.memory_space<any>>
    %c2_i32_40 = arith.constant 2 : i32
    %c0_i32_41 = arith.constant 0 : i32
    %32 = tpu.memref_slice %arg7[%c1_i32_36, %c2_i32_40, %c0_i32_41] : memref<2x8x512xf32, #tpu.memory_space<vmem>> -> memref<1x1x512xf32, #tpu.memory_space<vmem>>
    %33 = tpu.memref_squeeze %32 : memref<1x1x512xf32, #tpu.memory_space<vmem>> -> memref<1x512xf32, #tpu.memory_space<vmem>>
    %34 = tpu.memref_slice %arg8[%c2_i32_37, %c1_i32_38] : memref<8x2x!tpu.dma_semaphore, #tpu.memory_space<semaphore_mem>> -> memref<1x1x!tpu.dma_semaphore, #tpu.memory_space<semaphore_mem>>
    %35 = tpu.memref_squeeze %34 : memref<1x1x!tpu.dma_semaphore, #tpu.memory_space<semaphore_mem>> -> memref<!tpu.dma_semaphore, #tpu.memory_space<semaphore_mem>>
    tpu.enqueue_dma source(%31 : memref<1x512xf32, #tpu.memory_space<any>>) target(%33 : memref<1x512xf32, #tpu.memory_space<vmem>>) target_semaphore(%35 : memref<!tpu.dma_semaphore, #tpu.memory_space<semaphore_mem>>)
    %c0_42 = arith.constant 0 : index
    %c3 = arith.constant 3 : index
    %36 = memref.load %arg1[%c0_42, %c3] : memref<2x8xi32, #tpu.memory_space<smem>>
    %c0_i32_43 = arith.constant 0 : i32
    %c3_i32 = arith.constant 3 : i32
    %c0_i32_44 = arith.constant 0 : i32
    %c0_i32_45 = arith.constant 0 : i32
    %37 = tpu.memref_slice %arg2[%36, %c0_i32_45] : memref<1001x512xf32, #tpu.memory_space<any>> -> memref<1x512xf32, #tpu.memory_space<any>>
    %c3_i32_46 = arith.constant 3 : i32
    %c0_i32_47 = arith.constant 0 : i32
    %38 = tpu.memref_slice %arg7[%c0_i32_43, %c3_i32_46, %c0_i32_47] : memref<2x8x512xf32, #tpu.memory_space<vmem>> -> memref<1x1x512xf32, #tpu.memory_space<vmem>>
    %39 = tpu.memref_squeeze %38 : memref<1x1x512xf32, #tpu.memory_space<vmem>> -> memref<1x512xf32, #tpu.memory_space<vmem>>
    %40 = tpu.memref_slice %arg8[%c3_i32, %c0_i32_44] : memref<8x2x!tpu.dma_semaphore, #tpu.memory_space<semaphore_mem>> -> memref<1x1x!tpu.dma_semaphore, #tpu.memory_space<semaphore_mem>>
    %41 = tpu.memref_squeeze %40 : memref<1x1x!tpu.dma_semaphore, #tpu.memory_space<semaphore_mem>> -> memref<!tpu.dma_semaphore, #tpu.memory_space<semaphore_mem>>
    tpu.enqueue_dma source(%37 : memref<1x512xf32, #tpu.memory_space<any>>) target(%39 : memref<1x512xf32, #tpu.memory_space<vmem>>) target_semaphore(%41 : memref<!tpu.dma_semaphore, #tpu.memory_space<semaphore_mem>>)
    %c1_48 = arith.constant 1 : index
    %c3_49 = arith.constant 3 : index
    %42 = memref.load %arg1[%c1_48, %c3_49] : memref<2x8xi32, #tpu.memory_space<smem>>
    %c1_i32_50 = arith.constant 1 : i32
    %c3_i32_51 = arith.constant 3 : i32
    %c1_i32_52 = arith.constant 1 : i32
    %c0_i32_53 = arith.constant 0 : i32
    %43 = tpu.memref_slice %arg2[%42, %c0_i32_53] : memref<1001x512xf32, #tpu.memory_space<any>> -> memref<1x512xf32, #tpu.memory_space<any>>
    %c3_i32_54 = arith.constant 3 : i32
    %c0_i32_55 = arith.constant 0 : i32
    %44 = tpu.memref_slice %arg7[%c1_i32_50, %c3_i32_54, %c0_i32_55] : memref<2x8x512xf32, #tpu.memory_space<vmem>> -> memref<1x1x512xf32, #tpu.memory_space<vmem>>
    %45 = tpu.memref_squeeze %44 : memref<1x1x512xf32, #tpu.memory_space<vmem>> -> memref<1x512xf32, #tpu.memory_space<vmem>>
    %46 = tpu.memref_slice %arg8[%c3_i32_51, %c1_i32_52] : memref<8x2x!tpu.dma_semaphore, #tpu.memory_space<semaphore_mem>> -> memref<1x1x!tpu.dma_semaphore, #tpu.memory_space<semaphore_mem>>
    %47 = tpu.memref_squeeze %46 : memref<1x1x!tpu.dma_semaphore, #tpu.memory_space<semaphore_mem>> -> memref<!tpu.dma_semaphore, #tpu.memory_space<semaphore_mem>>
    tpu.enqueue_dma source(%43 : memref<1x512xf32, #tpu.memory_space<any>>) target(%45 : memref<1x512xf32, #tpu.memory_space<vmem>>) target_semaphore(%47 : memref<!tpu.dma_semaphore, #tpu.memory_space<semaphore_mem>>)
    %c0_56 = arith.constant 0 : index
    %c4 = arith.constant 4 : index
    %48 = memref.load %arg1[%c0_56, %c4] : memref<2x8xi32, #tpu.memory_space<smem>>
    %c0_i32_57 = arith.constant 0 : i32
    %c4_i32 = arith.constant 4 : i32
    %c0_i32_58 = arith.constant 0 : i32
    %c0_i32_59 = arith.constant 0 : i32
    %49 = tpu.memref_slice %arg2[%48, %c0_i32_59] : memref<1001x512xf32, #tpu.memory_space<any>> -> memref<1x512xf32, #tpu.memory_space<any>>
    %c4_i32_60 = arith.constant 4 : i32
    %c0_i32_61 = arith.constant 0 : i32
    %50 = tpu.memref_slice %arg7[%c0_i32_57, %c4_i32_60, %c0_i32_61] : memref<2x8x512xf32, #tpu.memory_space<vmem>> -> memref<1x1x512xf32, #tpu.memory_space<vmem>>
    %51 = tpu.memref_squeeze %50 : memref<1x1x512xf32, #tpu.memory_space<vmem>> -> memref<1x512xf32, #tpu.memory_space<vmem>>
    %52 = tpu.memref_slice %arg8[%c4_i32, %c0_i32_58] : memref<8x2x!tpu.dma_semaphore, #tpu.memory_space<semaphore_mem>> -> memref<1x1x!tpu.dma_semaphore, #tpu.memory_space<semaphore_mem>>
    %53 = tpu.memref_squeeze %52 : memref<1x1x!tpu.dma_semaphore, #tpu.memory_space<semaphore_mem>> -> memref<!tpu.dma_semaphore, #tpu.memory_space<semaphore_mem>>
    tpu.enqueue_dma source(%49 : memref<1x512xf32, #tpu.memory_space<any>>) target(%51 : memref<1x512xf32, #tpu.memory_space<vmem>>) target_semaphore(%53 : memref<!tpu.dma_semaphore, #tpu.memory_space<semaphore_mem>>)
    %c1_62 = arith.constant 1 : index
    %c4_63 = arith.constant 4 : index
    %54 = memref.load %arg1[%c1_62, %c4_63] : memref<2x8xi32, #tpu.memory_space<smem>>
    %c1_i32_64 = arith.constant 1 : i32
    %c4_i32_65 = arith.constant 4 : i32
    %c1_i32_66 = arith.constant 1 : i32
    %c0_i32_67 = arith.constant 0 : i32
    %55 = tpu.memref_slice %arg2[%54, %c0_i32_67] : memref<1001x512xf32, #tpu.memory_space<any>> -> memref<1x512xf32, #tpu.memory_space<any>>
    %c4_i32_68 = arith.constant 4 : i32
    %c0_i32_69 = arith.constant 0 : i32
    %56 = tpu.memref_slice %arg7[%c1_i32_64, %c4_i32_68, %c0_i32_69] : memref<2x8x512xf32, #tpu.memory_space<vmem>> -> memref<1x1x512xf32, #tpu.memory_space<vmem>>
    %57 = tpu.memref_squeeze %56 : memref<1x1x512xf32, #tpu.memory_space<vmem>> -> memref<1x512xf32, #tpu.memory_space<vmem>>
    %58 = tpu.memref_slice %arg8[%c4_i32_65, %c1_i32_66] : memref<8x2x!tpu.dma_semaphore, #tpu.memory_space<semaphore_mem>> -> memref<1x1x!tpu.dma_semaphore, #tpu.memory_space<semaphore_mem>>
    %59 = tpu.memref_squeeze %58 : memref<1x1x!tpu.dma_semaphore, #tpu.memory_space<semaphore_mem>> -> memref<!tpu.dma_semaphore, #tpu.memory_space<semaphore_mem>>
    tpu.enqueue_dma source(%55 : memref<1x512xf32, #tpu.memory_space<any>>) target(%57 : memref<1x512xf32, #tpu.memory_space<vmem>>) target_semaphore(%59 : memref<!tpu.dma_semaphore, #tpu.memory_space<semaphore_mem>>)
    %c0_70 = arith.constant 0 : index
    %c5 = arith.constant 5 : index
    %60 = memref.load %arg1[%c0_70, %c5] : memref<2x8xi32, #tpu.memory_space<smem>>
    %c0_i32_71 = arith.constant 0 : i32
    %c5_i32 = arith.constant 5 : i32
    %c0_i32_72 = arith.constant 0 : i32
    %c0_i32_73 = arith.constant 0 : i32
    %61 = tpu.memref_slice %arg2[%60, %c0_i32_73] : memref<1001x512xf32, #tpu.memory_space<any>> -> memref<1x512xf32, #tpu.memory_space<any>>
    %c5_i32_74 = arith.constant 5 : i32
    %c0_i32_75 = arith.constant 0 : i32
    %62 = tpu.memref_slice %arg7[%c0_i32_71, %c5_i32_74, %c0_i32_75] : memref<2x8x512xf32, #tpu.memory_space<vmem>> -> memref<1x1x512xf32, #tpu.memory_space<vmem>>
    %63 = tpu.memref_squeeze %62 : memref<1x1x512xf32, #tpu.memory_space<vmem>> -> memref<1x512xf32, #tpu.memory_space<vmem>>
    %64 = tpu.memref_slice %arg8[%c5_i32, %c0_i32_72] : memref<8x2x!tpu.dma_semaphore, #tpu.memory_space<semaphore_mem>> -> memref<1x1x!tpu.dma_semaphore, #tpu.memory_space<semaphore_mem>>
    %65 = tpu.memref_squeeze %64 : memref<1x1x!tpu.dma_semaphore, #tpu.memory_space<semaphore_mem>> -> memref<!tpu.dma_semaphore, #tpu.memory_space<semaphore_mem>>
    tpu.enqueue_dma source(%61 : memref<1x512xf32, #tpu.memory_space<any>>) target(%63 : memref<1x512xf32, #tpu.memory_space<vmem>>) target_semaphore(%65 : memref<!tpu.dma_semaphore, #tpu.memory_space<semaphore_mem>>)
    %c1_76 = arith.constant 1 : index
    %c5_77 = arith.constant 5 : index
    %66 = memref.load %arg1[%c1_76, %c5_77] : memref<2x8xi32, #tpu.memory_space<smem>>
    %c1_i32_78 = arith.constant 1 : i32
    %c5_i32_79 = arith.constant 5 : i32
    %c1_i32_80 = arith.constant 1 : i32
    %c0_i32_81 = arith.constant 0 : i32
    %67 = tpu.memref_slice %arg2[%66, %c0_i32_81] : memref<1001x512xf32, #tpu.memory_space<any>> -> memref<1x512xf32, #tpu.memory_space<any>>
    %c5_i32_82 = arith.constant 5 : i32
    %c0_i32_83 = arith.constant 0 : i32
    %68 = tpu.memref_slice %arg7[%c1_i32_78, %c5_i32_82, %c0_i32_83] : memref<2x8x512xf32, #tpu.memory_space<vmem>> -> memref<1x1x512xf32, #tpu.memory_space<vmem>>
    %69 = tpu.memref_squeeze %68 : memref<1x1x512xf32, #tpu.memory_space<vmem>> -> memref<1x512xf32, #tpu.memory_space<vmem>>
    %70 = tpu.memref_slice %arg8[%c5_i32_79, %c1_i32_80] : memref<8x2x!tpu.dma_semaphore, #tpu.memory_space<semaphore_mem>> -> memref<1x1x!tpu.dma_semaphore, #tpu.memory_space<semaphore_mem>>
    %71 = tpu.memref_squeeze %70 : memref<1x1x!tpu.dma_semaphore, #tpu.memory_space<semaphore_mem>> -> memref<!tpu.dma_semaphore, #tpu.memory_space<semaphore_mem>>
    tpu.enqueue_dma source(%67 : memref<1x512xf32, #tpu.memory_space<any>>) target(%69 : memref<1x512xf32, #tpu.memory_space<vmem>>) target_semaphore(%71 : memref<!tpu.dma_semaphore, #tpu.memory_space<semaphore_mem>>)
    %c0_84 = arith.constant 0 : index
    %c6 = arith.constant 6 : index
    %72 = memref.load %arg1[%c0_84, %c6] : memref<2x8xi32, #tpu.memory_space<smem>>
    %c0_i32_85 = arith.constant 0 : i32
    %c6_i32 = arith.constant 6 : i32
    %c0_i32_86 = arith.constant 0 : i32
    %c0_i32_87 = arith.constant 0 : i32
    %73 = tpu.memref_slice %arg2[%72, %c0_i32_87] : memref<1001x512xf32, #tpu.memory_space<any>> -> memref<1x512xf32, #tpu.memory_space<any>>
    %c6_i32_88 = arith.constant 6 : i32
    %c0_i32_89 = arith.constant 0 : i32
    %74 = tpu.memref_slice %arg7[%c0_i32_85, %c6_i32_88, %c0_i32_89] : memref<2x8x512xf32, #tpu.memory_space<vmem>> -> memref<1x1x512xf32, #tpu.memory_space<vmem>>
    %75 = tpu.memref_squeeze %74 : memref<1x1x512xf32, #tpu.memory_space<vmem>> -> memref<1x512xf32, #tpu.memory_space<vmem>>
    %76 = tpu.memref_slice %arg8[%c6_i32, %c0_i32_86] : memref<8x2x!tpu.dma_semaphore, #tpu.memory_space<semaphore_mem>> -> memref<1x1x!tpu.dma_semaphore, #tpu.memory_space<semaphore_mem>>
    %77 = tpu.memref_squeeze %76 : memref<1x1x!tpu.dma_semaphore, #tpu.memory_space<semaphore_mem>> -> memref<!tpu.dma_semaphore, #tpu.memory_space<semaphore_mem>>
    tpu.enqueue_dma source(%73 : memref<1x512xf32, #tpu.memory_space<any>>) target(%75 : memref<1x512xf32, #tpu.memory_space<vmem>>) target_semaphore(%77 : memref<!tpu.dma_semaphore, #tpu.memory_space<semaphore_mem>>)
    %c1_90 = arith.constant 1 : index
    %c6_91 = arith.constant 6 : index
    %78 = memref.load %arg1[%c1_90, %c6_91] : memref<2x8xi32, #tpu.memory_space<smem>>
    %c1_i32_92 = arith.constant 1 : i32
    %c6_i32_93 = arith.constant 6 : i32
    %c1_i32_94 = arith.constant 1 : i32
    %c0_i32_95 = arith.constant 0 : i32
    %79 = tpu.memref_slice %arg2[%78, %c0_i32_95] : memref<1001x512xf32, #tpu.memory_space<any>> -> memref<1x512xf32, #tpu.memory_space<any>>
    %c6_i32_96 = arith.constant 6 : i32
    %c0_i32_97 = arith.constant 0 : i32
    %80 = tpu.memref_slice %arg7[%c1_i32_92, %c6_i32_96, %c0_i32_97] : memref<2x8x512xf32, #tpu.memory_space<vmem>> -> memref<1x1x512xf32, #tpu.memory_space<vmem>>
    %81 = tpu.memref_squeeze %80 : memref<1x1x512xf32, #tpu.memory_space<vmem>> -> memref<1x512xf32, #tpu.memory_space<vmem>>
    %82 = tpu.memref_slice %arg8[%c6_i32_93, %c1_i32_94] : memref<8x2x!tpu.dma_semaphore, #tpu.memory_space<semaphore_mem>> -> memref<1x1x!tpu.dma_semaphore, #tpu.memory_space<semaphore_mem>>
    %83 = tpu.memref_squeeze %82 : memref<1x1x!tpu.dma_semaphore, #tpu.memory_space<semaphore_mem>> -> memref<!tpu.dma_semaphore, #tpu.memory_space<semaphore_mem>>
    tpu.enqueue_dma source(%79 : memref<1x512xf32, #tpu.memory_space<any>>) target(%81 : memref<1x512xf32, #tpu.memory_space<vmem>>) target_semaphore(%83 : memref<!tpu.dma_semaphore, #tpu.memory_space<semaphore_mem>>)
    %c0_98 = arith.constant 0 : index
    %c7 = arith.constant 7 : index
    %84 = memref.load %arg1[%c0_98, %c7] : memref<2x8xi32, #tpu.memory_space<smem>>
    %c0_i32_99 = arith.constant 0 : i32
    %c7_i32 = arith.constant 7 : i32
    %c0_i32_100 = arith.constant 0 : i32
    %c0_i32_101 = arith.constant 0 : i32
    %85 = tpu.memref_slice %arg2[%84, %c0_i32_101] : memref<1001x512xf32, #tpu.memory_space<any>> -> memref<1x512xf32, #tpu.memory_space<any>>
    %c7_i32_102 = arith.constant 7 : i32
    %c0_i32_103 = arith.constant 0 : i32
    %86 = tpu.memref_slice %arg7[%c0_i32_99, %c7_i32_102, %c0_i32_103] : memref<2x8x512xf32, #tpu.memory_space<vmem>> -> memref<1x1x512xf32, #tpu.memory_space<vmem>>
    %87 = tpu.memref_squeeze %86 : memref<1x1x512xf32, #tpu.memory_space<vmem>> -> memref<1x512xf32, #tpu.memory_space<vmem>>
    %88 = tpu.memref_slice %arg8[%c7_i32, %c0_i32_100] : memref<8x2x!tpu.dma_semaphore, #tpu.memory_space<semaphore_mem>> -> memref<1x1x!tpu.dma_semaphore, #tpu.memory_space<semaphore_mem>>
    %89 = tpu.memref_squeeze %88 : memref<1x1x!tpu.dma_semaphore, #tpu.memory_space<semaphore_mem>> -> memref<!tpu.dma_semaphore, #tpu.memory_space<semaphore_mem>>
    tpu.enqueue_dma source(%85 : memref<1x512xf32, #tpu.memory_space<any>>) target(%87 : memref<1x512xf32, #tpu.memory_space<vmem>>) target_semaphore(%89 : memref<!tpu.dma_semaphore, #tpu.memory_space<semaphore_mem>>)
    %c1_104 = arith.constant 1 : index
    %c7_105 = arith.constant 7 : index
    %90 = memref.load %arg1[%c1_104, %c7_105] : memref<2x8xi32, #tpu.memory_space<smem>>
    %c1_i32_106 = arith.constant 1 : i32
    %c7_i32_107 = arith.constant 7 : i32
    %c1_i32_108 = arith.constant 1 : i32
    %c0_i32_109 = arith.constant 0 : i32
    %91 = tpu.memref_slice %arg2[%90, %c0_i32_109] : memref<1001x512xf32, #tpu.memory_space<any>> -> memref<1x512xf32, #tpu.memory_space<any>>
    %c7_i32_110 = arith.constant 7 : i32
    %c0_i32_111 = arith.constant 0 : i32
    %92 = tpu.memref_slice %arg7[%c1_i32_106, %c7_i32_110, %c0_i32_111] : memref<2x8x512xf32, #tpu.memory_space<vmem>> -> memref<1x1x512xf32, #tpu.memory_space<vmem>>
    %93 = tpu.memref_squeeze %92 : memref<1x1x512xf32, #tpu.memory_space<vmem>> -> memref<1x512xf32, #tpu.memory_space<vmem>>
    %94 = tpu.memref_slice %arg8[%c7_i32_107, %c1_i32_108] : memref<8x2x!tpu.dma_semaphore, #tpu.memory_space<semaphore_mem>> -> memref<1x1x!tpu.dma_semaphore, #tpu.memory_space<semaphore_mem>>
    %95 = tpu.memref_squeeze %94 : memref<1x1x!tpu.dma_semaphore, #tpu.memory_space<semaphore_mem>> -> memref<!tpu.dma_semaphore, #tpu.memory_space<semaphore_mem>>
    tpu.enqueue_dma source(%91 : memref<1x512xf32, #tpu.memory_space<any>>) target(%93 : memref<1x512xf32, #tpu.memory_space<vmem>>) target_semaphore(%95 : memref<!tpu.dma_semaphore, #tpu.memory_space<semaphore_mem>>)
    %cst = arith.constant 0.000000e+00 : f32
    %96 = vector.broadcast %cst : f32 to vector<2x128xf32>
    %cst_112 = arith.constant 0.000000e+00 : f32
    %97 = vector.broadcast %cst_112 : f32 to vector<2x128xf32>
    %c0_i32_113 = arith.constant 0 : i32
    %c0_i32_114 = arith.constant 0 : i32
    %c0_i32_115 = arith.constant 0 : i32
    %c0_i32_116 = arith.constant 0 : i32
    %c0_i32_117 = arith.constant 0 : i32
    %98 = tpu.memref_slice %arg2[%c0_i32_116, %c0_i32_117] : memref<1001x512xf32, #tpu.memory_space<any>> -> memref<1x512xf32, #tpu.memory_space<any>>
    %c0_i32_118 = arith.constant 0 : i32
    %c0_i32_119 = arith.constant 0 : i32
    %99 = tpu.memref_slice %arg7[%c0_i32_113, %c0_i32_118, %c0_i32_119] : memref<2x8x512xf32, #tpu.memory_space<vmem>> -> memref<1x1x512xf32, #tpu.memory_space<vmem>>
    %100 = tpu.memref_squeeze %99 : memref<1x1x512xf32, #tpu.memory_space<vmem>> -> memref<1x512xf32, #tpu.memory_space<vmem>>
    %101 = tpu.memref_slice %arg8[%c0_i32_114, %c0_i32_115] : memref<8x2x!tpu.dma_semaphore, #tpu.memory_space<semaphore_mem>> -> memref<1x1x!tpu.dma_semaphore, #tpu.memory_space<semaphore_mem>>
    %102 = tpu.memref_squeeze %101 : memref<1x1x!tpu.dma_semaphore, #tpu.memory_space<semaphore_mem>> -> memref<!tpu.dma_semaphore, #tpu.memory_space<semaphore_mem>>
    tpu.wait_dma2 semaphore(%102 : memref<!tpu.dma_semaphore, #tpu.memory_space<semaphore_mem>>) src(%98 : memref<1x512xf32, #tpu.memory_space<any>>) dst(%100 : memref<1x512xf32, #tpu.memory_space<vmem>>)
    %c1_i32_120 = arith.constant 1 : i32
    %c0_i32_121 = arith.constant 0 : i32
    %c1_i32_122 = arith.constant 1 : i32
    %c0_i32_123 = arith.constant 0 : i32
    %c0_i32_124 = arith.constant 0 : i32
    %103 = tpu.memref_slice %arg2[%c0_i32_123, %c0_i32_124] : memref<1001x512xf32, #tpu.memory_space<any>> -> memref<1x512xf32, #tpu.memory_space<any>>
    %c0_i32_125 = arith.constant 0 : i32
    %c0_i32_126 = arith.constant 0 : i32
    %104 = tpu.memref_slice %arg7[%c1_i32_120, %c0_i32_125, %c0_i32_126] : memref<2x8x512xf32, #tpu.memory_space<vmem>> -> memref<1x1x512xf32, #tpu.memory_space<vmem>>
    %105 = tpu.memref_squeeze %104 : memref<1x1x512xf32, #tpu.memory_space<vmem>> -> memref<1x512xf32, #tpu.memory_space<vmem>>
    %106 = tpu.memref_slice %arg8[%c0_i32_121, %c1_i32_122] : memref<8x2x!tpu.dma_semaphore, #tpu.memory_space<semaphore_mem>> -> memref<1x1x!tpu.dma_semaphore, #tpu.memory_space<semaphore_mem>>
    %107 = tpu.memref_squeeze %106 : memref<1x1x!tpu.dma_semaphore, #tpu.memory_space<semaphore_mem>> -> memref<!tpu.dma_semaphore, #tpu.memory_space<semaphore_mem>>
    tpu.wait_dma2 semaphore(%107 : memref<!tpu.dma_semaphore, #tpu.memory_space<semaphore_mem>>) src(%103 : memref<1x512xf32, #tpu.memory_space<any>>) dst(%105 : memref<1x512xf32, #tpu.memory_space<vmem>>)
    %c0_127 = arith.constant 0 : index
    %c0_128 = arith.constant 0 : index
    %c0_129 = arith.constant 0 : index
    %108 = vector.load %arg7[%c0_127, %c0_128, %c0_129] : memref<2x8x512xf32, #tpu.memory_space<vmem>>, vector<2x1x512xf32>
    %109 = vector.shape_cast %108 : vector<2x1x512xf32> to vector<2x512xf32>
    %110 = arith.truncf %96 : vector<2x128xf32> to vector<2x128xbf16>
    %c0_130 = arith.constant 0 : index
    %c0_131 = arith.constant 0 : index
    %111 = vector.load %arg3[%c0_130, %c0_131] : memref<128x512xbf16, #tpu.memory_space<vmem>>, vector<128x512xbf16>
    %cst_132 = arith.constant dense<0.000000e+00> : vector<2x512xf32>
    %112 = tpu.matmul %110, %111, %cst_132 {dimension_numbers = #tpu.dot_dimension_numbers<[1], [0], [0], [1], [0, 0, 1, 1], [], []>} : vector<2x128xbf16>, vector<128x512xbf16>, vector<2x512xf32> -> vector<2x512xf32>
    %113 = arith.addf %112, %109 : vector<2x512xf32>
    %114 = vector.extract_strided_slice %113 {offsets = [0, 0], sizes = [2, 384], strides = [1, 1]} : vector<2x512xf32> to vector<2x384xf32>
    %cst_133 = arith.constant 5.000000e-01 : f32
    %115 = vector.broadcast %cst_133 : f32 to vector<2x384xf32>
    %116 = arith.mulf %115, %114 : vector<2x384xf32>
    %117 = math.tanh %116 : vector<2x384xf32>
    %cst_134 = arith.constant 1.000000e+00 : f32
    %118 = vector.broadcast %cst_134 : f32 to vector<2x384xf32>
    %119 = arith.addf %117, %118 : vector<2x384xf32>
    %cst_135 = arith.constant 5.000000e-01 : f32
    %120 = vector.broadcast %cst_135 : f32 to vector<2x384xf32>
    %121 = arith.mulf %120, %119 : vector<2x384xf32>
    %122 = vector.extract_strided_slice %121 {offsets = [0, 0], sizes = [2, 128], strides = [1, 1]} : vector<2x384xf32> to vector<2x128xf32>
    %123 = vector.extract_strided_slice %121 {offsets = [0, 128], sizes = [2, 128], strides = [1, 1]} : vector<2x384xf32> to vector<2x128xf32>
    %124 = vector.extract_strided_slice %121 {offsets = [0, 256], sizes = [2, 128], strides = [1, 1]} : vector<2x384xf32> to vector<2x128xf32>
    %125 = vector.extract_strided_slice %113 {offsets = [0, 384], sizes = [2, 128], strides = [1, 1]} : vector<2x512xf32> to vector<2x128xf32>
    %126 = math.tanh %125 : vector<2x128xf32>
    %127 = arith.mulf %123, %97 : vector<2x128xf32>
    %128 = arith.mulf %122, %126 : vector<2x128xf32>
    %129 = arith.addf %127, %128 : vector<2x128xf32>
    %130 = math.tanh %129 : vector<2x128xf32>
    %131 = arith.mulf %124, %130 : vector<2x128xf32>
    %c0_i32_136 = arith.constant 0 : i32
    %c1_i32_137 = arith.constant 1 : i32
    %c0_i32_138 = arith.constant 0 : i32
    %c0_i32_139 = arith.constant 0 : i32
    %c0_i32_140 = arith.constant 0 : i32
    %132 = tpu.memref_slice %arg2[%c0_i32_139, %c0_i32_140] : memref<1001x512xf32, #tpu.memory_space<any>> -> memref<1x512xf32, #tpu.memory_space<any>>
    %c1_i32_141 = arith.constant 1 : i32
    %c0_i32_142 = arith.constant 0 : i32
    %133 = tpu.memref_slice %arg7[%c0_i32_136, %c1_i32_141, %c0_i32_142] : memref<2x8x512xf32, #tpu.memory_space<vmem>> -> memref<1x1x512xf32, #tpu.memory_space<vmem>>
    %134 = tpu.memref_squeeze %133 : memref<1x1x512xf32, #tpu.memory_space<vmem>> -> memref<1x512xf32, #tpu.memory_space<vmem>>
    %135 = tpu.memref_slice %arg8[%c1_i32_137, %c0_i32_138] : memref<8x2x!tpu.dma_semaphore, #tpu.memory_space<semaphore_mem>> -> memref<1x1x!tpu.dma_semaphore, #tpu.memory_space<semaphore_mem>>
    %136 = tpu.memref_squeeze %135 : memref<1x1x!tpu.dma_semaphore, #tpu.memory_space<semaphore_mem>> -> memref<!tpu.dma_semaphore, #tpu.memory_space<semaphore_mem>>
    tpu.wait_dma2 semaphore(%136 : memref<!tpu.dma_semaphore, #tpu.memory_space<semaphore_mem>>) src(%132 : memref<1x512xf32, #tpu.memory_space<any>>) dst(%134 : memref<1x512xf32, #tpu.memory_space<vmem>>)
    %c1_i32_143 = arith.constant 1 : i32
    %c1_i32_144 = arith.constant 1 : i32
    %c1_i32_145 = arith.constant 1 : i32
    %c0_i32_146 = arith.constant 0 : i32
    %c0_i32_147 = arith.constant 0 : i32
    %137 = tpu.memref_slice %arg2[%c0_i32_146, %c0_i32_147] : memref<1001x512xf32, #tpu.memory_space<any>> -> memref<1x512xf32, #tpu.memory_space<any>>
    %c1_i32_148 = arith.constant 1 : i32
    %c0_i32_149 = arith.constant 0 : i32
    %138 = tpu.memref_slice %arg7[%c1_i32_143, %c1_i32_148, %c0_i32_149] : memref<2x8x512xf32, #tpu.memory_space<vmem>> -> memref<1x1x512xf32, #tpu.memory_space<vmem>>
    %139 = tpu.memref_squeeze %138 : memref<1x1x512xf32, #tpu.memory_space<vmem>> -> memref<1x512xf32, #tpu.memory_space<vmem>>
    %140 = tpu.memref_slice %arg8[%c1_i32_144, %c1_i32_145] : memref<8x2x!tpu.dma_semaphore, #tpu.memory_space<semaphore_mem>> -> memref<1x1x!tpu.dma_semaphore, #tpu.memory_space<semaphore_mem>>
    %141 = tpu.memref_squeeze %140 : memref<1x1x!tpu.dma_semaphore, #tpu.memory_space<semaphore_mem>> -> memref<!tpu.dma_semaphore, #tpu.memory_space<semaphore_mem>>
    tpu.wait_dma2 semaphore(%141 : memref<!tpu.dma_semaphore, #tpu.memory_space<semaphore_mem>>) src(%137 : memref<1x512xf32, #tpu.memory_space<any>>) dst(%139 : memref<1x512xf32, #tpu.memory_space<vmem>>)
    %c0_150 = arith.constant 0 : index
    %c1_151 = arith.constant 1 : index
    %c0_152 = arith.constant 0 : index
    %142 = vector.load %arg7[%c0_150, %c1_151, %c0_152] : memref<2x8x512xf32, #tpu.memory_space<vmem>>, vector<2x1x512xf32>
    %143 = vector.shape_cast %142 : vector<2x1x512xf32> to vector<2x512xf32>
    %144 = arith.truncf %131 : vector<2x128xf32> to vector<2x128xbf16>
    %c0_153 = arith.constant 0 : index
    %c0_154 = arith.constant 0 : index
    %145 = vector.load %arg3[%c0_153, %c0_154] : memref<128x512xbf16, #tpu.memory_space<vmem>>, vector<128x512xbf16>
    %cst_155 = arith.constant dense<0.000000e+00> : vector<2x512xf32>
    %146 = tpu.matmul %144, %145, %cst_155 {dimension_numbers = #tpu.dot_dimension_numbers<[1], [0], [0], [1], [0, 0, 1, 1], [], []>} : vector<2x128xbf16>, vector<128x512xbf16>, vector<2x512xf32> -> vector<2x512xf32>
    %147 = arith.addf %146, %143 : vector<2x512xf32>
    %148 = vector.extract_strided_slice %147 {offsets = [0, 0], sizes = [2, 384], strides = [1, 1]} : vector<2x512xf32> to vector<2x384xf32>
    %cst_156 = arith.constant 5.000000e-01 : f32
    %149 = vector.broadcast %cst_156 : f32 to vector<2x384xf32>
    %150 = arith.mulf %149, %148 : vector<2x384xf32>
    %151 = math.tanh %150 : vector<2x384xf32>
    %cst_157 = arith.constant 1.000000e+00 : f32
    %152 = vector.broadcast %cst_157 : f32 to vector<2x384xf32>
    %153 = arith.addf %151, %152 : vector<2x384xf32>
    %cst_158 = arith.constant 5.000000e-01 : f32
    %154 = vector.broadcast %cst_158 : f32 to vector<2x384xf32>
    %155 = arith.mulf %154, %153 : vector<2x384xf32>
    %156 = vector.extract_strided_slice %155 {offsets = [0, 0], sizes = [2, 128], strides = [1, 1]} : vector<2x384xf32> to vector<2x128xf32>
    %157 = vector.extract_strided_slice %155 {offsets = [0, 128], sizes = [2, 128], strides = [1, 1]} : vector<2x384xf32> to vector<2x128xf32>
    %158 = vector.extract_strided_slice %155 {offsets = [0, 256], sizes = [2, 128], strides = [1, 1]} : vector<2x384xf32> to vector<2x128xf32>
    %159 = vector.extract_strided_slice %147 {offsets = [0, 384], sizes = [2, 128], strides = [1, 1]} : vector<2x512xf32> to vector<2x128xf32>
    %160 = math.tanh %159 : vector<2x128xf32>
    %161 = arith.mulf %157, %129 : vector<2x128xf32>
    %162 = arith.mulf %156, %160 : vector<2x128xf32>
    %163 = arith.addf %161, %162 : vector<2x128xf32>
    %164 = math.tanh %163 : vector<2x128xf32>
    %165 = arith.mulf %158, %164 : vector<2x128xf32>
    %c0_i32_159 = arith.constant 0 : i32
    %c2_i32_160 = arith.constant 2 : i32
    %c0_i32_161 = arith.constant 0 : i32
    %c0_i32_162 = arith.constant 0 : i32
    %c0_i32_163 = arith.constant 0 : i32
    %166 = tpu.memref_slice %arg2[%c0_i32_162, %c0_i32_163] : memref<1001x512xf32, #tpu.memory_space<any>> -> memref<1x512xf32, #tpu.memory_space<any>>
    %c2_i32_164 = arith.constant 2 : i32
    %c0_i32_165 = arith.constant 0 : i32
    %167 = tpu.memref_slice %arg7[%c0_i32_159, %c2_i32_164, %c0_i32_165] : memref<2x8x512xf32, #tpu.memory_space<vmem>> -> memref<1x1x512xf32, #tpu.memory_space<vmem>>
    %168 = tpu.memref_squeeze %167 : memref<1x1x512xf32, #tpu.memory_space<vmem>> -> memref<1x512xf32, #tpu.memory_space<vmem>>
    %169 = tpu.memref_slice %arg8[%c2_i32_160, %c0_i32_161] : memref<8x2x!tpu.dma_semaphore, #tpu.memory_space<semaphore_mem>> -> memref<1x1x!tpu.dma_semaphore, #tpu.memory_space<semaphore_mem>>
    %170 = tpu.memref_squeeze %169 : memref<1x1x!tpu.dma_semaphore, #tpu.memory_space<semaphore_mem>> -> memref<!tpu.dma_semaphore, #tpu.memory_space<semaphore_mem>>
    tpu.wait_dma2 semaphore(%170 : memref<!tpu.dma_semaphore, #tpu.memory_space<semaphore_mem>>) src(%166 : memref<1x512xf32, #tpu.memory_space<any>>) dst(%168 : memref<1x512xf32, #tpu.memory_space<vmem>>)
    %c1_i32_166 = arith.constant 1 : i32
    %c2_i32_167 = arith.constant 2 : i32
    %c1_i32_168 = arith.constant 1 : i32
    %c0_i32_169 = arith.constant 0 : i32
    %c0_i32_170 = arith.constant 0 : i32
    %171 = tpu.memref_slice %arg2[%c0_i32_169, %c0_i32_170] : memref<1001x512xf32, #tpu.memory_space<any>> -> memref<1x512xf32, #tpu.memory_space<any>>
    %c2_i32_171 = arith.constant 2 : i32
    %c0_i32_172 = arith.constant 0 : i32
    %172 = tpu.memref_slice %arg7[%c1_i32_166, %c2_i32_171, %c0_i32_172] : memref<2x8x512xf32, #tpu.memory_space<vmem>> -> memref<1x1x512xf32, #tpu.memory_space<vmem>>
    %173 = tpu.memref_squeeze %172 : memref<1x1x512xf32, #tpu.memory_space<vmem>> -> memref<1x512xf32, #tpu.memory_space<vmem>>
    %174 = tpu.memref_slice %arg8[%c2_i32_167, %c1_i32_168] : memref<8x2x!tpu.dma_semaphore, #tpu.memory_space<semaphore_mem>> -> memref<1x1x!tpu.dma_semaphore, #tpu.memory_space<semaphore_mem>>
    %175 = tpu.memref_squeeze %174 : memref<1x1x!tpu.dma_semaphore, #tpu.memory_space<semaphore_mem>> -> memref<!tpu.dma_semaphore, #tpu.memory_space<semaphore_mem>>
    tpu.wait_dma2 semaphore(%175 : memref<!tpu.dma_semaphore, #tpu.memory_space<semaphore_mem>>) src(%171 : memref<1x512xf32, #tpu.memory_space<any>>) dst(%173 : memref<1x512xf32, #tpu.memory_space<vmem>>)
    %c0_173 = arith.constant 0 : index
    %c2_174 = arith.constant 2 : index
    %c0_175 = arith.constant 0 : index
    %176 = vector.load %arg7[%c0_173, %c2_174, %c0_175] : memref<2x8x512xf32, #tpu.memory_space<vmem>>, vector<2x1x512xf32>
    %177 = vector.shape_cast %176 : vector<2x1x512xf32> to vector<2x512xf32>
    %178 = arith.truncf %165 : vector<2x128xf32> to vector<2x128xbf16>
    %c0_176 = arith.constant 0 : index
    %c0_177 = arith.constant 0 : index
    %179 = vector.load %arg3[%c0_176, %c0_177] : memref<128x512xbf16, #tpu.memory_space<vmem>>, vector<128x512xbf16>
    %cst_178 = arith.constant dense<0.000000e+00> : vector<2x512xf32>
    %180 = tpu.matmul %178, %179, %cst_178 {dimension_numbers = #tpu.dot_dimension_numbers<[1], [0], [0], [1], [0, 0, 1, 1], [], []>} : vector<2x128xbf16>, vector<128x512xbf16>, vector<2x512xf32> -> vector<2x512xf32>
    %181 = arith.addf %180, %177 : vector<2x512xf32>
    %182 = vector.extract_strided_slice %181 {offsets = [0, 0], sizes = [2, 384], strides = [1, 1]} : vector<2x512xf32> to vector<2x384xf32>
    %cst_179 = arith.constant 5.000000e-01 : f32
    %183 = vector.broadcast %cst_179 : f32 to vector<2x384xf32>
    %184 = arith.mulf %183, %182 : vector<2x384xf32>
    %185 = math.tanh %184 : vector<2x384xf32>
    %cst_180 = arith.constant 1.000000e+00 : f32
    %186 = vector.broadcast %cst_180 : f32 to vector<2x384xf32>
    %187 = arith.addf %185, %186 : vector<2x384xf32>
    %cst_181 = arith.constant 5.000000e-01 : f32
    %188 = vector.broadcast %cst_181 : f32 to vector<2x384xf32>
    %189 = arith.mulf %188, %187 : vector<2x384xf32>
    %190 = vector.extract_strided_slice %189 {offsets = [0, 0], sizes = [2, 128], strides = [1, 1]} : vector<2x384xf32> to vector<2x128xf32>
    %191 = vector.extract_strided_slice %189 {offsets = [0, 128], sizes = [2, 128], strides = [1, 1]} : vector<2x384xf32> to vector<2x128xf32>
    %192 = vector.extract_strided_slice %189 {offsets = [0, 256], sizes = [2, 128], strides = [1, 1]} : vector<2x384xf32> to vector<2x128xf32>
    %193 = vector.extract_strided_slice %181 {offsets = [0, 384], sizes = [2, 128], strides = [1, 1]} : vector<2x512xf32> to vector<2x128xf32>
    %194 = math.tanh %193 : vector<2x128xf32>
    %195 = arith.mulf %191, %163 : vector<2x128xf32>
    %196 = arith.mulf %190, %194 : vector<2x128xf32>
    %197 = arith.addf %195, %196 : vector<2x128xf32>
    %198 = math.tanh %197 : vector<2x128xf32>
    %199 = arith.mulf %192, %198 : vector<2x128xf32>
    %c0_i32_182 = arith.constant 0 : i32
    %c3_i32_183 = arith.constant 3 : i32
    %c0_i32_184 = arith.constant 0 : i32
    %c0_i32_185 = arith.constant 0 : i32
    %c0_i32_186 = arith.constant 0 : i32
    %200 = tpu.memref_slice %arg2[%c0_i32_185, %c0_i32_186] : memref<1001x512xf32, #tpu.memory_space<any>> -> memref<1x512xf32, #tpu.memory_space<any>>
    %c3_i32_187 = arith.constant 3 : i32
    %c0_i32_188 = arith.constant 0 : i32
    %201 = tpu.memref_slice %arg7[%c0_i32_182, %c3_i32_187, %c0_i32_188] : memref<2x8x512xf32, #tpu.memory_space<vmem>> -> memref<1x1x512xf32, #tpu.memory_space<vmem>>
    %202 = tpu.memref_squeeze %201 : memref<1x1x512xf32, #tpu.memory_space<vmem>> -> memref<1x512xf32, #tpu.memory_space<vmem>>
    %203 = tpu.memref_slice %arg8[%c3_i32_183, %c0_i32_184] : memref<8x2x!tpu.dma_semaphore, #tpu.memory_space<semaphore_mem>> -> memref<1x1x!tpu.dma_semaphore, #tpu.memory_space<semaphore_mem>>
    %204 = tpu.memref_squeeze %203 : memref<1x1x!tpu.dma_semaphore, #tpu.memory_space<semaphore_mem>> -> memref<!tpu.dma_semaphore, #tpu.memory_space<semaphore_mem>>
    tpu.wait_dma2 semaphore(%204 : memref<!tpu.dma_semaphore, #tpu.memory_space<semaphore_mem>>) src(%200 : memref<1x512xf32, #tpu.memory_space<any>>) dst(%202 : memref<1x512xf32, #tpu.memory_space<vmem>>)
    %c1_i32_189 = arith.constant 1 : i32
    %c3_i32_190 = arith.constant 3 : i32
    %c1_i32_191 = arith.constant 1 : i32
    %c0_i32_192 = arith.constant 0 : i32
    %c0_i32_193 = arith.constant 0 : i32
    %205 = tpu.memref_slice %arg2[%c0_i32_192, %c0_i32_193] : memref<1001x512xf32, #tpu.memory_space<any>> -> memref<1x512xf32, #tpu.memory_space<any>>
    %c3_i32_194 = arith.constant 3 : i32
    %c0_i32_195 = arith.constant 0 : i32
    %206 = tpu.memref_slice %arg7[%c1_i32_189, %c3_i32_194, %c0_i32_195] : memref<2x8x512xf32, #tpu.memory_space<vmem>> -> memref<1x1x512xf32, #tpu.memory_space<vmem>>
    %207 = tpu.memref_squeeze %206 : memref<1x1x512xf32, #tpu.memory_space<vmem>> -> memref<1x512xf32, #tpu.memory_space<vmem>>
    %208 = tpu.memref_slice %arg8[%c3_i32_190, %c1_i32_191] : memref<8x2x!tpu.dma_semaphore, #tpu.memory_space<semaphore_mem>> -> memref<1x1x!tpu.dma_semaphore, #tpu.memory_space<semaphore_mem>>
    %209 = tpu.memref_squeeze %208 : memref<1x1x!tpu.dma_semaphore, #tpu.memory_space<semaphore_mem>> -> memref<!tpu.dma_semaphore, #tpu.memory_space<semaphore_mem>>
    tpu.wait_dma2 semaphore(%209 : memref<!tpu.dma_semaphore, #tpu.memory_space<semaphore_mem>>) src(%205 : memref<1x512xf32, #tpu.memory_space<any>>) dst(%207 : memref<1x512xf32, #tpu.memory_space<vmem>>)
    %c0_196 = arith.constant 0 : index
    %c3_197 = arith.constant 3 : index
    %c0_198 = arith.constant 0 : index
    %210 = vector.load %arg7[%c0_196, %c3_197, %c0_198] : memref<2x8x512xf32, #tpu.memory_space<vmem>>, vector<2x1x512xf32>
    %211 = vector.shape_cast %210 : vector<2x1x512xf32> to vector<2x512xf32>
    %212 = arith.truncf %199 : vector<2x128xf32> to vector<2x128xbf16>
    %c0_199 = arith.constant 0 : index
    %c0_200 = arith.constant 0 : index
    %213 = vector.load %arg3[%c0_199, %c0_200] : memref<128x512xbf16, #tpu.memory_space<vmem>>, vector<128x512xbf16>
    %cst_201 = arith.constant dense<0.000000e+00> : vector<2x512xf32>
    %214 = tpu.matmul %212, %213, %cst_201 {dimension_numbers = #tpu.dot_dimension_numbers<[1], [0], [0], [1], [0, 0, 1, 1], [], []>} : vector<2x128xbf16>, vector<128x512xbf16>, vector<2x512xf32> -> vector<2x512xf32>
    %215 = arith.addf %214, %211 : vector<2x512xf32>
    %216 = vector.extract_strided_slice %215 {offsets = [0, 0], sizes = [2, 384], strides = [1, 1]} : vector<2x512xf32> to vector<2x384xf32>
    %cst_202 = arith.constant 5.000000e-01 : f32
    %217 = vector.broadcast %cst_202 : f32 to vector<2x384xf32>
    %218 = arith.mulf %217, %216 : vector<2x384xf32>
    %219 = math.tanh %218 : vector<2x384xf32>
    %cst_203 = arith.constant 1.000000e+00 : f32
    %220 = vector.broadcast %cst_203 : f32 to vector<2x384xf32>
    %221 = arith.addf %219, %220 : vector<2x384xf32>
    %cst_204 = arith.constant 5.000000e-01 : f32
    %222 = vector.broadcast %cst_204 : f32 to vector<2x384xf32>
    %223 = arith.mulf %222, %221 : vector<2x384xf32>
    %224 = vector.extract_strided_slice %223 {offsets = [0, 0], sizes = [2, 128], strides = [1, 1]} : vector<2x384xf32> to vector<2x128xf32>
    %225 = vector.extract_strided_slice %223 {offsets = [0, 128], sizes = [2, 128], strides = [1, 1]} : vector<2x384xf32> to vector<2x128xf32>
    %226 = vector.extract_strided_slice %223 {offsets = [0, 256], sizes = [2, 128], strides = [1, 1]} : vector<2x384xf32> to vector<2x128xf32>
    %227 = vector.extract_strided_slice %215 {offsets = [0, 384], sizes = [2, 128], strides = [1, 1]} : vector<2x512xf32> to vector<2x128xf32>
    %228 = math.tanh %227 : vector<2x128xf32>
    %229 = arith.mulf %225, %197 : vector<2x128xf32>
    %230 = arith.mulf %224, %228 : vector<2x128xf32>
    %231 = arith.addf %229, %230 : vector<2x128xf32>
    %232 = math.tanh %231 : vector<2x128xf32>
    %233 = arith.mulf %226, %232 : vector<2x128xf32>
    %c0_i32_205 = arith.constant 0 : i32
    %c4_i32_206 = arith.constant 4 : i32
    %c0_i32_207 = arith.constant 0 : i32
    %c0_i32_208 = arith.constant 0 : i32
    %c0_i32_209 = arith.constant 0 : i32
    %234 = tpu.memref_slice %arg2[%c0_i32_208, %c0_i32_209] : memref<1001x512xf32, #tpu.memory_space<any>> -> memref<1x512xf32, #tpu.memory_space<any>>
    %c4_i32_210 = arith.constant 4 : i32
    %c0_i32_211 = arith.constant 0 : i32
    %235 = tpu.memref_slice %arg7[%c0_i32_205, %c4_i32_210, %c0_i32_211] : memref<2x8x512xf32, #tpu.memory_space<vmem>> -> memref<1x1x512xf32, #tpu.memory_space<vmem>>
    %236 = tpu.memref_squeeze %235 : memref<1x1x512xf32, #tpu.memory_space<vmem>> -> memref<1x512xf32, #tpu.memory_space<vmem>>
    %237 = tpu.memref_slice %arg8[%c4_i32_206, %c0_i32_207] : memref<8x2x!tpu.dma_semaphore, #tpu.memory_space<semaphore_mem>> -> memref<1x1x!tpu.dma_semaphore, #tpu.memory_space<semaphore_mem>>
    %238 = tpu.memref_squeeze %237 : memref<1x1x!tpu.dma_semaphore, #tpu.memory_space<semaphore_mem>> -> memref<!tpu.dma_semaphore, #tpu.memory_space<semaphore_mem>>
    tpu.wait_dma2 semaphore(%238 : memref<!tpu.dma_semaphore, #tpu.memory_space<semaphore_mem>>) src(%234 : memref<1x512xf32, #tpu.memory_space<any>>) dst(%236 : memref<1x512xf32, #tpu.memory_space<vmem>>)
    %c1_i32_212 = arith.constant 1 : i32
    %c4_i32_213 = arith.constant 4 : i32
    %c1_i32_214 = arith.constant 1 : i32
    %c0_i32_215 = arith.constant 0 : i32
    %c0_i32_216 = arith.constant 0 : i32
    %239 = tpu.memref_slice %arg2[%c0_i32_215, %c0_i32_216] : memref<1001x512xf32, #tpu.memory_space<any>> -> memref<1x512xf32, #tpu.memory_space<any>>
    %c4_i32_217 = arith.constant 4 : i32
    %c0_i32_218 = arith.constant 0 : i32
    %240 = tpu.memref_slice %arg7[%c1_i32_212, %c4_i32_217, %c0_i32_218] : memref<2x8x512xf32, #tpu.memory_space<vmem>> -> memref<1x1x512xf32, #tpu.memory_space<vmem>>
    %241 = tpu.memref_squeeze %240 : memref<1x1x512xf32, #tpu.memory_space<vmem>> -> memref<1x512xf32, #tpu.memory_space<vmem>>
    %242 = tpu.memref_slice %arg8[%c4_i32_213, %c1_i32_214] : memref<8x2x!tpu.dma_semaphore, #tpu.memory_space<semaphore_mem>> -> memref<1x1x!tpu.dma_semaphore, #tpu.memory_space<semaphore_mem>>
    %243 = tpu.memref_squeeze %242 : memref<1x1x!tpu.dma_semaphore, #tpu.memory_space<semaphore_mem>> -> memref<!tpu.dma_semaphore, #tpu.memory_space<semaphore_mem>>
    tpu.wait_dma2 semaphore(%243 : memref<!tpu.dma_semaphore, #tpu.memory_space<semaphore_mem>>) src(%239 : memref<1x512xf32, #tpu.memory_space<any>>) dst(%241 : memref<1x512xf32, #tpu.memory_space<vmem>>)
    %c0_219 = arith.constant 0 : index
    %c4_220 = arith.constant 4 : index
    %c0_221 = arith.constant 0 : index
    %244 = vector.load %arg7[%c0_219, %c4_220, %c0_221] : memref<2x8x512xf32, #tpu.memory_space<vmem>>, vector<2x1x512xf32>
    %245 = vector.shape_cast %244 : vector<2x1x512xf32> to vector<2x512xf32>
    %246 = arith.truncf %233 : vector<2x128xf32> to vector<2x128xbf16>
    %c0_222 = arith.constant 0 : index
    %c0_223 = arith.constant 0 : index
    %247 = vector.load %arg3[%c0_222, %c0_223] : memref<128x512xbf16, #tpu.memory_space<vmem>>, vector<128x512xbf16>
    %cst_224 = arith.constant dense<0.000000e+00> : vector<2x512xf32>
    %248 = tpu.matmul %246, %247, %cst_224 {dimension_numbers = #tpu.dot_dimension_numbers<[1], [0], [0], [1], [0, 0, 1, 1], [], []>} : vector<2x128xbf16>, vector<128x512xbf16>, vector<2x512xf32> -> vector<2x512xf32>
    %249 = arith.addf %248, %245 : vector<2x512xf32>
    %250 = vector.extract_strided_slice %249 {offsets = [0, 0], sizes = [2, 384], strides = [1, 1]} : vector<2x512xf32> to vector<2x384xf32>
    %cst_225 = arith.constant 5.000000e-01 : f32
    %251 = vector.broadcast %cst_225 : f32 to vector<2x384xf32>
    %252 = arith.mulf %251, %250 : vector<2x384xf32>
    %253 = math.tanh %252 : vector<2x384xf32>
    %cst_226 = arith.constant 1.000000e+00 : f32
    %254 = vector.broadcast %cst_226 : f32 to vector<2x384xf32>
    %255 = arith.addf %253, %254 : vector<2x384xf32>
    %cst_227 = arith.constant 5.000000e-01 : f32
    %256 = vector.broadcast %cst_227 : f32 to vector<2x384xf32>
    %257 = arith.mulf %256, %255 : vector<2x384xf32>
    %258 = vector.extract_strided_slice %257 {offsets = [0, 0], sizes = [2, 128], strides = [1, 1]} : vector<2x384xf32> to vector<2x128xf32>
    %259 = vector.extract_strided_slice %257 {offsets = [0, 128], sizes = [2, 128], strides = [1, 1]} : vector<2x384xf32> to vector<2x128xf32>
    %260 = vector.extract_strided_slice %257 {offsets = [0, 256], sizes = [2, 128], strides = [1, 1]} : vector<2x384xf32> to vector<2x128xf32>
    %261 = vector.extract_strided_slice %249 {offsets = [0, 384], sizes = [2, 128], strides = [1, 1]} : vector<2x512xf32> to vector<2x128xf32>
    %262 = math.tanh %261 : vector<2x128xf32>
    %263 = arith.mulf %259, %231 : vector<2x128xf32>
    %264 = arith.mulf %258, %262 : vector<2x128xf32>
    %265 = arith.addf %263, %264 : vector<2x128xf32>
    %266 = math.tanh %265 : vector<2x128xf32>
    %267 = arith.mulf %260, %266 : vector<2x128xf32>
    %c0_i32_228 = arith.constant 0 : i32
    %c5_i32_229 = arith.constant 5 : i32
    %c0_i32_230 = arith.constant 0 : i32
    %c0_i32_231 = arith.constant 0 : i32
    %c0_i32_232 = arith.constant 0 : i32
    %268 = tpu.memref_slice %arg2[%c0_i32_231, %c0_i32_232] : memref<1001x512xf32, #tpu.memory_space<any>> -> memref<1x512xf32, #tpu.memory_space<any>>
    %c5_i32_233 = arith.constant 5 : i32
    %c0_i32_234 = arith.constant 0 : i32
    %269 = tpu.memref_slice %arg7[%c0_i32_228, %c5_i32_233, %c0_i32_234] : memref<2x8x512xf32, #tpu.memory_space<vmem>> -> memref<1x1x512xf32, #tpu.memory_space<vmem>>
    %270 = tpu.memref_squeeze %269 : memref<1x1x512xf32, #tpu.memory_space<vmem>> -> memref<1x512xf32, #tpu.memory_space<vmem>>
    %271 = tpu.memref_slice %arg8[%c5_i32_229, %c0_i32_230] : memref<8x2x!tpu.dma_semaphore, #tpu.memory_space<semaphore_mem>> -> memref<1x1x!tpu.dma_semaphore, #tpu.memory_space<semaphore_mem>>
    %272 = tpu.memref_squeeze %271 : memref<1x1x!tpu.dma_semaphore, #tpu.memory_space<semaphore_mem>> -> memref<!tpu.dma_semaphore, #tpu.memory_space<semaphore_mem>>
    tpu.wait_dma2 semaphore(%272 : memref<!tpu.dma_semaphore, #tpu.memory_space<semaphore_mem>>) src(%268 : memref<1x512xf32, #tpu.memory_space<any>>) dst(%270 : memref<1x512xf32, #tpu.memory_space<vmem>>)
    %c1_i32_235 = arith.constant 1 : i32
    %c5_i32_236 = arith.constant 5 : i32
    %c1_i32_237 = arith.constant 1 : i32
    %c0_i32_238 = arith.constant 0 : i32
    %c0_i32_239 = arith.constant 0 : i32
    %273 = tpu.memref_slice %arg2[%c0_i32_238, %c0_i32_239] : memref<1001x512xf32, #tpu.memory_space<any>> -> memref<1x512xf32, #tpu.memory_space<any>>
    %c5_i32_240 = arith.constant 5 : i32
    %c0_i32_241 = arith.constant 0 : i32
    %274 = tpu.memref_slice %arg7[%c1_i32_235, %c5_i32_240, %c0_i32_241] : memref<2x8x512xf32, #tpu.memory_space<vmem>> -> memref<1x1x512xf32, #tpu.memory_space<vmem>>
    %275 = tpu.memref_squeeze %274 : memref<1x1x512xf32, #tpu.memory_space<vmem>> -> memref<1x512xf32, #tpu.memory_space<vmem>>
    %276 = tpu.memref_slice %arg8[%c5_i32_236, %c1_i32_237] : memref<8x2x!tpu.dma_semaphore, #tpu.memory_space<semaphore_mem>> -> memref<1x1x!tpu.dma_semaphore, #tpu.memory_space<semaphore_mem>>
    %277 = tpu.memref_squeeze %276 : memref<1x1x!tpu.dma_semaphore, #tpu.memory_space<semaphore_mem>> -> memref<!tpu.dma_semaphore, #tpu.memory_space<semaphore_mem>>
    tpu.wait_dma2 semaphore(%277 : memref<!tpu.dma_semaphore, #tpu.memory_space<semaphore_mem>>) src(%273 : memref<1x512xf32, #tpu.memory_space<any>>) dst(%275 : memref<1x512xf32, #tpu.memory_space<vmem>>)
    %c0_242 = arith.constant 0 : index
    %c5_243 = arith.constant 5 : index
    %c0_244 = arith.constant 0 : index
    %278 = vector.load %arg7[%c0_242, %c5_243, %c0_244] : memref<2x8x512xf32, #tpu.memory_space<vmem>>, vector<2x1x512xf32>
    %279 = vector.shape_cast %278 : vector<2x1x512xf32> to vector<2x512xf32>
    %280 = arith.truncf %267 : vector<2x128xf32> to vector<2x128xbf16>
    %c0_245 = arith.constant 0 : index
    %c0_246 = arith.constant 0 : index
    %281 = vector.load %arg3[%c0_245, %c0_246] : memref<128x512xbf16, #tpu.memory_space<vmem>>, vector<128x512xbf16>
    %cst_247 = arith.constant dense<0.000000e+00> : vector<2x512xf32>
    %282 = tpu.matmul %280, %281, %cst_247 {dimension_numbers = #tpu.dot_dimension_numbers<[1], [0], [0], [1], [0, 0, 1, 1], [], []>} : vector<2x128xbf16>, vector<128x512xbf16>, vector<2x512xf32> -> vector<2x512xf32>
    %283 = arith.addf %282, %279 : vector<2x512xf32>
    %284 = vector.extract_strided_slice %283 {offsets = [0, 0], sizes = [2, 384], strides = [1, 1]} : vector<2x512xf32> to vector<2x384xf32>
    %cst_248 = arith.constant 5.000000e-01 : f32
    %285 = vector.broadcast %cst_248 : f32 to vector<2x384xf32>
    %286 = arith.mulf %285, %284 : vector<2x384xf32>
    %287 = math.tanh %286 : vector<2x384xf32>
    %cst_249 = arith.constant 1.000000e+00 : f32
    %288 = vector.broadcast %cst_249 : f32 to vector<2x384xf32>
    %289 = arith.addf %287, %288 : vector<2x384xf32>
    %cst_250 = arith.constant 5.000000e-01 : f32
    %290 = vector.broadcast %cst_250 : f32 to vector<2x384xf32>
    %291 = arith.mulf %290, %289 : vector<2x384xf32>
    %292 = vector.extract_strided_slice %291 {offsets = [0, 0], sizes = [2, 128], strides = [1, 1]} : vector<2x384xf32> to vector<2x128xf32>
    %293 = vector.extract_strided_slice %291 {offsets = [0, 128], sizes = [2, 128], strides = [1, 1]} : vector<2x384xf32> to vector<2x128xf32>
    %294 = vector.extract_strided_slice %291 {offsets = [0, 256], sizes = [2, 128], strides = [1, 1]} : vector<2x384xf32> to vector<2x128xf32>
    %295 = vector.extract_strided_slice %283 {offsets = [0, 384], sizes = [2, 128], strides = [1, 1]} : vector<2x512xf32> to vector<2x128xf32>
    %296 = math.tanh %295 : vector<2x128xf32>
    %297 = arith.mulf %293, %265 : vector<2x128xf32>
    %298 = arith.mulf %292, %296 : vector<2x128xf32>
    %299 = arith.addf %297, %298 : vector<2x128xf32>
    %300 = math.tanh %299 : vector<2x128xf32>
    %301 = arith.mulf %294, %300 : vector<2x128xf32>
    %c0_i32_251 = arith.constant 0 : i32
    %c6_i32_252 = arith.constant 6 : i32
    %c0_i32_253 = arith.constant 0 : i32
    %c0_i32_254 = arith.constant 0 : i32
    %c0_i32_255 = arith.constant 0 : i32
    %302 = tpu.memref_slice %arg2[%c0_i32_254, %c0_i32_255] : memref<1001x512xf32, #tpu.memory_space<any>> -> memref<1x512xf32, #tpu.memory_space<any>>
    %c6_i32_256 = arith.constant 6 : i32
    %c0_i32_257 = arith.constant 0 : i32
    %303 = tpu.memref_slice %arg7[%c0_i32_251, %c6_i32_256, %c0_i32_257] : memref<2x8x512xf32, #tpu.memory_space<vmem>> -> memref<1x1x512xf32, #tpu.memory_space<vmem>>
    %304 = tpu.memref_squeeze %303 : memref<1x1x512xf32, #tpu.memory_space<vmem>> -> memref<1x512xf32, #tpu.memory_space<vmem>>
    %305 = tpu.memref_slice %arg8[%c6_i32_252, %c0_i32_253] : memref<8x2x!tpu.dma_semaphore, #tpu.memory_space<semaphore_mem>> -> memref<1x1x!tpu.dma_semaphore, #tpu.memory_space<semaphore_mem>>
    %306 = tpu.memref_squeeze %305 : memref<1x1x!tpu.dma_semaphore, #tpu.memory_space<semaphore_mem>> -> memref<!tpu.dma_semaphore, #tpu.memory_space<semaphore_mem>>
    tpu.wait_dma2 semaphore(%306 : memref<!tpu.dma_semaphore, #tpu.memory_space<semaphore_mem>>) src(%302 : memref<1x512xf32, #tpu.memory_space<any>>) dst(%304 : memref<1x512xf32, #tpu.memory_space<vmem>>)
    %c1_i32_258 = arith.constant 1 : i32
    %c6_i32_259 = arith.constant 6 : i32
    %c1_i32_260 = arith.constant 1 : i32
    %c0_i32_261 = arith.constant 0 : i32
    %c0_i32_262 = arith.constant 0 : i32
    %307 = tpu.memref_slice %arg2[%c0_i32_261, %c0_i32_262] : memref<1001x512xf32, #tpu.memory_space<any>> -> memref<1x512xf32, #tpu.memory_space<any>>
    %c6_i32_263 = arith.constant 6 : i32
    %c0_i32_264 = arith.constant 0 : i32
    %308 = tpu.memref_slice %arg7[%c1_i32_258, %c6_i32_263, %c0_i32_264] : memref<2x8x512xf32, #tpu.memory_space<vmem>> -> memref<1x1x512xf32, #tpu.memory_space<vmem>>
    %309 = tpu.memref_squeeze %308 : memref<1x1x512xf32, #tpu.memory_space<vmem>> -> memref<1x512xf32, #tpu.memory_space<vmem>>
    %310 = tpu.memref_slice %arg8[%c6_i32_259, %c1_i32_260] : memref<8x2x!tpu.dma_semaphore, #tpu.memory_space<semaphore_mem>> -> memref<1x1x!tpu.dma_semaphore, #tpu.memory_space<semaphore_mem>>
    %311 = tpu.memref_squeeze %310 : memref<1x1x!tpu.dma_semaphore, #tpu.memory_space<semaphore_mem>> -> memref<!tpu.dma_semaphore, #tpu.memory_space<semaphore_mem>>
    tpu.wait_dma2 semaphore(%311 : memref<!tpu.dma_semaphore, #tpu.memory_space<semaphore_mem>>) src(%307 : memref<1x512xf32, #tpu.memory_space<any>>) dst(%309 : memref<1x512xf32, #tpu.memory_space<vmem>>)
    %c0_265 = arith.constant 0 : index
    %c6_266 = arith.constant 6 : index
    %c0_267 = arith.constant 0 : index
    %312 = vector.load %arg7[%c0_265, %c6_266, %c0_267] : memref<2x8x512xf32, #tpu.memory_space<vmem>>, vector<2x1x512xf32>
    %313 = vector.shape_cast %312 : vector<2x1x512xf32> to vector<2x512xf32>
    %314 = arith.truncf %301 : vector<2x128xf32> to vector<2x128xbf16>
    %c0_268 = arith.constant 0 : index
    %c0_269 = arith.constant 0 : index
    %315 = vector.load %arg3[%c0_268, %c0_269] : memref<128x512xbf16, #tpu.memory_space<vmem>>, vector<128x512xbf16>
    %cst_270 = arith.constant dense<0.000000e+00> : vector<2x512xf32>
    %316 = tpu.matmul %314, %315, %cst_270 {dimension_numbers = #tpu.dot_dimension_numbers<[1], [0], [0], [1], [0, 0, 1, 1], [], []>} : vector<2x128xbf16>, vector<128x512xbf16>, vector<2x512xf32> -> vector<2x512xf32>
    %317 = arith.addf %316, %313 : vector<2x512xf32>
    %318 = vector.extract_strided_slice %317 {offsets = [0, 0], sizes = [2, 384], strides = [1, 1]} : vector<2x512xf32> to vector<2x384xf32>
    %cst_271 = arith.constant 5.000000e-01 : f32
    %319 = vector.broadcast %cst_271 : f32 to vector<2x384xf32>
    %320 = arith.mulf %319, %318 : vector<2x384xf32>
    %321 = math.tanh %320 : vector<2x384xf32>
    %cst_272 = arith.constant 1.000000e+00 : f32
    %322 = vector.broadcast %cst_272 : f32 to vector<2x384xf32>
    %323 = arith.addf %321, %322 : vector<2x384xf32>
    %cst_273 = arith.constant 5.000000e-01 : f32
    %324 = vector.broadcast %cst_273 : f32 to vector<2x384xf32>
    %325 = arith.mulf %324, %323 : vector<2x384xf32>
    %326 = vector.extract_strided_slice %325 {offsets = [0, 0], sizes = [2, 128], strides = [1, 1]} : vector<2x384xf32> to vector<2x128xf32>
    %327 = vector.extract_strided_slice %325 {offsets = [0, 128], sizes = [2, 128], strides = [1, 1]} : vector<2x384xf32> to vector<2x128xf32>
    %328 = vector.extract_strided_slice %325 {offsets = [0, 256], sizes = [2, 128], strides = [1, 1]} : vector<2x384xf32> to vector<2x128xf32>
    %329 = vector.extract_strided_slice %317 {offsets = [0, 384], sizes = [2, 128], strides = [1, 1]} : vector<2x512xf32> to vector<2x128xf32>
    %330 = math.tanh %329 : vector<2x128xf32>
    %331 = arith.mulf %327, %299 : vector<2x128xf32>
    %332 = arith.mulf %326, %330 : vector<2x128xf32>
    %333 = arith.addf %331, %332 : vector<2x128xf32>
    %334 = math.tanh %333 : vector<2x128xf32>
    %335 = arith.mulf %328, %334 : vector<2x128xf32>
    %c0_i32_274 = arith.constant 0 : i32
    %c7_i32_275 = arith.constant 7 : i32
    %c0_i32_276 = arith.constant 0 : i32
    %c0_i32_277 = arith.constant 0 : i32
    %c0_i32_278 = arith.constant 0 : i32
    %336 = tpu.memref_slice %arg2[%c0_i32_277, %c0_i32_278] : memref<1001x512xf32, #tpu.memory_space<any>> -> memref<1x512xf32, #tpu.memory_space<any>>
    %c7_i32_279 = arith.constant 7 : i32
    %c0_i32_280 = arith.constant 0 : i32
    %337 = tpu.memref_slice %arg7[%c0_i32_274, %c7_i32_279, %c0_i32_280] : memref<2x8x512xf32, #tpu.memory_space<vmem>> -> memref<1x1x512xf32, #tpu.memory_space<vmem>>
    %338 = tpu.memref_squeeze %337 : memref<1x1x512xf32, #tpu.memory_space<vmem>> -> memref<1x512xf32, #tpu.memory_space<vmem>>
    %339 = tpu.memref_slice %arg8[%c7_i32_275, %c0_i32_276] : memref<8x2x!tpu.dma_semaphore, #tpu.memory_space<semaphore_mem>> -> memref<1x1x!tpu.dma_semaphore, #tpu.memory_space<semaphore_mem>>
    %340 = tpu.memref_squeeze %339 : memref<1x1x!tpu.dma_semaphore, #tpu.memory_space<semaphore_mem>> -> memref<!tpu.dma_semaphore, #tpu.memory_space<semaphore_mem>>
    tpu.wait_dma2 semaphore(%340 : memref<!tpu.dma_semaphore, #tpu.memory_space<semaphore_mem>>) src(%336 : memref<1x512xf32, #tpu.memory_space<any>>) dst(%338 : memref<1x512xf32, #tpu.memory_space<vmem>>)
    %c1_i32_281 = arith.constant 1 : i32
    %c7_i32_282 = arith.constant 7 : i32
    %c1_i32_283 = arith.constant 1 : i32
    %c0_i32_284 = arith.constant 0 : i32
    %c0_i32_285 = arith.constant 0 : i32
    %341 = tpu.memref_slice %arg2[%c0_i32_284, %c0_i32_285] : memref<1001x512xf32, #tpu.memory_space<any>> -> memref<1x512xf32, #tpu.memory_space<any>>
    %c7_i32_286 = arith.constant 7 : i32
    %c0_i32_287 = arith.constant 0 : i32
    %342 = tpu.memref_slice %arg7[%c1_i32_281, %c7_i32_286, %c0_i32_287] : memref<2x8x512xf32, #tpu.memory_space<vmem>> -> memref<1x1x512xf32, #tpu.memory_space<vmem>>
    %343 = tpu.memref_squeeze %342 : memref<1x1x512xf32, #tpu.memory_space<vmem>> -> memref<1x512xf32, #tpu.memory_space<vmem>>
    %344 = tpu.memref_slice %arg8[%c7_i32_282, %c1_i32_283] : memref<8x2x!tpu.dma_semaphore, #tpu.memory_space<semaphore_mem>> -> memref<1x1x!tpu.dma_semaphore, #tpu.memory_space<semaphore_mem>>
    %345 = tpu.memref_squeeze %344 : memref<1x1x!tpu.dma_semaphore, #tpu.memory_space<semaphore_mem>> -> memref<!tpu.dma_semaphore, #tpu.memory_space<semaphore_mem>>
    tpu.wait_dma2 semaphore(%345 : memref<!tpu.dma_semaphore, #tpu.memory_space<semaphore_mem>>) src(%341 : memref<1x512xf32, #tpu.memory_space<any>>) dst(%343 : memref<1x512xf32, #tpu.memory_space<vmem>>)
    %c0_288 = arith.constant 0 : index
    %c7_289 = arith.constant 7 : index
    %c0_290 = arith.constant 0 : index
    %346 = vector.load %arg7[%c0_288, %c7_289, %c0_290] : memref<2x8x512xf32, #tpu.memory_space<vmem>>, vector<2x1x512xf32>
    %347 = vector.shape_cast %346 : vector<2x1x512xf32> to vector<2x512xf32>
    %348 = arith.truncf %335 : vector<2x128xf32> to vector<2x128xbf16>
    %c0_291 = arith.constant 0 : index
    %c0_292 = arith.constant 0 : index
    %349 = vector.load %arg3[%c0_291, %c0_292] : memref<128x512xbf16, #tpu.memory_space<vmem>>, vector<128x512xbf16>
    %cst_293 = arith.constant dense<0.000000e+00> : vector<2x512xf32>
    %350 = tpu.matmul %348, %349, %cst_293 {dimension_numbers = #tpu.dot_dimension_numbers<[1], [0], [0], [1], [0, 0, 1, 1], [], []>} : vector<2x128xbf16>, vector<128x512xbf16>, vector<2x512xf32> -> vector<2x512xf32>
    %351 = arith.addf %350, %347 : vector<2x512xf32>
    %352 = vector.extract_strided_slice %351 {offsets = [0, 0], sizes = [2, 384], strides = [1, 1]} : vector<2x512xf32> to vector<2x384xf32>
    %cst_294 = arith.constant 5.000000e-01 : f32
    %353 = vector.broadcast %cst_294 : f32 to vector<2x384xf32>
    %354 = arith.mulf %353, %352 : vector<2x384xf32>
    %355 = math.tanh %354 : vector<2x384xf32>
    %cst_295 = arith.constant 1.000000e+00 : f32
    %356 = vector.broadcast %cst_295 : f32 to vector<2x384xf32>
    %357 = arith.addf %355, %356 : vector<2x384xf32>
    %cst_296 = arith.constant 5.000000e-01 : f32
    %358 = vector.broadcast %cst_296 : f32 to vector<2x384xf32>
    %359 = arith.mulf %358, %357 : vector<2x384xf32>
    %360 = vector.extract_strided_slice %359 {offsets = [0, 0], sizes = [2, 128], strides = [1, 1]} : vector<2x384xf32> to vector<2x128xf32>
    %361 = vector.extract_strided_slice %359 {offsets = [0, 128], sizes = [2, 128], strides = [1, 1]} : vector<2x384xf32> to vector<2x128xf32>
    %362 = vector.extract_strided_slice %359 {offsets = [0, 256], sizes = [2, 128], strides = [1, 1]} : vector<2x384xf32> to vector<2x128xf32>
    %363 = vector.extract_strided_slice %351 {offsets = [0, 384], sizes = [2, 128], strides = [1, 1]} : vector<2x512xf32> to vector<2x128xf32>
    %364 = math.tanh %363 : vector<2x128xf32>
    %365 = arith.mulf %361, %333 : vector<2x128xf32>
    %366 = arith.mulf %360, %364 : vector<2x128xf32>
    %367 = arith.addf %365, %366 : vector<2x128xf32>
    %368 = math.tanh %367 : vector<2x128xf32>
    %369 = arith.mulf %362, %368 : vector<2x128xf32>
    %c0_297 = arith.constant 0 : index
    %c0_298 = arith.constant 0 : index
    %370 = vector.load %arg4[%c0_297, %c0_298] : memref<1x128xf32, #tpu.memory_space<vmem>>, vector<1x128xf32>
    %371 = vector.broadcast %370 : vector<1x128xf32> to vector<2x128xf32>
    %372 = arith.mulf %369, %371 : vector<2x128xf32>
    %cst_299 = arith.constant dense<0.000000e+00> : vector<2xf32>
    %373 = vector.multi_reduction <add>, %372, %cst_299 [1] : vector<2x128xf32> to vector<2xf32>
    %374 = vector.shape_cast %373 : vector<2xf32> to vector<2x1xf32>
    %c0_300 = arith.constant 0 : index
    %c0_301 = arith.constant 0 : index
    %375 = vector.load %arg5[%c0_300, %c0_301] : memref<1x1xf32, #tpu.memory_space<vmem>>, vector<1x1xf32>
    %376 = vector.broadcast %375 : vector<1x1xf32> to vector<2x1xf32>
    %377 = arith.addf %374, %376 : vector<2x1xf32>
    %c0_302 = arith.constant 0 : index
    %c0_303 = arith.constant 0 : index
    %378 = vector.load %arg6[%c0_302, %c0_303] : memref<2x1xf32, #tpu.memory_space<vmem>>, vector<2x1xf32>
    tpu.vector_store %arg6[%c0_302, %c0_303], %377 {strides = array<i32>} : memref<2x1xf32, #tpu.memory_space<vmem>>, vector<2x1xf32>,
    return
  }
  func.func @transform_1(%arg0: i32, %arg1: memref<2x8xi32, #tpu.memory_space<smem>>) -> (i32, i32) {
    %c0_i32 = arith.constant 0 : i32
    %c0_i32_0 = arith.constant 0 : i32
    %c0_i32_1 = arith.constant 0 : i32
    return %c0_i32, %c0_i32_0 : i32, i32
  }
  func.func @transform_2(%arg0: i32, %arg1: memref<2x8xi32, #tpu.memory_space<smem>>) -> (i32, i32) {
    %c0_i32 = arith.constant 0 : i32
    %c0_i32_0 = arith.constant 0 : i32
    %c0_i32_1 = arith.constant 0 : i32
    return %c0_i32, %c0_i32_0 : i32, i32
  }
  func.func @transform_3(%arg0: i32, %arg1: memref<2x8xi32, #tpu.memory_space<smem>>) -> (i32, i32) {
    %c0_i32 = arith.constant 0 : i32
    %c0_i32_0 = arith.constant 0 : i32
    %c0_i32_1 = arith.constant 0 : i32
    return %c0_i32, %c0_i32_0 : i32, i32
  }
  func.func @transform_4(%arg0: i32, %arg1: memref<2x8xi32, #tpu.memory_space<smem>>) -> (i32, i32) {
    %c0_i32 = arith.constant 0 : i32
    %c0_i32_0 = arith.constant 0 : i32
    %c0_i32_1 = arith.constant 0 : i32
    return %c0_i32, %c0_i32_0 : i32, i32
  }
}

</mosaic_0001>

<bundles_post_ra>
// kernel: tpu_custom_call.1
= control target key start
LH: loop header
LB: loop body
LE: loop exit
PB: predicated region body
PF: predicated region fallthrough
CT: control target
= control target key end

     0   :  { %s4911_s0 = inlined_call_operand.hbm [shape: s32[2,8], index: 0, kind: input, shape index: {}]   ;;  %s4912_s1 = inlined_call_operand.hbm [shape: f32[1001,512], index: 1, kind: input, shape index: {}]   ;;  %s4913_s2 = inlined_call_operand.hbm [shape: bf16[128,512], index: 2, kind: input, shape index: {}]   ;;  %s4914_s3 = inlined_call_operand.hbm [shape: f32[1,128], index: 3, kind: input, shape index: {}]   ;;  %s4915_s5 = inlined_call_operand.vmem [shape: f32[2,1], index: 5, kind: output, shape index: {}]   ;;  %s4916_s4 = inlined_call_operand.<no memory space> [shape: f32[1,1], index: 4, kind: input, shape index: {}]  }
   0x1   :  { %s3939_s20 = scalar_lea.hbm %s4911_s0, 32 }
   0x2   :  { %p3940_p0 = scmp.ne.s32.totalorder %s4911_s0, %s3939_s20  ;;  %p3943_p1 = scmp.lt.u32.totalorder %s3939_s20, %s4911_s0 }
   0x4   :  { %p3945_p2 = pnand %p3943_p1, %p3940_p0 }
   0x6   :  { %3948 = shalt.err (!%p3945_p2)  }
   0x7   :  { %s4415_s25 = smov [#allocation5]   ;;  %v12_v0 = vstv %s4916_s4 }
   0x8   :  { %11 = dma.hbm_to_smem %s4911_s0, 32, %s4415_s25, [#allocation4]  ;;  %13 = vst [vmem:[#allocation6] sm:$0x1] %v12_v0 }
   0x9   :  { %4377 = dma.done.wait [#allocation4], 32 }
   0xa   :  { %4378 = vsyncadd [#allocation4], 4294967264 }
   0xb   :  { %15 = sfence }
   0xc   :  { %16 = vsyncpa [#allocation8], 0 }
   0xd   :  { %17 = vsyncpa [#allocation10], 0  ;;  %s4416_s30 = smov [#allocation7]   ;;  %s3949_s9 = scalar_lea.hbm %s4913_s2, 4096 }
   0xe   :  { %s23_s6 = sshll.u32 %s4416_s30, 4  ;;  %p3950_p3 = scmp.ne.s32.totalorder %s4913_s2, %s3949_s9  ;;  %s24_s6 = int_to_ptr.vmem [resolvable:$true] %s23_s6 }
   0xf   :  { %p3953_p4 = scmp.lt.u32.totalorder %s3949_s9, %s4913_s2 }
  0x11   :  { %p3955_p5 = pnand %p3953_p4, %p3950_p3 }
  0x13   :  { %3958 = shalt.err (!%p3955_p5)
}
  0x14   :  { %s3959_s4 = scalar_lea.vmem %s24_s6, 4096  ;;  %p3964_p7 = scmp.lt.s32.totalorder %s24_s6, %s24_s6 }
  0x15   :  { %p3960_p6 = scmp.ne.s32.totalorder %s24_s6, %s3959_s4  ;;  %p3965_p8 = scmp.lt.s32.totalorder %s3959_s4, %s3959_s4 }
  0x17   :  { %p3966_p9 = por %p3965_p8, %p3964_p7 }
  0x19   :  { %p3967_p10 = pnand %p3966_p9, %p3960_p6 }
  0x1b   :  { %3970 = shalt.err (!%p3967_p10)
}
  0x1c   :  { %s4417_s13 = smov 256   ;;  %s4418_s14 = smov 16  }
  0x1d   :  { %29 = dma.hbm_to_vmem [thread:$0]  %s4913_s2, 4096, %s24_s6, [#allocation8], %s4417_s13, %s4417_s13, %s4418_s14  }
  0x1e   :  { %s4419_s17 = smov [#allocation9]   ;;  %s3971_s21 = scalar_lea.hbm %s4914_s3, 16 }
  0x1f   :  { %s36_s18 = sshll.u32 %s4419_s17, 4  ;;  %p3972_p11 = scmp.ne.s32.totalorder %s4914_s3, %s3971_s21  ;;  %s37_s18 = int_to_ptr.vmem [resolvable:$true] %s36_s18 }
  0x20   :  { %p3975_p12 = scmp.lt.u32.totalorder %s3971_s21, %s4914_s3 }
  0x22   :  { %p3977_p13 = pnand %p3975_p12, %p3972_p11 }
  0x24   :  { %3980 = shalt.err (!%p3977_p13)
}
  0x25   :  { %s3981_s26 = scalar_lea.vmem %s37_s18, 16  ;;  %s3985_s2 = scalar_lea.vmem %s37_s18, 32 }
  0x26   :  { %p3982_p0 = scmp.ne.s32.totalorder %s37_s18, %s3981_s26  ;;  %p3986_p1 = scmp.lt.s32.totalorder %s37_s18, %s37_s18 }
  0x27   :  { %p3987_p2 = scmp.lt.s32.totalorder %s3985_s2, %s3981_s26 }
  0x29   :  { %p3988_p3 = por %p3987_p2, %p3986_p1 }
  0x2b   :  { %p3989_p4 = pnand %p3988_p3, %p3982_p0 }
  0x2d   :  { %3992 = shalt.err (!%p3989_p4)
}
  0x2e   :  { %39 = dma.hbm_to_vmem [thread:$0]  %s4914_s3, 16, %s37_s18, [#allocation10]  }
  0x2f   :  { %4379 = dma.done.wait [#allocation8], 4096  }
  0x30   :  { %4380 = vsyncadd [#allocation8], 4294963200 }
  0x31   :  { %4381 = dma.done.wait [#allocation10], 16  }
  0x32   :  { %4382 = vsyncadd [#allocation10], 4294967280  ;;  %s49_s29 = sld [smem:[#allocation5]]  ;;  %s4420_s30 = smov [#allocation2]  }
  0x33   :  { %s57_s6 = sshll.u32 %s4420_s30, 4  ;;  %s4511_s7 = sld [smem:[#allocation5 + $0x80]]  ;;  %s4509_s6 = int_to_ptr.vmem [resolvable:$true] %s57_s6 }
  0x34   :  { %s4421_s8 = smov [#allocation2 + $0x20]   ;;  %s4513_s10 = sld [smem:[#allocation5 + $0x1]] }
  0x35   :  { %s71_s9 = sshll.u32 %s4421_s8, 4  ;;  %s4422_s3 = smov [#allocation2 + $0x1]   ;;  %s4515_s9 = int_to_ptr.vmem [resolvable:$true] %s71_s9 }
  0x36   :  { %s85_s11 = sshll.u32 %s4422_s3, 4  ;;  %s4517_s0 = sld [smem:[#allocation5 + $0x81]]  ;;  %s4519_s11 = int_to_ptr.vmem [resolvable:$true] %s85_s11 }
  0x37   :  { %s4529_s25 = scalar_lea.hbm %s4912_s1, 64512 }
  0x38   :  { %s50_s12 = sshrl.u32 %s49_s29, 3  ;;  %s51_s4 = sand.u32 7, %s49_s29  }
  0x39   :  { %s3129_s13 = sshll.u32 %s50_s12, 5  ;;  %s62_s15 = sshrl.u32 %s4511_s7, 3 }
  0x3a   :  { %s53_s14 = sadd.s32 %s3129_s13, %s51_s4  ;;  %s63_s17 = sand.u32 7, %s4511_s7  }
  0x3b   :  { %s3130_s16 = sshll.u32 %s53_s14, 4  ;;  %s3132_s21 = sshll.u32 %s62_s15, 5 }
  0x3c   :  { %s55_s20 = scalar_lea.hbm %s4912_s1, %s3130_s16 }
  0x3d   :  { %s3993_s22 = scalar_lea.hbm %s55_s20, 64  ;;  %p3996_p6 = scmp.lt.u32.totalorder %s55_s20, %s4912_s1 }
  0x3e   :  { %p3994_p5 = scmp.ne.s32.totalorder %s55_s20, %s3993_s22  ;;  %p3997_p7 = scmp.lt.u32.totalorder %s4529_s25, %s3993_s22 }
  0x3f   :  { %p3999_p9 = scmp.lt.u32.totalorder %s3993_s22, %s55_s20 }
  0x40   :  { %p3998_p8 = por %p3997_p7, %p3996_p6 }
  0x42   :  { %p4000_p10 = por %p3999_p9, %p3998_p8 }
  0x44   :  { %p4001_p11 = pnand %p4000_p10, %p3994_p5 }
  0x46   :  { %4004 = shalt.err (!%p4001_p11)  }
  0x47   :  { %s4005_s27 = scalar_lea.vmem %s4509_s6, 64  ;;  %s4538_s28 = scalar_lea.vmem %s4509_s6, 1024 }
  0x48   :  { %p4006_p12 = scmp.ne.s32.totalorder %s4509_s6, %s4005_s27  ;;  %p4010_p13 = scmp.lt.s32.totalorder %s4509_s6, %s4509_s6 }
  0x49   :  { %p4011_p0 = scmp.lt.s32.totalorder %s4538_s28, %s4005_s27 }
  0x4b   :  { %p4012_p1 = por %p4011_p0, %p4010_p13 }
  0x4d   :  { %p4013_p2 = pnand %p4012_p1, %p4006_p12 }
  0x4f   :  { %4016 = shalt.err (!%p4013_p2)  }
  0x50   :  { %s4423_s29 = smov 128   ;;  %s4424_s30 = smov 1  }
  0x51   :  { %60 = dma.hbm_to_vmem [thread:$0]  %s55_s20, 64, %s4509_s6, [#allocation3], %s4423_s29, %s4423_s29, %s4424_s30 }
  0x52   :  { %s65_s7 = sadd.s32 %s3132_s21, %s63_s17  ;;  %s76_s8 = sshrl.u32 %s4513_s10, 3 }
  0x53   :  { %s3133_s3 = sshll.u32 %s65_s7, 4  ;;  %s77_s12 = sand.u32 7, %s4513_s10  }
  0x54   :  { %s67_s14 = scalar_lea.hbm %s4912_s1, %s3133_s3  ;;  %s3135_s15 = sshll.u32 %s76_s8, 5 }
  0x55   :  { %s4017_s16 = scalar_lea.hbm %s67_s14, 64  ;;  %p4020_p4 = scmp.lt.u32.totalorder %s67_s14, %s4912_s1 }
  0x56   :  { %p4018_p3 = scmp.ne.s32.totalorder %s67_s14, %s4017_s16  ;;  %p4021_p5 = scmp.lt.u32.totalorder %s4529_s25, %s4017_s16 }
  0x57   :  { %p4023_p7 = scmp.lt.u32.totalorder %s4017_s16, %s67_s14 }
  0x58   :  { %p4022_p6 = por %p4021_p5, %p4020_p4 }
  0x5a   :  { %p4024_p8 = por %p4023_p7, %p4022_p6 }
  0x5c   :  { %p4025_p9 = pnand %p4024_p8, %p4018_p3 }
  0x5e   :  { %4028 = shalt.err (!%p4025_p9)  }
  0x5f   :  { %s4029_s10 = scalar_lea.vmem %s4515_s9, 64  ;;  %p4034_p11 = scmp.lt.s32.totalorder %s4515_s9, %s4509_s6 }
  0x60   :  { %p4030_p10 = scmp.ne.s32.totalorder %s4515_s9, %s4029_s10  ;;  %p4035_p12 = scmp.lt.s32.totalorder %s4538_s28, %s4029_s10 }
  0x62   :  { %p4036_p13 = por %p4035_p12, %p4034_p11 }
  0x64   :  { %p4037_p0 = pnand %p4036_p13, %p4030_p10 }
  0x66   :  { %4040 = shalt.err (!%p4037_p0)  }
  0x67   :  { %74 = dma.hbm_to_vmem [thread:$0]  %s67_s14, 64, %s4515_s9, [#allocation3 + $0x1], %s4423_s29, %s4423_s29, %s4424_s30 }
  0x68   :  { %s79_s17 = sadd.s32 %s3135_s15, %s77_s12  ;;  %s90_s20 = sshrl.u32 %s4517_s0, 3 }
  0x69   :  { %s3136_s21 = sshll.u32 %s79_s17, 4  ;;  %s91_s22 = sand.u32 7, %s4517_s0  }
  0x6a   :  { %s81_s26 = scalar_lea.hbm %s4912_s1, %s3136_s21  ;;  %s3138_s2 = sshll.u32 %s90_s20, 5 }
  0x6b   :  { %s4041_s27 = scalar_lea.hbm %s81_s26, 64  ;;  %p4044_p2 = scmp.lt.u32.totalorder %s81_s26, %s4912_s1 }
  0x6c   :  { %p4042_p1 = scmp.ne.s32.totalorder %s81_s26, %s4041_s27  ;;  %p4045_p3 = scmp.lt.u32.totalorder %s4529_s25, %s4041_s27 }
  0x6d   :  { %p4047_p5 = scmp.lt.u32.totalorder %s4041_s27, %s81_s26 }
  0x6e   :  { %p4046_p4 = por %p4045_p3, %p4044_p2 }
  0x70   :  { %p4048_p6 = por %p4047_p5, %p4046_p4 }
  0x72   :  { %p4049_p7 = pnand %p4048_p6, %p4042_p1 }
  0x74   :  { %4052 = shalt.err (!%p4049_p7)  }
  0x75   :  { %s4053_s9 = scalar_lea.vmem %s4519_s11, 64  ;;  %p4058_p9 = scmp.lt.s32.totalorder %s4519_s11, %s4509_s6 }
  0x76   :  { %p4054_p8 = scmp.ne.s32.totalorder %s4519_s11, %s4053_s9  ;;  %p4059_p10 = scmp.lt.s32.totalorder %s4538_s28, %s4053_s9 }
  0x78   :  { %p4060_p11 = por %p4059_p10, %p4058_p9 }
  0x7a   :  { %p4061_p12 = pnand %p4060_p11, %p4054_p8 }
  0x7c   :  { %4064 = shalt.err (!%p4061_p12)  }
  0x7d   :  { %88 = dma.hbm_to_vmem [thread:$0]  %s81_s26, 64, %s4519_s11, [#allocation3 + $0x2], %s4423_s29, %s4423_s29, %s4424_s30 }
  0x7e   :  { %s93_s0 = sadd.s32 %s3138_s2, %s91_s22  ;;  %s4425_s12 = smov [#allocation2 + $0x21]  }
  0x7f   :  { %s3139_s3 = sshll.u32 %s93_s0, 4  ;;  %s99_s4 = sshll.u32 %s4425_s12, 4  ;;  %s100_s4 = int_to_ptr.vmem [resolvable:$true] %s99_s4 }
  0x80   :  { %s95_s15 = scalar_lea.hbm %s4912_s1, %s3139_s3 }
  0x81   :  { %s4065_s16 = scalar_lea.hbm %s95_s15, 64  ;;  %p4068_p0 = scmp.lt.u32.totalorder %s95_s15, %s4912_s1 }
  0x82   :  { %p4066_p13 = scmp.ne.s32.totalorder %s95_s15, %s4065_s16  ;;  %p4069_p1 = scmp.lt.u32.totalorder %s4529_s25, %s4065_s16 }
  0x83   :  { %p4071_p3 = scmp.lt.u32.totalorder %s4065_s16, %s95_s15 }
  0x84   :  { %p4070_p2 = por %p4069_p1, %p4068_p0 }
  0x86   :  { %p4072_p4 = por %p4071_p3, %p4070_p2 }
  0x88   :  { %p4073_p5 = pnand %p4072_p4, %p4066_p13 }
  0x8a   :  { %4076 = shalt.err (!%p4073_p5)  }
  0x8b   :  { %s4077_s11 = scalar_lea.vmem %s100_s4, 64  ;;  %p4082_p7 = scmp.lt.s32.totalorder %s100_s4, %s4509_s6 }
  0x8c   :  { %p4078_p6 = scmp.ne.s32.totalorder %s100_s4, %s4077_s11  ;;  %p4083_p8 = scmp.lt.s32.totalorder %s4538_s28, %s4077_s11 }
  0x8e   :  { %p4084_p9 = por %p4083_p8, %p4082_p7 }
  0x90   :  { %p4085_p10 = pnand %p4084_p9, %p4078_p6 }
  0x92   :  { %4088 = shalt.err (!%p4085_p10)  }
  0x93   :  { %102 = dma.hbm_to_vmem [thread:$0]  %s95_s15, 64, %s100_s4, [#allocation3 + $0x3], %s4423_s29, %s4423_s29, %s4424_s30 }
  0x94   :  { %s3140_s10 = sld [smem:[#allocation5 + $0x2]]  ;;  %s4426_s17 = smov [#allocation2 + $0x2]  }
  0x95   :  { %s113_s20 = sshll.u32 %s4426_s17, 4  ;;  %s3143_s21 = sld [smem:[#allocation5 + $0x82]]  ;;  %s4595_s20 = int_to_ptr.vmem [resolvable:$true] %s113_s20 }
  0x96   :  { %s4427_s22 = smov [#allocation2 + $0x22]   ;;  %s4597_s24 = sld [smem:[#allocation5 + $0x3]] }
  0x97   :  { %s127_s23 = sshll.u32 %s4427_s22, 4  ;;  %s4428_s26 = smov [#allocation2 + $0x3]   ;;  %s4599_s23 = int_to_ptr.vmem [resolvable:$true] %s127_s23 }
  0x98   :  { %s4601_s2 = sshll.u32 %s4428_s26, 4  ;;  %s4603_s27 = sld [smem:[#allocation5 + $0x83]]  ;;  %s142_s2 = int_to_ptr.vmem [resolvable:$true] %s4601_s2 }
  0x9a   :  { %s104_s7 = sshrl.u32 %s3140_s10, 3  ;;  %s105_s8 = sand.u32 7, %s3140_s10  }
  0x9b   :  { %s3141_s9 = sshll.u32 %s104_s7, 5  ;;  %s118_s0 = sshrl.u32 %s3143_s21, 3 }
  0x9c   :  { %s107_s3 = sadd.s32 %s3141_s9, %s105_s8  ;;  %s119_s12 = sand.u32 7, %s3143_s21  }
  0x9d   :  { %s3142_s4 = sshll.u32 %s107_s3, 4  ;;  %s3144_s13 = sshll.u32 %s118_s0, 5 }
  0x9e   :  { %s109_s16 = scalar_lea.hbm %s4912_s1, %s3142_s4  ;;  %s121_s18 = sadd.s32 %s3144_s13, %s119_s12 }
  0x9f   :  { %s4089_s19 = scalar_lea.hbm %s109_s16, 64  ;;  %p4092_p12 = scmp.lt.u32.totalorder %s109_s16, %s4912_s1 }
  0xa0   :  { %p4090_p11 = scmp.ne.s32.totalorder %s109_s16, %s4089_s19  ;;  %p4093_p13 = scmp.lt.u32.totalorder %s4529_s25, %s4089_s19 }
  0xa1   :  { %p4095_p1 = scmp.lt.u32.totalorder %s4089_s19, %s109_s16 }
  0xa2   :  { %p4094_p0 = por %p4093_p13, %p4092_p12 }
  0xa4   :  { %p4096_p2 = por %p4095_p1, %p4094_p0 }
  0xa6   :  { %p4097_p3 = pnand %p4096_p2, %p4090_p11 }
  0xa8   :  { %4100 = shalt.err (!%p4097_p3)  }
  0xa9   :  { %s4101_s10 = scalar_lea.vmem %s4595_s20, 64  ;;  %p4106_p5 = scmp.lt.s32.totalorder %s4595_s20, %s4509_s6 }
  0xaa   :  { %p4102_p4 = scmp.ne.s32.totalorder %s4595_s20, %s4101_s10  ;;  %p4107_p6 = scmp.lt.s32.totalorder %s4538_s28, %s4101_s10 }
  0xac   :  { %p4108_p7 = por %p4107_p6, %p4106_p5 }
  0xae   :  { %p4109_p8 = pnand %p4108_p7, %p4102_p4 }
  0xb0   :  { %4112 = shalt.err (!%p4109_p8)  }
  0xb1   :  { %116 = dma.hbm_to_vmem [thread:$0]  %s109_s16, 64, %s4595_s20, [#allocation3 + $0x4], %s4423_s29, %s4423_s29, %s4424_s30 }
  0xb2   :  { %s3145_s21 = sshll.u32 %s121_s18, 4  ;;  %s132_s22 = sshrl.u32 %s4597_s24, 3 }
  0xb3   :  { %s123_s8 = scalar_lea.hbm %s4912_s1, %s3145_s21  ;;  %s133_s9 = sand.u32 7, %s4597_s24  }
  0xb4   :  { %s4113_s0 = scalar_lea.hbm %s123_s8, 64  ;;  %p4116_p10 = scmp.lt.u32.totalorder %s123_s8, %s4912_s1 }
  0xb5   :  { %p4114_p9 = scmp.ne.s32.totalorder %s123_s8, %s4113_s0  ;;  %p4117_p11 = scmp.lt.u32.totalorder %s4529_s25, %s4113_s0 }
  0xb6   :  { %p4119_p13 = scmp.lt.u32.totalorder %s4113_s0, %s123_s8 }
  0xb7   :  { %p4118_p12 = por %p4117_p11, %p4116_p10 }
  0xb9   :  { %p4120_p0 = por %p4119_p13, %p4118_p12 }
  0xbb   :  { %p4121_p1 = pnand %p4120_p0, %p4114_p9 }
  0xbd   :  { %4124 = shalt.err (!%p4121_p1)  }
  0xbe   :  { %s4125_s20 = scalar_lea.vmem %s4599_s23, 64  ;;  %p4130_p3 = scmp.lt.s32.totalorder %s4599_s23, %s4509_s6 }
  0xbf   :  { %p4126_p2 = scmp.ne.s32.totalorder %s4599_s23, %s4125_s20  ;;  %p4131_p4 = scmp.lt.s32.totalorder %s4538_s28, %s4125_s20 }
  0xc1   :  { %p4132_p5 = por %p4131_p4, %p4130_p3 }
  0xc3   :  { %p4133_p6 = pnand %p4132_p5, %p4126_p2 }
  0xc5   :  { %4136 = shalt.err (!%p4133_p6)  }
  0xc6   :  { %130 = dma.hbm_to_vmem [thread:$0]  %s123_s8, 64, %s4599_s23, [#allocation3 + $0x5], %s4423_s29, %s4423_s29, %s4424_s30 }
  0xc7   :  { %s3147_s24 = sshll.u32 %s132_s22, 5  ;;  %s146_s13 = sshrl.u32 %s4603_s27, 3 }
  0xc8   :  { %s135_s4 = sadd.s32 %s3147_s24, %s133_s9  ;;  %s147_s15 = sand.u32 7, %s4603_s27  }
  0xc9   :  { %s3148_s14 = sshll.u32 %s135_s4, 4  ;;  %s3150_s11 = sshll.u32 %s146_s13, 5 }
  0xca   :  { %s137_s19 = scalar_lea.hbm %s4912_s1, %s3148_s14 }
  0xcb   :  { %s4137_s17 = scalar_lea.hbm %s137_s19, 64  ;;  %p4140_p8 = scmp.lt.u32.totalorder %s137_s19, %s4912_s1 }
  0xcc   :  { %p4138_p7 = scmp.ne.s32.totalorder %s137_s19, %s4137_s17  ;;  %p4141_p9 = scmp.lt.u32.totalorder %s4529_s25, %s4137_s17 }
  0xcd   :  { %p4143_p11 = scmp.lt.u32.totalorder %s4137_s17, %s137_s19 }
  0xce   :  { %p4142_p10 = por %p4141_p9, %p4140_p8 }
  0xd0   :  { %p4144_p12 = por %p4143_p11, %p4142_p10 }
  0xd2   :  { %p4145_p13 = pnand %p4144_p12, %p4138_p7 }
  0xd4   :  { %4148 = shalt.err (!%p4145_p13)  }
  0xd5   :  { %s4149_s23 = scalar_lea.vmem %s142_s2, 64  ;;  %p4154_p1 = scmp.lt.s32.totalorder %s142_s2, %s4509_s6 }
  0xd6   :  { %p4150_p0 = scmp.ne.s32.totalorder %s142_s2, %s4149_s23  ;;  %p4155_p2 = scmp.lt.s32.totalorder %s4538_s28, %s4149_s23 }
  0xd8   :  { %p4156_p3 = por %p4155_p2, %p4154_p1 }
  0xda   :  { %p4157_p4 = pnand %p4156_p3, %p4150_p0 }
  0xdc   :  { %4160 = shalt.err (!%p4157_p4)  }
  0xdd   :  { %144 = dma.hbm_to_vmem [thread:$0]  %s137_s19, 64, %s142_s2, [#allocation3 + $0x6], %s4423_s29, %s4423_s29, %s4424_s30 }
  0xde   :  { %s149_s27 = sadd.s32 %s3150_s11, %s147_s15  ;;  %s4429_s26 = smov [#allocation2 + $0x23]  }
  0xdf   :  { %s3151_s22 = sshll.u32 %s149_s27, 4  ;;  %s155_s7 = sshll.u32 %s4429_s26, 4  ;;  %s156_s7 = int_to_ptr.vmem [resolvable:$true] %s155_s7 }
  0xe0   :  { %s151_s0 = scalar_lea.hbm %s4912_s1, %s3151_s22 }
  0xe1   :  { %s4161_s3 = scalar_lea.hbm %s151_s0, 64  ;;  %p4164_p6 = scmp.lt.u32.totalorder %s151_s0, %s4912_s1 }
  0xe2   :  { %p4162_p5 = scmp.ne.s32.totalorder %s151_s0, %s4161_s3  ;;  %p4165_p7 = scmp.lt.u32.totalorder %s4529_s25, %s4161_s3 }
  0xe3   :  { %p4167_p9 = scmp.lt.u32.totalorder %s4161_s3, %s151_s0 }
  0xe4   :  { %p4166_p8 = por %p4165_p7, %p4164_p6 }
  0xe6   :  { %p4168_p10 = por %p4167_p9, %p4166_p8 }
  0xe8   :  { %p4169_p11 = pnand %p4168_p10, %p4162_p5 }
  0xea   :  { %4172 = shalt.err (!%p4169_p11)  }
  0xeb   :  { %s4173_s2 = scalar_lea.vmem %s156_s7, 64  ;;  %p4178_p13 = scmp.lt.s32.totalorder %s156_s7, %s4509_s6 }
  0xec   :  { %p4174_p12 = scmp.ne.s32.totalorder %s156_s7, %s4173_s2  ;;  %p4179_p0 = scmp.lt.s32.totalorder %s4538_s28, %s4173_s2 }
  0xee   :  { %p4180_p1 = por %p4179_p0, %p4178_p13 }
  0xf0   :  { %p4181_p2 = pnand %p4180_p1, %p4174_p12 }
  0xf2   :  { %4184 = shalt.err (!%p4181_p2)  }
  0xf3   :  { %158 = dma.hbm_to_vmem [thread:$0]  %s151_s0, 64, %s156_s7, [#allocation3 + $0x7], %s4423_s29, %s4423_s29, %s4424_s30 }
  0xf4   :  { %s3152_s24 = sld [smem:[#allocation5 + $0x4]]  ;;  %s4430_s4 = smov [#allocation2 + $0x4]  }
  0xf5   :  { %s169_s13 = sshll.u32 %s4430_s4, 4  ;;  %s3155_s14 = sld [smem:[#allocation5 + $0x84]]  ;;  %s4666_s13 = int_to_ptr.vmem [resolvable:$true] %s169_s13 }
  0xf6   :  { %s4431_s15 = smov [#allocation2 + $0x24]   ;;  %s4668_s18 = sld [smem:[#allocation5 + $0x5]] }
  0xf7   :  { %s183_s16 = sshll.u32 %s4431_s15, 4  ;;  %s4432_s19 = smov [#allocation2 + $0x5]   ;;  %s4670_s16 = int_to_ptr.vmem [resolvable:$true] %s183_s16 }
  0xf8   :  { %s4672_s11 = sshll.u32 %s4432_s19, 4  ;;  %s4674_s17 = sld [smem:[#allocation5 + $0x85]]  ;;  %s198_s11 = int_to_ptr.vmem [resolvable:$true] %s4672_s11 }
  0xfa   :  { %s160_s10 = sshrl.u32 %s3152_s24, 3  ;;  %s161_s21 = sand.u32 7, %s3152_s24  }
  0xfb   :  { %s3153_s23 = sshll.u32 %s160_s10, 5  ;;  %s174_s27 = sshrl.u32 %s3155_s14, 3 }
  0xfc   :  { %s163_s22 = sadd.s32 %s3153_s23, %s161_s21  ;;  %s175_s26 = sand.u32 7, %s3155_s14  }
  0xfd   :  { %s3154_s7 = sshll.u32 %s163_s22, 4  ;;  %s3156_s8 = sshll.u32 %s174_s27, 5 }
  0xfe   :  { %s165_s3 = scalar_lea.hbm %s4912_s1, %s3154_s7  ;;  %s177_s12 = sadd.s32 %s3156_s8, %s175_s26 }
  0xff   :  { %s4185_s20 = scalar_lea.hbm %s165_s3, 64  ;;  %p4188_p4 = scmp.lt.u32.totalorder %s165_s3, %s4912_s1 }
 0x100   :  { %p4186_p3 = scmp.ne.s32.totalorder %s165_s3, %s4185_s20  ;;  %p4189_p5 = scmp.lt.u32.totalorder %s4529_s25, %s4185_s20 }
 0x101   :  { %p4191_p7 = scmp.lt.u32.totalorder %s4185_s20, %s165_s3 }
 0x102   :  { %p4190_p6 = por %p4189_p5, %p4188_p4 }
 0x104   :  { %p4192_p8 = por %p4191_p7, %p4190_p6 }
 0x106   :  { %p4193_p9 = pnand %p4192_p8, %p4186_p3 }
 0x108   :  { %4196 = shalt.err (!%p4193_p9)  }
 0x109   :  { %s4197_s24 = scalar_lea.vmem %s4666_s13, 64  ;;  %p4202_p11 = scmp.lt.s32.totalorder %s4666_s13, %s4509_s6 }
 0x10a   :  { %p4198_p10 = scmp.ne.s32.totalorder %s4666_s13, %s4197_s24  ;;  %p4203_p12 = scmp.lt.s32.totalorder %s4538_s28, %s4197_s24 }
 0x10c   :  { %p4204_p13 = por %p4203_p12, %p4202_p11 }
 0x10e   :  { %p4205_p0 = pnand %p4204_p13, %p4198_p10 }
 0x110   :  { %4208 = shalt.err (!%p4205_p0)  }
 0x111   :  { %172 = dma.hbm_to_vmem [thread:$0]  %s165_s3, 64, %s4666_s13, [#allocation3 + $0x8], %s4423_s29, %s4423_s29, %s4424_s30 }
 0x112   :  { %s3157_s14 = sshll.u32 %s177_s12, 4  ;;  %s188_s15 = sshrl.u32 %s4668_s18, 3 }
 0x113   :  { %s179_s21 = scalar_lea.hbm %s4912_s1, %s3157_s14  ;;  %s189_s23 = sand.u32 7, %s4668_s18  }
 0x114   :  { %s4209_s27 = scalar_lea.hbm %s179_s21, 64  ;;  %p4212_p2 = scmp.lt.u32.totalorder %s179_s21, %s4912_s1 }
 0x115   :  { %p4210_p1 = scmp.ne.s32.totalorder %s179_s21, %s4209_s27  ;;  %p4213_p3 = scmp.lt.u32.totalorder %s4529_s25, %s4209_s27 }
 0x116   :  { %p4215_p5 = scmp.lt.u32.totalorder %s4209_s27, %s179_s21 }
 0x117   :  { %p4214_p4 = por %p4213_p3, %p4212_p2 }
 0x119   :  { %p4216_p6 = por %p4215_p5, %p4214_p4 }
 0x11b   :  { %p4217_p7 = pnand %p4216_p6, %p4210_p1 }
 0x11d   :  { %4220 = shalt.err (!%p4217_p7)  }
 0x11e   :  { %s4221_s13 = scalar_lea.vmem %s4670_s16, 64  ;;  %p4226_p9 = scmp.lt.s32.totalorder %s4670_s16, %s4509_s6 }
 0x11f   :  { %p4222_p8 = scmp.ne.s32.totalorder %s4670_s16, %s4221_s13  ;;  %p4227_p10 = scmp.lt.s32.totalorder %s4538_s28, %s4221_s13 }
 0x121   :  { %p4228_p11 = por %p4227_p10, %p4226_p9 }
 0x123   :  { %p4229_p12 = pnand %p4228_p11, %p4222_p8 }
 0x125   :  { %4232 = shalt.err (!%p4229_p12)  }
 0x126   :  { %186 = dma.hbm_to_vmem [thread:$0]  %s179_s21, 64, %s4670_s16, [#allocation3 + $0x9], %s4423_s29, %s4423_s29, %s4424_s30 }
 0x127   :  { %s3159_s18 = sshll.u32 %s188_s15, 5  ;;  %s202_s8 = sshrl.u32 %s4674_s17, 3 }
 0x128   :  { %s191_s7 = sadd.s32 %s3159_s18, %s189_s23  ;;  %s203_s0 = sand.u32 7, %s4674_s17  }
 0x129   :  { %s3160_s9 = sshll.u32 %s191_s7, 4  ;;  %s3162_s2 = sshll.u32 %s202_s8, 5 }
 0x12a   :  { %s193_s20 = scalar_lea.hbm %s4912_s1, %s3160_s9 }
 0x12b   :  { %s4233_s4 = scalar_lea.hbm %s193_s20, 64  ;;  %p4236_p0 = scmp.lt.u32.totalorder %s193_s20, %s4912_s1 }
 0x12c   :  { %p4234_p13 = scmp.ne.s32.totalorder %s193_s20, %s4233_s4  ;;  %p4237_p1 = scmp.lt.u32.totalorder %s4529_s25, %s4233_s4 }
 0x12d   :  { %p4239_p3 = scmp.lt.u32.totalorder %s4233_s4, %s193_s20 }
 0x12e   :  { %p4238_p2 = por %p4237_p1, %p4236_p0 }
 0x130   :  { %p4240_p4 = por %p4239_p3, %p4238_p2 }
 0x132   :  { %p4241_p5 = pnand %p4240_p4, %p4234_p13 }
 0x134   :  { %4244 = shalt.err (!%p4241_p5)  }
 0x135   :  { %s4245_s16 = scalar_lea.vmem %s198_s11, 64  ;;  %p4250_p7 = scmp.lt.s32.totalorder %s198_s11, %s4509_s6 }
 0x136   :  { %p4246_p6 = scmp.ne.s32.totalorder %s198_s11, %s4245_s16  ;;  %p4251_p8 = scmp.lt.s32.totalorder %s4538_s28, %s4245_s16 }
 0x138   :  { %p4252_p9 = por %p4251_p8, %p4250_p7 }
 0x13a   :  { %p4253_p10 = pnand %p4252_p9, %p4246_p6 }
 0x13c   :  { %4256 = shalt.err (!%p4253_p10)  }
 0x13d   :  { %200 = dma.hbm_to_vmem [thread:$0]  %s193_s20, 64, %s198_s11, [#allocation3 + $0xa], %s4423_s29, %s4423_s29, %s4424_s30 }
 0x13e   :  { %s205_s17 = sadd.s32 %s3162_s2, %s203_s0  ;;  %s4433_s19 = smov [#allocation2 + $0x25]  }
 0x13f   :  { %s3163_s15 = sshll.u32 %s205_s17, 4  ;;  %s211_s10 = sshll.u32 %s4433_s19, 4  ;;  %s212_s10 = int_to_ptr.vmem [resolvable:$true] %s211_s10 }
 0x140   :  { %s207_s27 = scalar_lea.hbm %s4912_s1, %s3163_s15 }
 0x141   :  { %s4257_s22 = scalar_lea.hbm %s207_s27, 64  ;;  %p4260_p12 = scmp.lt.u32.totalorder %s207_s27, %s4912_s1 }
 0x142   :  { %p4258_p11 = scmp.ne.s32.totalorder %s207_s27, %s4257_s22  ;;  %p4261_p13 = scmp.lt.u32.totalorder %s4529_s25, %s4257_s22 }
 0x143   :  { %p4263_p1 = scmp.lt.u32.totalorder %s4257_s22, %s207_s27 }
 0x144   :  { %p4262_p0 = por %p4261_p13, %p4260_p12 }
 0x146   :  { %p4264_p2 = por %p4263_p1, %p4262_p0 }
 0x148   :  { %p4265_p3 = pnand %p4264_p2, %p4258_p11 }
 0x14a   :  { %4268 = shalt.err (!%p4265_p3)  }
 0x14b   :  { %s4269_s11 = scalar_lea.vmem %s212_s10, 64  ;;  %p4274_p5 = scmp.lt.s32.totalorder %s212_s10, %s4509_s6 }
 0x14c   :  { %p4270_p4 = scmp.ne.s32.totalorder %s212_s10, %s4269_s11  ;;  %p4275_p6 = scmp.lt.s32.totalorder %s4538_s28, %s4269_s11 }
 0x14e   :  { %p4276_p7 = por %p4275_p6, %p4274_p5 }
 0x150   :  { %p4277_p8 = pnand %p4276_p7, %p4270_p4 }
 0x152   :  { %4280 = shalt.err (!%p4277_p8)  }
 0x153   :  { %214 = dma.hbm_to_vmem [thread:$0]  %s207_s27, 64, %s212_s10, [#allocation3 + $0xb], %s4423_s29, %s4423_s29, %s4424_s30 }
 0x154   :  { %s3164_s18 = sld [smem:[#allocation5 + $0x6]]  ;;  %s4434_s7 = smov [#allocation2 + $0x6]  }
 0x155   :  { %s225_s8 = sshll.u32 %s4434_s7, 4  ;;  %s3167_s9 = sld [smem:[#allocation5 + $0x86]]  ;;  %s4737_s8 = int_to_ptr.vmem [resolvable:$true] %s225_s8 }
 0x156   :  { %s4435_s0 = smov [#allocation2 + $0x26]   ;;  %s4739_s12 = sld [smem:[#allocation5 + $0x7]] }
 0x157   :  { %s239_s3 = sshll.u32 %s4435_s0, 4  ;;  %s4436_s20 = smov [#allocation2 + $0x7]   ;;  %s4741_s3 = int_to_ptr.vmem [resolvable:$true] %s239_s3 }
 0x158   :  { %s4743_s2 = sshll.u32 %s4436_s20, 4  ;;  %s4745_s4 = sld [smem:[#allocation5 + $0x87]]  ;;  %s254_s2 = int_to_ptr.vmem [resolvable:$true] %s4743_s2 }
 0x15a   :  { %s216_s24 = sshrl.u32 %s3164_s18, 3  ;;  %s217_s14 = sand.u32 7, %s3164_s18  }
 0x15b   :  { %s3165_s16 = sshll.u32 %s216_s24, 5  ;;  %s230_s17 = sshrl.u32 %s3167_s9, 3 }
 0x15c   :  { %s219_s15 = sadd.s32 %s3165_s16, %s217_s14  ;;  %s231_s19 = sand.u32 7, %s3167_s9  }
 0x15d   :  { %s3166_s10 = sshll.u32 %s219_s15, 4  ;;  %s3168_s21 = sshll.u32 %s230_s17, 5 }
 0x15e   :  { %s221_s22 = scalar_lea.hbm %s4912_s1, %s3166_s10  ;;  %s233_s26 = sadd.s32 %s3168_s21, %s231_s19 }
 0x15f   :  { %s4281_s13 = scalar_lea.hbm %s221_s22, 64  ;;  %p4284_p10 = scmp.lt.u32.totalorder %s221_s22, %s4912_s1 }
 0x160   :  { %p4282_p9 = scmp.ne.s32.totalorder %s221_s22, %s4281_s13  ;;  %p4285_p11 = scmp.lt.u32.totalorder %s4529_s25, %s4281_s13 }
 0x161   :  { %p4287_p13 = scmp.lt.u32.totalorder %s4281_s13, %s221_s22 }
 0x162   :  { %p4286_p12 = por %p4285_p11, %p4284_p10 }
 0x164   :  { %p4288_p0 = por %p4287_p13, %p4286_p12 }
 0x166   :  { %p4289_p1 = pnand %p4288_p0, %p4282_p9 }
 0x168   :  { %4292 = shalt.err (!%p4289_p1)  }
 0x169   :  { %s4293_s18 = scalar_lea.vmem %s4737_s8, 64  ;;  %p4298_p3 = scmp.lt.s32.totalorder %s4737_s8, %s4509_s6 }
 0x16a   :  { %p4294_p2 = scmp.ne.s32.totalorder %s4737_s8, %s4293_s18  ;;  %p4299_p4 = scmp.lt.s32.totalorder %s4538_s28, %s4293_s18 }
 0x16c   :  { %p4300_p5 = por %p4299_p4, %p4298_p3 }
 0x16e   :  { %p4301_p6 = pnand %p4300_p5, %p4294_p2 }
 0x170   :  { %4304 = shalt.err (!%p4301_p6)  }
 0x171   :  { %228 = dma.hbm_to_vmem [thread:$0]  %s221_s22, 64, %s4737_s8, [#allocation3 + $0xc], %s4423_s29, %s4423_s29, %s4424_s30 }
 0x172   :  { %s3169_s9 = sshll.u32 %s233_s26, 4  ;;  %s244_s0 = sshrl.u32 %s4739_s12, 3 }
 0x173   :  { %s235_s14 = scalar_lea.hbm %s4912_s1, %s3169_s9  ;;  %s245_s16 = sand.u32 7, %s4739_s12  }
 0x174   :  { %s4305_s17 = scalar_lea.hbm %s235_s14, 64  ;;  %p4308_p8 = scmp.lt.u32.totalorder %s235_s14, %s4912_s1 }
 0x175   :  { %p4306_p7 = scmp.ne.s32.totalorder %s235_s14, %s4305_s17  ;;  %p4309_p9 = scmp.lt.u32.totalorder %s4529_s25, %s4305_s17 }
 0x176   :  { %p4311_p11 = scmp.lt.u32.totalorder %s4305_s17, %s235_s14 }
 0x177   :  { %p4310_p10 = por %p4309_p9, %p4308_p8 }
 0x179   :  { %p4312_p12 = por %p4311_p11, %p4310_p10 }
 0x17b   :  { %p4313_p13 = pnand %p4312_p12, %p4306_p7 }
 0x17d   :  { %4316 = shalt.err (!%p4313_p13)  }
 0x17e   :  { %s4317_s8 = scalar_lea.vmem %s4741_s3, 64  ;;  %p4322_p1 = scmp.lt.s32.totalorder %s4741_s3, %s4509_s6 }
 0x17f   :  { %p4318_p0 = scmp.ne.s32.totalorder %s4741_s3, %s4317_s8  ;;  %p4323_p2 = scmp.lt.s32.totalorder %s4538_s28, %s4317_s8 }
 0x181   :  { %p4324_p3 = por %p4323_p2, %p4322_p1 }
 0x183   :  { %p4325_p4 = pnand %p4324_p3, %p4318_p0 }
 0x185   :  { %4328 = shalt.err (!%p4325_p4)  }
 0x186   :  { %242 = dma.hbm_to_vmem [thread:$0]  %s235_s14, 64, %s4741_s3, [#allocation3 + $0xd], %s4423_s29, %s4423_s29, %s4424_s30 }
 0x187   :  { %s3171_s12 = sshll.u32 %s244_s0, 5  ;;  %s258_s21 = sshrl.u32 %s4745_s4, 3 }
 0x188   :  { %s247_s10 = sadd.s32 %s3171_s12, %s245_s16  ;;  %s259_s27 = sand.u32 7, %s4745_s4  }
 0x189   :  { %s3172_s23 = sshll.u32 %s247_s10, 4  ;;  %s3174_s11 = sshll.u32 %s258_s21, 5 }
 0x18a   :  { %s249_s13 = scalar_lea.hbm %s4912_s1, %s3172_s23 }
 0x18b   :  { %s4329_s7 = scalar_lea.hbm %s249_s13, 64  ;;  %p4332_p6 = scmp.lt.u32.totalorder %s249_s13, %s4912_s1 }
 0x18c   :  { %p4330_p5 = scmp.ne.s32.totalorder %s249_s13, %s4329_s7  ;;  %p4333_p7 = scmp.lt.u32.totalorder %s4529_s25, %s4329_s7 }
 0x18d   :  { %p4335_p9 = scmp.lt.u32.totalorder %s4329_s7, %s249_s13 }
 0x18e   :  { %p4334_p8 = por %p4333_p7, %p4332_p6 }
 0x190   :  { %p4336_p10 = por %p4335_p9, %p4334_p8 }
 0x192   :  { %p4337_p11 = pnand %p4336_p10, %p4330_p5 }
 0x194   :  { %4340 = shalt.err (!%p4337_p11)  }
 0x195   :  { %s4341_s3 = scalar_lea.vmem %s254_s2, 64  ;;  %p4346_p13 = scmp.lt.s32.totalorder %s254_s2, %s4509_s6 }
 0x196   :  { %p4342_p12 = scmp.ne.s32.totalorder %s254_s2, %s4341_s3  ;;  %p4347_p0 = scmp.lt.s32.totalorder %s4538_s28, %s4341_s3 }
 0x198   :  { %p4348_p1 = por %p4347_p0, %p4346_p13 }
 0x19a   :  { %p4349_p2 = pnand %p4348_p1, %p4342_p12 }
 0x19c   :  { %4352 = shalt.err (!%p4349_p2)  }
 0x19d   :  { %256 = dma.hbm_to_vmem [thread:$0]  %s249_s13, 64, %s254_s2, [#allocation3 + $0xe], %s4423_s29, %s4423_s29, %s4424_s30 }
 0x19e   :  { %s261_s4 = sadd.s32 %s3174_s11, %s259_s27  ;;  %s4437_s20 = smov [#allocation2 + $0x27]  }
 0x19f   :  { %s3175_s0 = sshll.u32 %s261_s4, 4  ;;  %s267_s24 = sshll.u32 %s4437_s20, 4  ;;  %s268_s24 = int_to_ptr.vmem [resolvable:$true] %s267_s24 }
 0x1a0   :  { %s263_s17 = scalar_lea.hbm %s4912_s1, %s3175_s0 }
 0x1a1   :  { %s4353_s15 = scalar_lea.hbm %s263_s17, 64  ;;  %p4356_p4 = scmp.lt.u32.totalorder %s263_s17, %s4912_s1 }
 0x1a2   :  { %p4354_p3 = scmp.ne.s32.totalorder %s263_s17, %s4353_s15  ;;  %p4357_p5 = scmp.lt.u32.totalorder %s4529_s25, %s4353_s15 }
 0x1a3   :  { %p4359_p7 = scmp.lt.u32.totalorder %s4353_s15, %s263_s17 }
 0x1a4   :  { %p4358_p6 = por %p4357_p5, %p4356_p4 }
 0x1a6   :  { %p4360_p8 = por %p4359_p7, %p4358_p6 }
 0x1a8   :  { %p4361_p9 = pnand %p4360_p8, %p4354_p3 }
 0x1aa   :  { %4364 = shalt.err (!%p4361_p9)  }
 0x1ab   :  { %s4365_s2 = scalar_lea.vmem %s268_s24, 64  ;;  %p4370_p11 = scmp.lt.s32.totalorder %s268_s24, %s4509_s6 }
 0x1ac   :  { %p4366_p10 = scmp.ne.s32.totalorder %s268_s24, %s4365_s2  ;;  %p4371_p12 = scmp.lt.s32.totalorder %s4538_s28, %s4365_s2 }
 0x1ae   :  { %p4372_p13 = por %p4371_p12, %p4370_p11 }
 0x1b0   :  { %p4373_p0 = pnand %p4372_p13, %p4366_p10 }
 0x1b2   :  { %4376 = shalt.err (!%p4373_p0)  }
 0x1b3   :  { %270 = dma.hbm_to_vmem [thread:$0]  %s263_s17, 64, %s268_s24, [#allocation3 + $0xf], %s4423_s29, %s4423_s29, %s4424_s30 }
 0x1b4   :  { %4383 = dma.done.wait [#allocation3], 64 }
 0x1b5   :  { %4384 = vsyncadd [#allocation3], 4294967232 }
 0x1b6   :  { %4385 = dma.done.wait [#allocation3 + $0x1], 64 }
 0x1b7   :  { %4386 = vsyncadd [#allocation3 + $0x1], 4294967232  ;;  %v4438_v1 = vmov 0   ;;  %v3475_v2 = vld [vmem:[#allocation7 + $0x4] ss:$16 sps:$4 sm:$0xff]   ;;  %v477_v36 = vlaneseq }
 0x1b8   :  { %534 = vmatprep.mubr.bf16.mxu0 %v4438_v1  ;;  %575 = vmatprep.mubr.bf16.mxu1 %v4438_v1  ;;  %v3477_v3 = vld [vmem:[#allocation7] ss:$16 sps:$4 sm:$0xff]   ;;  %v3478_v4 = vld [vmem:[#allocation7 + $0xc] ss:$16 sps:$4 sm:$0xff]   ;;  %v3480_v5 = vld [vmem:[#allocation7 + $0x24] ss:$16 sps:$4 sm:$0xff]  }
 0x1b9   :  { %502 = vmatprep.subr.bf16.mxu0 %v3475_v2  ;;  %v3482_v6 = vld [vmem:[#allocation7 + $0x8] ss:$16 sps:$4 sm:$0xff]   ;;  %v3483_v7 = vld [vmem:[#allocation7 + $0x20] ss:$16 sps:$4 sm:$0xff]   ;;  %543 = vmatprep.subr.bf16.mxu1 %v3478_v4  ;;  %v3484_v8 = vld [vmem:[#allocation7 + $0x2c] ss:$16 sps:$4 sm:$0xff]  }
 0x1ba   :  { %503 = vmatpush1.bf16.msra.mxu0 %v3477_v3  ;;  %544 = vmatpush1.bf16.msra.mxu1 %v3482_v6  ;;  %v3486_v9 = vld [vmem:[#allocation7 + $0x44] ss:$16 sps:$4 sm:$0xff]   ;;  %v3488_v10 = vld [vmem:[#allocation7 + $0x28] ss:$16 sps:$4 sm:$0xff]   ;;  %v3489_v11 = vld [vmem:[#allocation7 + $0x40] ss:$16 sps:$4 sm:$0xff]  }
 0x1bb   :  { %504 = vmatprep.subr.bf16.mxu0 %v3480_v5  ;;  %545 = vmatprep.subr.bf16.mxu1 %v3484_v8  ;;  %v3490_v12 = vld [vmem:[#allocation7 + $0x4c] ss:$16 sps:$4 sm:$0xff]   ;;  %v3492_v13 = vld [vmem:[#allocation7 + $0x64] ss:$16 sps:$4 sm:$0xff]   ;;  %v3494_v14 = vld [vmem:[#allocation7 + $0x48] ss:$16 sps:$4 sm:$0xff]  }
 0x1bc   :  { %v3496_v15 = vld [vmem:[#allocation7 + $0x6c] ss:$16 sps:$4 sm:$0xff]   ;;  %v3495_v16 = vld [vmem:[#allocation7 + $0x60] ss:$16 sps:$4 sm:$0xff]   ;;  %v3498_v17 = vld [vmem:[#allocation7 + $0x84] ss:$16 sps:$4 sm:$0xff]  }
 0x1bd   :  { %v3500_v18 = vld [vmem:[#allocation7 + $0x68] ss:$16 sps:$4 sm:$0xff]   ;;  %v3502_v19 = vld [vmem:[#allocation7 + $0x8c] ss:$16 sps:$4 sm:$0xff]   ;;  %v3501_v20 = vld [vmem:[#allocation7 + $0x80] ss:$16 sps:$4 sm:$0xff]  }
 0x1be   :  { %505 = vmatpush1.bf16.msra.mxu0 %v3483_v7  ;;  %546 = vmatpush1.bf16.msra.mxu1 %v3488_v10  ;;  %v3504_v21 = vld [vmem:[#allocation7 + $0xa4] ss:$16 sps:$4 sm:$0xff]   ;;  %v3506_v22 = vld [vmem:[#allocation7 + $0x88] ss:$16 sps:$4 sm:$0xff]   ;;  %v3508_v23 = vld [vmem:[#allocation7 + $0xac] ss:$16 sps:$4 sm:$0xff]  }
 0x1bf   :  { %506 = vmatprep.subr.bf16.mxu0 %v3486_v9  ;;  %547 = vmatprep.subr.bf16.mxu1 %v3490_v12  ;;  %v3507_v24 = vld [vmem:[#allocation7 + $0xa0] ss:$16 sps:$4 sm:$0xff]   ;;  %v3510_v25 = vld [vmem:[#allocation7 + $0xc4] ss:$16 sps:$4 sm:$0xff]   ;;  %v3512_v26 = vld [vmem:[#allocation7 + $0xa8] ss:$16 sps:$4 sm:$0xff]  }
 0x1c0   :  { %v3514_v27 = vld [vmem:[#allocation7 + $0xcc] ss:$16 sps:$4 sm:$0xff]   ;;  %v3513_v28 = vld [vmem:[#allocation7 + $0xc0] ss:$16 sps:$4 sm:$0xff]   ;;  %v3516_v29 = vld [vmem:[#allocation7 + $0xe4] ss:$16 sps:$4 sm:$0xff]  }
 0x1c1   :  { %v3518_v30 = vld [vmem:[#allocation7 + $0xc8] ss:$16 sps:$4 sm:$0xff]   ;;  %v3520_v31 = vld [vmem:[#allocation7 + $0xec] ss:$16 sps:$4 sm:$0xff]   ;;  %v3519_v32 = vld [vmem:[#allocation7 + $0xe0] ss:$16 sps:$4 sm:$0xff]  }
 0x1c2   :  { %507 = vmatpush1.bf16.msra.mxu0 %v3489_v11  ;;  %548 = vmatpush1.bf16.msra.mxu1 %v3494_v14  ;;  %v3522_v33 = vld [vmem:[#allocation7 + $0xe8] ss:$16 sps:$4 sm:$0xff]   ;;  %v4439_v34 = vmov 1966171168   ;;  %v478_v38 = vshrl.u32 %v477_v36, 7 }
 0x1c3   :  { %508 = vmatprep.subr.bf16.mxu0 %v3492_v13  ;;  %549 = vmatprep.subr.bf16.mxu1 %v3496_v15  ;;  %v475_v35 = vunpack.c.l.s4 %v4439_v34  ;;  %v276_v39 = vld [vmem:[#allocation2] ss:$8 sm:$0xf] }
 0x1c4   :  { %v278_v40 = vld [vmem:[#allocation2 + $0x20] ss:$8 sm:$0xf] }
 0x1c5   :  { %v476_v37 = vunpack.c.0.s8 %v475_v35  ;;  %v473_v41 = vcombine.low %v276_v39, %v278_v40 }
 0x1c6   :  { %509 = vmatpush1.bf16.msra.mxu0 %v3495_v16  ;;  %550 = vmatpush1.bf16.msra.mxu1 %v3500_v18 }
 0x1c7   :  { %510 = vmatprep.subr.bf16.mxu0 %v3498_v17  ;;  %551 = vmatprep.subr.bf16.mxu1 %v3502_v19  ;;  %v4812_v42 = vsub.s32 %v476_v37, %v478_v38 }
 0x1c9   :  { %v480_v43 = vrot.slane %v473_v41, %v4812_v42 }
 0x1ca   :  { %511 = vmatpush1.bf16.msra.mxu0 %v3501_v20  ;;  %552 = vmatpush1.bf16.msra.mxu1 %v3506_v22 }
 0x1cb   :  { %512 = vmatprep.subr.bf16.mxu0 %v3504_v21  ;;  %553 = vmatprep.subr.bf16.mxu1 %v3508_v23  ;;  %v481_v44 = vcombine.high %v480_v43, %v480_v43  ;;  %v488_v45 = vrot.slane %v480_v43, %v4812_v42 }
 0x1cd   :  { %v495_v46 = vrot.slane %v481_v44, %v4812_v42  ;;  %v496_v60 = vcombine.high %v488_v45, %v488_v45 }
 0x1ce   :  { %513 = vmatpush1.bf16.msra.mxu0 %v3507_v24  ;;  %554 = vmatpush1.bf16.msra.mxu1 %v3512_v26 }
 0x1cf   :  { %514 = vmatprep.subr.bf16.mxu0 %v3510_v25  ;;  %555 = vmatprep.subr.bf16.mxu1 %v3514_v27  ;;  %v497_v48 = vcombine.high %v495_v46, %v495_v46 }
 0x1d2   :  { %515 = vmatpush1.bf16.msra.mxu0 %v3513_v28  ;;  %556 = vmatpush1.bf16.msra.mxu1 %v3518_v30 }
 0x1d3   :  { %516 = vmatprep.subr.bf16.mxu0 %v3516_v29  ;;  %557 = vmatprep.subr.bf16.mxu1 %v3520_v31 }
 0x1d6   :  { %517 = vmatpush1.bf16.msra.mxu0 %v3519_v32  ;;  %558 = vmatpush1.bf16.msra.mxu1 %v3522_v33 }
 0x1d9   :  { %535 = vmatmul.mubr.bf16.vlgmr.msra.gmra.mrb[0].mxu0 %v4438_v1  ;;  %576 = vmatmul.mubr.bf16.vlgmr.msra.gmra.mrb[0].mxu1 %v4438_v1 }
 0x2ac   :  { %v536_v47 = vpop.f32.mrb[0].mxu0  ;;  %v577_v53 = vpop.f32.mrb[0].mxu1 }
 0x2ad   :  { %v537_v49 = vadd.f32 %v536_v47, %v488_v45  ;;  %v538_v50 = vpop.f32.mrb[1].mxu0  ;;  %v579_v56 = vpop.f32.mrb[1].mxu1  ;;  %v578_v62 = vadd.f32 %v577_v53, %v496_v60 }
 0x2ae   :  { %v539_v51 = vadd.f32 %v538_v50, %v495_v46  ;;  %v540_v52 = vpop.f32.mrb[2].mxu0  ;;  %v580_v58 = vadd.f32 %v579_v56, %v497_v48  ;;  %v581_v59 = vpop.f32.mrb[2].mxu1 }
 0x2af   :  { %v584_v54 = vmul.f32 0.5, %v537_v49  ;;  %v541_v55 = vpop.f32.mrb[3].mxu0  ;;  %v582_v61 = vpop.f32.mrb[3].mxu1  ;;  %v586_v63 = vmul.f32 0.5, %v578_v62 }
 0x2b0   :  { %v585_v57 = vmul.f32 0.5, %v539_v51 }
 0x2b1   :  { %3523 = vtanh.f32 %v584_v54 }
 0x2b2   :  { %3525 = vtanh.f32 %v585_v57 }
 0x2b3   :  { %3527 = vtanh.f32 %v580_v58 }
 0x2b4   :  { %3529 = vtanh.f32 %v586_v63 }
 0x2bb   :  { %v3524_v0 = vpop.eup %3523 }
 0x2bc   :  { %v3526_v2 = vpop.eup %3525  ;;  %v590_v3 = vadd.f32 1.0, %v3524_v0 }
 0x2bd   :  { %v591_v4 = vadd.f32 1.0, %v3526_v2  ;;  %v3528_v5 = vpop.eup %3527 }
 0x2be   :  { %v593_v6 = vmul.f32 0.5, %v590_v3  ;;  %v3530_v11 = vpop.eup %3529 }
 0x2bf   :  { %v594_v7 = vmul.f32 0.5, %v591_v4  ;;  %v592_v12 = vadd.f32 1.0, %v3530_v11 }
 0x2c0   :  { %v598_v8 = vmul.f32 %v3528_v5, %v593_v6 }
 0x2c1   :  { %v597_v9 = vmul.f32 0.0, %v594_v7  ;;  %v595_v13 = vmul.f32 0.5, %v592_v12 }
 0x2c3   :  { %v4817_v10 = vadd.f32 %v598_v8, %v597_v9 }
 0x2c5   :  { %3531 = vtanh.f32 %v4817_v10 }
 0x2cf   :  { %v3532_v14 = vpop.eup %3531 }
 0x2d0   :  { %v4820_v15 = vmul.f32 %v3532_v14, %v595_v13 }
 0x2d1   :  { %4387 = dma.done.wait [#allocation3 + $0x2], 64 }
 0x2d2   :  { %4388 = vsyncadd [#allocation3 + $0x2], 4294967232 }
 0x2d3   :  { %4389 = dma.done.wait [#allocation3 + $0x3], 64 }
 0x2d4   :  { %4390 = vsyncadd [#allocation3 + $0x3], 4294967232  ;;  %866 = vmatprep.mubr.bf16.mxu0 %v4438_v1  ;;  %907 = vmatprep.mubr.bf16.mxu1 %v4438_v1  ;;  %v3533_v16 = vld [vmem:[#allocation7 + $0x4] ss:$16 sps:$4 sm:$0xff]   ;;  %v3535_v17 = vld [vmem:[#allocation7] ss:$16 sps:$4 sm:$0xff]   ;;  %v610_v49 = vpack.c.bf16 %v4820_v15, %v4820_v15 }
 0x2d5   :  { %834 = vmatprep.subr.bf16.mxu0 %v3533_v16  ;;  %v3536_v18 = vld [vmem:[#allocation7 + $0xc] ss:$16 sps:$4 sm:$0xff]   ;;  %v3538_v19 = vld [vmem:[#allocation7 + $0x24] ss:$16 sps:$4 sm:$0xff]   ;;  %v3540_v20 = vld [vmem:[#allocation7 + $0x8] ss:$16 sps:$4 sm:$0xff]  }
 0x2d6   :  { %835 = vmatpush1.bf16.msra.mxu0 %v3535_v17  ;;  %v3541_v21 = vld [vmem:[#allocation7 + $0x20] ss:$16 sps:$4 sm:$0xff]   ;;  %875 = vmatprep.subr.bf16.mxu1 %v3536_v18  ;;  %v3542_v22 = vld [vmem:[#allocation7 + $0x2c] ss:$16 sps:$4 sm:$0xff]   ;;  %v3544_v23 = vld [vmem:[#allocation7 + $0x44] ss:$16 sps:$4 sm:$0xff]  }
 0x2d7   :  { %836 = vmatprep.subr.bf16.mxu0 %v3538_v19  ;;  %876 = vmatpush1.bf16.msra.mxu1 %v3540_v20  ;;  %v3546_v24 = vld [vmem:[#allocation7 + $0x28] ss:$16 sps:$4 sm:$0xff]   ;;  %v3547_v25 = vld [vmem:[#allocation7 + $0x40] ss:$16 sps:$4 sm:$0xff]   ;;  %v3548_v26 = vld [vmem:[#allocation7 + $0x4c] ss:$16 sps:$4 sm:$0xff]  }
 0x2d8   :  { %877 = vmatprep.subr.bf16.mxu1 %v3542_v22  ;;  %v3550_v27 = vld [vmem:[#allocation7 + $0x64] ss:$16 sps:$4 sm:$0xff]   ;;  %v3552_v28 = vld [vmem:[#allocation7 + $0x48] ss:$16 sps:$4 sm:$0xff]   ;;  %v3554_v29 = vld [vmem:[#allocation7 + $0x6c] ss:$16 sps:$4 sm:$0xff]  }
 0x2d9   :  { %v3553_v30 = vld [vmem:[#allocation7 + $0x60] ss:$16 sps:$4 sm:$0xff]   ;;  %v3556_v31 = vld [vmem:[#allocation7 + $0x84] ss:$16 sps:$4 sm:$0xff]   ;;  %v3558_v32 = vld [vmem:[#allocation7 + $0x68] ss:$16 sps:$4 sm:$0xff]  }
 0x2da   :  { %837 = vmatpush1.bf16.msra.mxu0 %v3541_v21  ;;  %v3560_v33 = vld [vmem:[#allocation7 + $0x8c] ss:$16 sps:$4 sm:$0xff]   ;;  %v3559_v34 = vld [vmem:[#allocation7 + $0x80] ss:$16 sps:$4 sm:$0xff]   ;;  %v3562_v35 = vld [vmem:[#allocation7 + $0xa4] ss:$16 sps:$4 sm:$0xff]  }
 0x2db   :  { %838 = vmatprep.subr.bf16.mxu0 %v3544_v23  ;;  %878 = vmatpush1.bf16.msra.mxu1 %v3546_v24  ;;  %v3564_v36 = vld [vmem:[#allocation7 + $0x88] ss:$16 sps:$4 sm:$0xff]   ;;  %v3566_v37 = vld [vmem:[#allocation7 + $0xac] ss:$16 sps:$4 sm:$0xff]   ;;  %v3565_v38 = vld [vmem:[#allocation7 + $0xa0] ss:$16 sps:$4 sm:$0xff]  }
 0x2dc   :  { %879 = vmatprep.subr.bf16.mxu1 %v3548_v26  ;;  %v3568_v39 = vld [vmem:[#allocation7 + $0xc4] ss:$16 sps:$4 sm:$0xff]   ;;  %v3570_v40 = vld [vmem:[#allocation7 + $0xa8] ss:$16 sps:$4 sm:$0xff]   ;;  %v3572_v41 = vld [vmem:[#allocation7 + $0xcc] ss:$16 sps:$4 sm:$0xff]  }
 0x2dd   :  { %v3571_v43 = vld [vmem:[#allocation7 + $0xc0] ss:$16 sps:$4 sm:$0xff]   ;;  %v3574_v44 = vld [vmem:[#allocation7 + $0xe4] ss:$16 sps:$4 sm:$0xff]   ;;  %v3576_v45 = vld [vmem:[#allocation7 + $0xc8] ss:$16 sps:$4 sm:$0xff]  }
 0x2de   :  { %839 = vmatpush1.bf16.msra.mxu0 %v3547_v25  ;;  %v3578_v46 = vld [vmem:[#allocation7 + $0xec] ss:$16 sps:$4 sm:$0xff]   ;;  %v3577_v47 = vld [vmem:[#allocation7 + $0xe0] ss:$16 sps:$4 sm:$0xff]   ;;  %v3580_v48 = vld [vmem:[#allocation7 + $0xe8] ss:$16 sps:$4 sm:$0xff]  }
 0x2df   :  { %840 = vmatprep.subr.bf16.mxu0 %v3550_v27  ;;  %880 = vmatpush1.bf16.msra.mxu1 %v3552_v28  ;;  %v607_v50 = vld [vmem:[#allocation2 + $0x1] ss:$8 sm:$0xf] }
 0x2e0   :  { %881 = vmatprep.subr.bf16.mxu1 %v3554_v29  ;;  %v609_v51 = vld [vmem:[#allocation2 + $0x21] ss:$8 sm:$0xf] }
 0x2e1   :  { %v805_v52 = vcombine.low %v607_v50, %v609_v51 }
 0x2e2   :  { %841 = vmatpush1.bf16.msra.mxu0 %v3553_v30 }
 0x2e3   :  { %842 = vmatprep.subr.bf16.mxu0 %v3556_v31  ;;  %882 = vmatpush1.bf16.msra.mxu1 %v3558_v32  ;;  %v812_v53 = vrot.slane %v805_v52, %v4812_v42 }
 0x2e4   :  { %883 = vmatprep.subr.bf16.mxu1 %v3560_v33 }
 0x2e5   :  { %v813_v54 = vcombine.high %v812_v53, %v812_v53  ;;  %v820_v55 = vrot.slane %v812_v53, %v4812_v42 }
 0x2e6   :  { %843 = vmatpush1.bf16.msra.mxu0 %v3559_v34 }
 0x2e7   :  { %844 = vmatprep.subr.bf16.mxu0 %v3562_v35  ;;  %884 = vmatpush1.bf16.msra.mxu1 %v3564_v36  ;;  %v827_v56 = vrot.slane %v813_v54, %v4812_v42  ;;  %v828_v7 = vcombine.high %v820_v55, %v820_v55 }
 0x2e8   :  { %885 = vmatprep.subr.bf16.mxu1 %v3566_v37 }
 0x2e9   :  { %v829_v58 = vcombine.high %v827_v56, %v827_v56 }
 0x2ea   :  { %845 = vmatpush1.bf16.msra.mxu0 %v3565_v38 }
 0x2eb   :  { %846 = vmatprep.subr.bf16.mxu0 %v3568_v39  ;;  %886 = vmatpush1.bf16.msra.mxu1 %v3570_v40 }
 0x2ec   :  { %887 = vmatprep.subr.bf16.mxu1 %v3572_v41 }
 0x2ee   :  { %847 = vmatpush1.bf16.msra.mxu0 %v3571_v43 }
 0x2ef   :  { %848 = vmatprep.subr.bf16.mxu0 %v3574_v44  ;;  %888 = vmatpush1.bf16.msra.mxu1 %v3576_v45 }
 0x2f0   :  { %889 = vmatprep.subr.bf16.mxu1 %v3578_v46 }
 0x2f2   :  { %849 = vmatpush1.bf16.msra.mxu0 %v3577_v47 }
 0x2f3   :  { %890 = vmatpush1.bf16.msra.mxu1 %v3580_v48 }
 0x2f5   :  { %867 = vmatmul.mubr.bf16.vlgmr.msra.gmra.mrb[4].mxu0 %v610_v49 }
 0x2f6   :  { %908 = vmatmul.mubr.bf16.vlgmr.msra.gmra.mrb[4].mxu1 %v610_v49 }
 0x3c8   :  { %v868_v57 = vpop.f32.mrb[4].mxu0 }
 0x3c9   :  { %v869_v59 = vadd.f32 %v868_v57, %v820_v55  ;;  %v870_v60 = vpop.f32.mrb[5].mxu0  ;;  %v909_v63 = vpop.f32.mrb[4].mxu1 }
 0x3ca   :  { %v871_v61 = vadd.f32 %v870_v60, %v827_v56  ;;  %v872_v62 = vpop.f32.mrb[6].mxu0  ;;  %v911_v3 = vpop.f32.mrb[5].mxu1  ;;  %v910_v9 = vadd.f32 %v909_v63, %v828_v7 }
 0x3cb   :  { %v916_v0 = vmul.f32 0.5, %v869_v59  ;;  %v873_v2 = vpop.f32.mrb[7].mxu0  ;;  %v912_v5 = vadd.f32 %v911_v3, %v829_v58  ;;  %v913_v6 = vpop.f32.mrb[6].mxu1 }
 0x3cc   :  { %v917_v4 = vmul.f32 0.5, %v871_v61  ;;  %v914_v8 = vpop.f32.mrb[7].mxu1  ;;  %v918_v11 = vmul.f32 0.5, %v910_v9 }
 0x3cd   :  { %3581 = vtanh.f32 %v916_v0 }
 0x3ce   :  { %3583 = vtanh.f32 %v917_v4 }
 0x3cf   :  { %3585 = vtanh.f32 %v912_v5 }
 0x3d0   :  { %3587 = vtanh.f32 %v918_v11 }
 0x3d7   :  { %v3582_v12 = vpop.eup %3581 }
 0x3d8   :  { %v3584_v13 = vpop.eup %3583  ;;  %v922_v14 = vadd.f32 1.0, %v3582_v12 }
 0x3d9   :  { %v923_v15 = vadd.f32 1.0, %v3584_v13  ;;  %v3586_v16 = vpop.eup %3585 }
 0x3da   :  { %v925_v17 = vmul.f32 0.5, %v922_v14  ;;  %v3588_v22 = vpop.eup %3587 }
 0x3db   :  { %v926_v18 = vmul.f32 0.5, %v923_v15  ;;  %v924_v23 = vadd.f32 1.0, %v3588_v22 }
 0x3dc   :  { %v930_v19 = vmul.f32 %v3586_v16, %v925_v17 }
 0x3dd   :  { %v929_v20 = vmul.f32 %v926_v18, %v4817_v10  ;;  %v927_v24 = vmul.f32 0.5, %v924_v23 }
 0x3df   :  { %v4830_v21 = vadd.f32 %v930_v19, %v929_v20 }
 0x3e1   :  { %3589 = vtanh.f32 %v4830_v21 }
 0x3eb   :  { %v3590_v25 = vpop.eup %3589 }
 0x3ec   :  { %v4833_v26 = vmul.f32 %v3590_v25, %v927_v24 }
 0x3ed   :  { %4391 = dma.done.wait [#allocation3 + $0x4], 64 }
 0x3ee   :  { %4392 = vsyncadd [#allocation3 + $0x4], 4294967232 }
 0x3ef   :  { %4393 = dma.done.wait [#allocation3 + $0x5], 64 }
 0x3f0   :  { %4394 = vsyncadd [#allocation3 + $0x5], 4294967232  ;;  %1198 = vmatprep.mubr.bf16.mxu0 %v4438_v1  ;;  %1239 = vmatprep.mubr.bf16.mxu1 %v4438_v1  ;;  %v3591_v27 = vld [vmem:[#allocation7 + $0x4] ss:$16 sps:$4 sm:$0xff]   ;;  %v3593_v10 = vld [vmem:[#allocation7] ss:$16 sps:$4 sm:$0xff]   ;;  %v942_v59 = vpack.c.bf16 %v4833_v26, %v4833_v26 }
 0x3f1   :  { %1166 = vmatprep.subr.bf16.mxu0 %v3591_v27  ;;  %v3594_v28 = vld [vmem:[#allocation7 + $0xc] ss:$16 sps:$4 sm:$0xff]   ;;  %v3596_v29 = vld [vmem:[#allocation7 + $0x24] ss:$16 sps:$4 sm:$0xff]   ;;  %v3598_v30 = vld [vmem:[#allocation7 + $0x8] ss:$16 sps:$4 sm:$0xff]  }
 0x3f2   :  { %1167 = vmatpush1.bf16.msra.mxu0 %v3593_v10  ;;  %v3599_v31 = vld [vmem:[#allocation7 + $0x20] ss:$16 sps:$4 sm:$0xff]   ;;  %1207 = vmatprep.subr.bf16.mxu1 %v3594_v28  ;;  %v3600_v32 = vld [vmem:[#allocation7 + $0x2c] ss:$16 sps:$4 sm:$0xff]   ;;  %v3602_v33 = vld [vmem:[#allocation7 + $0x44] ss:$16 sps:$4 sm:$0xff]  }
 0x3f3   :  { %1168 = vmatprep.subr.bf16.mxu0 %v3596_v29  ;;  %1208 = vmatpush1.bf16.msra.mxu1 %v3598_v30  ;;  %v3604_v34 = vld [vmem:[#allocation7 + $0x28] ss:$16 sps:$4 sm:$0xff]   ;;  %v3605_v35 = vld [vmem:[#allocation7 + $0x40] ss:$16 sps:$4 sm:$0xff]   ;;  %v3606_v36 = vld [vmem:[#allocation7 + $0x4c] ss:$16 sps:$4 sm:$0xff]  }
 0x3f4   :  { %1209 = vmatprep.subr.bf16.mxu1 %v3600_v32  ;;  %v3608_v37 = vld [vmem:[#allocation7 + $0x64] ss:$16 sps:$4 sm:$0xff]   ;;  %v3610_v38 = vld [vmem:[#allocation7 + $0x48] ss:$16 sps:$4 sm:$0xff]   ;;  %v3612_v39 = vld [vmem:[#allocation7 + $0x6c] ss:$16 sps:$4 sm:$0xff]  }
 0x3f5   :  { %v3611_v40 = vld [vmem:[#allocation7 + $0x60] ss:$16 sps:$4 sm:$0xff]   ;;  %v3614_v41 = vld [vmem:[#allocation7 + $0x84] ss:$16 sps:$4 sm:$0xff]   ;;  %v3616_v43 = vld [vmem:[#allocation7 + $0x68] ss:$16 sps:$4 sm:$0xff]  }
 0x3f6   :  { %1169 = vmatpush1.bf16.msra.mxu0 %v3599_v31  ;;  %v3618_v44 = vld [vmem:[#allocation7 + $0x8c] ss:$16 sps:$4 sm:$0xff]   ;;  %v3617_v45 = vld [vmem:[#allocation7 + $0x80] ss:$16 sps:$4 sm:$0xff]   ;;  %v3620_v46 = vld [vmem:[#allocation7 + $0xa4] ss:$16 sps:$4 sm:$0xff]  }
 0x3f7   :  { %1170 = vmatprep.subr.bf16.mxu0 %v3602_v33  ;;  %1210 = vmatpush1.bf16.msra.mxu1 %v3604_v34  ;;  %v3622_v47 = vld [vmem:[#allocation7 + $0x88] ss:$16 sps:$4 sm:$0xff]   ;;  %v3624_v48 = vld [vmem:[#allocation7 + $0xac] ss:$16 sps:$4 sm:$0xff]   ;;  %v3623_v49 = vld [vmem:[#allocation7 + $0xa0] ss:$16 sps:$4 sm:$0xff]  }
 0x3f8   :  { %1211 = vmatprep.subr.bf16.mxu1 %v3606_v36  ;;  %v3626_v50 = vld [vmem:[#allocation7 + $0xc4] ss:$16 sps:$4 sm:$0xff]   ;;  %v3628_v51 = vld [vmem:[#allocation7 + $0xa8] ss:$16 sps:$4 sm:$0xff]   ;;  %v3630_v52 = vld [vmem:[#allocation7 + $0xcc] ss:$16 sps:$4 sm:$0xff]  }
 0x3f9   :  { %v3629_v53 = vld [vmem:[#allocation7 + $0xc0] ss:$16 sps:$4 sm:$0xff]   ;;  %v3632_v54 = vld [vmem:[#allocation7 + $0xe4] ss:$16 sps:$4 sm:$0xff]   ;;  %v3634_v55 = vld [vmem:[#allocation7 + $0xc8] ss:$16 sps:$4 sm:$0xff]  }
 0x3fa   :  { %1171 = vmatpush1.bf16.msra.mxu0 %v3605_v35  ;;  %v3636_v56 = vld [vmem:[#allocation7 + $0xec] ss:$16 sps:$4 sm:$0xff]   ;;  %v3635_v57 = vld [vmem:[#allocation7 + $0xe0] ss:$16 sps:$4 sm:$0xff]   ;;  %v3638_v58 = vld [vmem:[#allocation7 + $0xe8] ss:$16 sps:$4 sm:$0xff]  }
 0x3fb   :  { %1172 = vmatprep.subr.bf16.mxu0 %v3608_v37  ;;  %1212 = vmatpush1.bf16.msra.mxu1 %v3610_v38  ;;  %v939_v60 = vld [vmem:[#allocation2 + $0x2] ss:$8 sm:$0xf] }
 0x3fc   :  { %1213 = vmatprep.subr.bf16.mxu1 %v3612_v39  ;;  %v941_v61 = vld [vmem:[#allocation2 + $0x22] ss:$8 sm:$0xf] }
 0x3fd   :  { %v1137_v62 = vcombine.low %v939_v60, %v941_v61 }
 0x3fe   :  { %1173 = vmatpush1.bf16.msra.mxu0 %v3611_v40 }
 0x3ff   :  { %1174 = vmatprep.subr.bf16.mxu0 %v3614_v41  ;;  %1214 = vmatpush1.bf16.msra.mxu1 %v3616_v43  ;;  %v1144_v63 = vrot.slane %v1137_v62, %v4812_v42 }
 0x400   :  { %1215 = vmatprep.subr.bf16.mxu1 %v3618_v44 }
 0x401   :  { %v1145_v0 = vcombine.high %v1144_v63, %v1144_v63  ;;  %v1152_v2 = vrot.slane %v1144_v63, %v4812_v42 }
 0x402   :  { %1175 = vmatpush1.bf16.msra.mxu0 %v3617_v45 }
 0x403   :  { %1176 = vmatprep.subr.bf16.mxu0 %v3620_v46  ;;  %1216 = vmatpush1.bf16.msra.mxu1 %v3622_v47  ;;  %v1159_v3 = vrot.slane %v1145_v0, %v4812_v42  ;;  %v1160_v18 = vcombine.high %v1152_v2, %v1152_v2 }
 0x404   :  { %1217 = vmatprep.subr.bf16.mxu1 %v3624_v48 }
 0x405   :  { %v1161_v5 = vcombine.high %v1159_v3, %v1159_v3 }
 0x406   :  { %1177 = vmatpush1.bf16.msra.mxu0 %v3623_v49 }
 0x407   :  { %1178 = vmatprep.subr.bf16.mxu0 %v3626_v50  ;;  %1218 = vmatpush1.bf16.msra.mxu1 %v3628_v51 }
 0x408   :  { %1219 = vmatprep.subr.bf16.mxu1 %v3630_v52 }
 0x40a   :  { %1179 = vmatpush1.bf16.msra.mxu0 %v3629_v53 }
 0x40b   :  { %1180 = vmatprep.subr.bf16.mxu0 %v3632_v54  ;;  %1220 = vmatpush1.bf16.msra.mxu1 %v3634_v55 }
 0x40c   :  { %1221 = vmatprep.subr.bf16.mxu1 %v3636_v56 }
 0x40e   :  { %1181 = vmatpush1.bf16.msra.mxu0 %v3635_v57 }
 0x40f   :  { %1222 = vmatpush1.bf16.msra.mxu1 %v3638_v58 }
 0x411   :  { %1199 = vmatmul.mubr.bf16.vlgmr.msra.gmra.mrb[8].mxu0 %v942_v59 }
 0x412   :  { %1240 = vmatmul.mubr.bf16.vlgmr.msra.gmra.mrb[8].mxu1 %v942_v59 }
 0x4e4   :  { %v1200_v4 = vpop.f32.mrb[8].mxu0 }
 0x4e5   :  { %v1201_v6 = vadd.f32 %v1200_v4, %v1152_v2  ;;  %v1202_v7 = vpop.f32.mrb[9].mxu0  ;;  %v1241_v11 = vpop.f32.mrb[8].mxu1 }
 0x4e6   :  { %v1203_v8 = vadd.f32 %v1202_v7, %v1159_v3  ;;  %v1204_v9 = vpop.f32.mrb[10].mxu0  ;;  %v1243_v14 = vpop.f32.mrb[9].mxu1  ;;  %v1242_v20 = vadd.f32 %v1241_v11, %v1160_v18 }
 0x4e7   :  { %v1248_v12 = vmul.f32 0.5, %v1201_v6  ;;  %v1205_v13 = vpop.f32.mrb[11].mxu0  ;;  %v1244_v16 = vadd.f32 %v1243_v14, %v1161_v5  ;;  %v1245_v17 = vpop.f32.mrb[10].mxu1 }
 0x4e8   :  { %v1249_v15 = vmul.f32 0.5, %v1203_v8  ;;  %v1246_v19 = vpop.f32.mrb[11].mxu1  ;;  %v1250_v22 = vmul.f32 0.5, %v1242_v20 }
 0x4e9   :  { %3639 = vtanh.f32 %v1248_v12 }
 0x4ea   :  { %3641 = vtanh.f32 %v1249_v15 }
 0x4eb   :  { %3643 = vtanh.f32 %v1244_v16 }
 0x4ec   :  { %3645 = vtanh.f32 %v1250_v22 }
 0x4f3   :  { %v3640_v23 = vpop.eup %3639 }
 0x4f4   :  { %v3642_v24 = vpop.eup %3641  ;;  %v1254_v25 = vadd.f32 1.0, %v3640_v23 }
 0x4f5   :  { %v1255_v26 = vadd.f32 1.0, %v3642_v24  ;;  %v3644_v27 = vpop.eup %3643 }
 0x4f6   :  { %v1257_v10 = vmul.f32 0.5, %v1254_v25  ;;  %v3646_v32 = vpop.eup %3645 }
 0x4f7   :  { %v1258_v28 = vmul.f32 0.5, %v1255_v26  ;;  %v1256_v33 = vadd.f32 1.0, %v3646_v32 }
 0x4f8   :  { %v1262_v29 = vmul.f32 %v3644_v27, %v1257_v10 }
 0x4f9   :  { %v1261_v30 = vmul.f32 %v1258_v28, %v4830_v21  ;;  %v1259_v34 = vmul.f32 0.5, %v1256_v33 }
 0x4fb   :  { %v4843_v31 = vadd.f32 %v1262_v29, %v1261_v30 }
 0x4fd   :  { %3647 = vtanh.f32 %v4843_v31 }
 0x507   :  { %v3648_v35 = vpop.eup %3647 }
 0x508   :  { %v4846_v36 = vmul.f32 %v3648_v35, %v1259_v34 }
 0x509   :  { %4395 = dma.done.wait [#allocation3 + $0x6], 64 }
 0x50a   :  { %4396 = vsyncadd [#allocation3 + $0x6], 4294967232 }
 0x50b   :  { %4397 = dma.done.wait [#allocation3 + $0x7], 64 }
 0x50c   :  { %4398 = vsyncadd [#allocation3 + $0x7], 4294967232  ;;  %1530 = vmatprep.mubr.bf16.mxu0 %v4438_v1  ;;  %1571 = vmatprep.mubr.bf16.mxu1 %v4438_v1  ;;  %v3649_v37 = vld [vmem:[#allocation7 + $0x4] ss:$16 sps:$4 sm:$0xff]   ;;  %v3651_v21 = vld [vmem:[#allocation7] ss:$16 sps:$4 sm:$0xff]   ;;  %v1274_v6 = vpack.c.bf16 %v4846_v36, %v4846_v36 }
 0x50d   :  { %1498 = vmatprep.subr.bf16.mxu0 %v3649_v37  ;;  %v3652_v38 = vld [vmem:[#allocation7 + $0xc] ss:$16 sps:$4 sm:$0xff]   ;;  %v3654_v39 = vld [vmem:[#allocation7 + $0x24] ss:$16 sps:$4 sm:$0xff]   ;;  %v3656_v40 = vld [vmem:[#allocation7 + $0x8] ss:$16 sps:$4 sm:$0xff]  }
 0x50e   :  { %1499 = vmatpush1.bf16.msra.mxu0 %v3651_v21  ;;  %v3657_v41 = vld [vmem:[#allocation7 + $0x20] ss:$16 sps:$4 sm:$0xff]   ;;  %1539 = vmatprep.subr.bf16.mxu1 %v3652_v38  ;;  %v3658_v43 = vld [vmem:[#allocation7 + $0x2c] ss:$16 sps:$4 sm:$0xff]   ;;  %v3660_v44 = vld [vmem:[#allocation7 + $0x44] ss:$16 sps:$4 sm:$0xff]  }
 0x50f   :  { %1500 = vmatprep.subr.bf16.mxu0 %v3654_v39  ;;  %1540 = vmatpush1.bf16.msra.mxu1 %v3656_v40  ;;  %v3662_v45 = vld [vmem:[#allocation7 + $0x28] ss:$16 sps:$4 sm:$0xff]   ;;  %v3663_v46 = vld [vmem:[#allocation7 + $0x40] ss:$16 sps:$4 sm:$0xff]   ;;  %v3664_v47 = vld [vmem:[#allocation7 + $0x4c] ss:$16 sps:$4 sm:$0xff]  }
 0x510   :  { %1541 = vmatprep.subr.bf16.mxu1 %v3658_v43  ;;  %v3666_v48 = vld [vmem:[#allocation7 + $0x64] ss:$16 sps:$4 sm:$0xff]   ;;  %v3668_v49 = vld [vmem:[#allocation7 + $0x48] ss:$16 sps:$4 sm:$0xff]   ;;  %v3670_v50 = vld [vmem:[#allocation7 + $0x6c] ss:$16 sps:$4 sm:$0xff]  }
 0x511   :  { %v3669_v51 = vld [vmem:[#allocation7 + $0x60] ss:$16 sps:$4 sm:$0xff]   ;;  %v3672_v52 = vld [vmem:[#allocation7 + $0x84] ss:$16 sps:$4 sm:$0xff]   ;;  %v3674_v53 = vld [vmem:[#allocation7 + $0x68] ss:$16 sps:$4 sm:$0xff]  }
 0x512   :  { %1501 = vmatpush1.bf16.msra.mxu0 %v3657_v41  ;;  %v3676_v54 = vld [vmem:[#allocation7 + $0x8c] ss:$16 sps:$4 sm:$0xff]   ;;  %v3675_v55 = vld [vmem:[#allocation7 + $0x80] ss:$16 sps:$4 sm:$0xff]   ;;  %v3678_v56 = vld [vmem:[#allocation7 + $0xa4] ss:$16 sps:$4 sm:$0xff]  }
 0x513   :  { %1502 = vmatprep.subr.bf16.mxu0 %v3660_v44  ;;  %1542 = vmatpush1.bf16.msra.mxu1 %v3662_v45  ;;  %v3680_v57 = vld [vmem:[#allocation7 + $0x88] ss:$16 sps:$4 sm:$0xff]   ;;  %v3682_v58 = vld [vmem:[#allocation7 + $0xac] ss:$16 sps:$4 sm:$0xff]   ;;  %v3681_v59 = vld [vmem:[#allocation7 + $0xa0] ss:$16 sps:$4 sm:$0xff]  }
 0x514   :  { %1543 = vmatprep.subr.bf16.mxu1 %v3664_v47  ;;  %v3684_v60 = vld [vmem:[#allocation7 + $0xc4] ss:$16 sps:$4 sm:$0xff]   ;;  %v3686_v61 = vld [vmem:[#allocation7 + $0xa8] ss:$16 sps:$4 sm:$0xff]   ;;  %v3688_v62 = vld [vmem:[#allocation7 + $0xcc] ss:$16 sps:$4 sm:$0xff]  }
 0x515   :  { %v3687_v63 = vld [vmem:[#allocation7 + $0xc0] ss:$16 sps:$4 sm:$0xff]   ;;  %v3690_v0 = vld [vmem:[#allocation7 + $0xe4] ss:$16 sps:$4 sm:$0xff]   ;;  %v3692_v2 = vld [vmem:[#allocation7 + $0xc8] ss:$16 sps:$4 sm:$0xff]  }
 0x516   :  { %1503 = vmatpush1.bf16.msra.mxu0 %v3663_v46  ;;  %v3694_v3 = vld [vmem:[#allocation7 + $0xec] ss:$16 sps:$4 sm:$0xff]   ;;  %v3693_v4 = vld [vmem:[#allocation7 + $0xe0] ss:$16 sps:$4 sm:$0xff]   ;;  %v3696_v5 = vld [vmem:[#allocation7 + $0xe8] ss:$16 sps:$4 sm:$0xff]  }
 0x517   :  { %1504 = vmatprep.subr.bf16.mxu0 %v3666_v48  ;;  %1544 = vmatpush1.bf16.msra.mxu1 %v3668_v49  ;;  %v1271_v7 = vld [vmem:[#allocation2 + $0x3] ss:$8 sm:$0xf] }
 0x518   :  { %1545 = vmatprep.subr.bf16.mxu1 %v3670_v50  ;;  %v1273_v8 = vld [vmem:[#allocation2 + $0x23] ss:$8 sm:$0xf] }
 0x519   :  { %v1469_v9 = vcombine.low %v1271_v7, %v1273_v8 }
 0x51a   :  { %1505 = vmatpush1.bf16.msra.mxu0 %v3669_v51 }
 0x51b   :  { %1506 = vmatprep.subr.bf16.mxu0 %v3672_v52  ;;  %1546 = vmatpush1.bf16.msra.mxu1 %v3674_v53  ;;  %v1476_v11 = vrot.slane %v1469_v9, %v4812_v42 }
 0x51c   :  { %1547 = vmatprep.subr.bf16.mxu1 %v3676_v54 }
 0x51d   :  { %v1477_v12 = vcombine.high %v1476_v11, %v1476_v11  ;;  %v1484_v13 = vrot.slane %v1476_v11, %v4812_v42 }
 0x51e   :  { %1507 = vmatpush1.bf16.msra.mxu0 %v3675_v55 }
 0x51f   :  { %1508 = vmatprep.subr.bf16.mxu0 %v3678_v56  ;;  %1548 = vmatpush1.bf16.msra.mxu1 %v3680_v57  ;;  %v1491_v14 = vrot.slane %v1477_v12, %v4812_v42  ;;  %v1492_v28 = vcombine.high %v1484_v13, %v1484_v13 }
 0x520   :  { %1549 = vmatprep.subr.bf16.mxu1 %v3682_v58 }
 0x521   :  { %v1493_v16 = vcombine.high %v1491_v14, %v1491_v14 }
 0x522   :  { %1509 = vmatpush1.bf16.msra.mxu0 %v3681_v59 }
 0x523   :  { %1510 = vmatprep.subr.bf16.mxu0 %v3684_v60  ;;  %1550 = vmatpush1.bf16.msra.mxu1 %v3686_v61 }
 0x524   :  { %1551 = vmatprep.subr.bf16.mxu1 %v3688_v62 }
 0x526   :  { %1511 = vmatpush1.bf16.msra.mxu0 %v3687_v63 }
 0x527   :  { %1512 = vmatprep.subr.bf16.mxu0 %v3690_v0  ;;  %1552 = vmatpush1.bf16.msra.mxu1 %v3692_v2 }
 0x528   :  { %1553 = vmatprep.subr.bf16.mxu1 %v3694_v3 }
 0x52a   :  { %1513 = vmatpush1.bf16.msra.mxu0 %v3693_v4 }
 0x52b   :  { %1554 = vmatpush1.bf16.msra.mxu1 %v3696_v5 }
 0x52d   :  { %1531 = vmatmul.mubr.bf16.vlgmr.msra.gmra.mrb[12].mxu0 %v1274_v6 }
 0x52e   :  { %1572 = vmatmul.mubr.bf16.vlgmr.msra.gmra.mrb[12].mxu1 %v1274_v6 }
 0x600   :  { %v1532_v15 = vpop.f32.mrb[12].mxu0 }
 0x601   :  { %v1533_v17 = vadd.f32 %v1532_v15, %v1484_v13  ;;  %v1534_v18 = vpop.f32.mrb[13].mxu0  ;;  %v1573_v22 = vpop.f32.mrb[12].mxu1 }
 0x602   :  { %v1535_v19 = vadd.f32 %v1534_v18, %v1491_v14  ;;  %v1536_v20 = vpop.f32.mrb[14].mxu0  ;;  %v1575_v25 = vpop.f32.mrb[13].mxu1  ;;  %v1574_v30 = vadd.f32 %v1573_v22, %v1492_v28 }
 0x603   :  { %v1580_v23 = vmul.f32 0.5, %v1533_v17  ;;  %v1537_v24 = vpop.f32.mrb[15].mxu0  ;;  %v1576_v27 = vadd.f32 %v1575_v25, %v1493_v16  ;;  %v1577_v10 = vpop.f32.mrb[14].mxu1 }
 0x604   :  { %v1581_v26 = vmul.f32 0.5, %v1535_v19  ;;  %v1578_v29 = vpop.f32.mrb[15].mxu1  ;;  %v1582_v32 = vmul.f32 0.5, %v1574_v30 }
 0x605   :  { %3697 = vtanh.f32 %v1580_v23 }
 0x606   :  { %3699 = vtanh.f32 %v1581_v26 }
 0x607   :  { %3701 = vtanh.f32 %v1576_v27 }
 0x608   :  { %3703 = vtanh.f32 %v1582_v32 }
 0x60f   :  { %v3698_v33 = vpop.eup %3697 }
 0x610   :  { %v3700_v34 = vpop.eup %3699  ;;  %v1586_v35 = vadd.f32 1.0, %v3698_v33 }
 0x611   :  { %v1587_v36 = vadd.f32 1.0, %v3700_v34  ;;  %v3702_v37 = vpop.eup %3701 }
 0x612   :  { %v1589_v21 = vmul.f32 0.5, %v1586_v35  ;;  %v3704_v43 = vpop.eup %3703 }
 0x613   :  { %v1590_v38 = vmul.f32 0.5, %v1587_v36  ;;  %v1588_v44 = vadd.f32 1.0, %v3704_v43 }
 0x614   :  { %v1594_v39 = vmul.f32 %v3702_v37, %v1589_v21 }
 0x615   :  { %v1593_v40 = vmul.f32 %v1590_v38, %v4843_v31  ;;  %v1591_v45 = vmul.f32 0.5, %v1588_v44 }
 0x617   :  { %v4856_v41 = vadd.f32 %v1594_v39, %v1593_v40 }
 0x619   :  { %3705 = vtanh.f32 %v4856_v41 }
 0x623   :  { %v3706_v46 = vpop.eup %3705 }
 0x624   :  { %v4859_v47 = vmul.f32 %v3706_v46, %v1591_v45 }
 0x625   :  { %4399 = dma.done.wait [#allocation3 + $0x8], 64 }
 0x626   :  { %4400 = vsyncadd [#allocation3 + $0x8], 4294967232 }
 0x627   :  { %4401 = dma.done.wait [#allocation3 + $0x9], 64 }
 0x628   :  { %4402 = vsyncadd [#allocation3 + $0x9], 4294967232  ;;  %1862 = vmatprep.mubr.bf16.mxu0 %v4438_v1  ;;  %1903 = vmatprep.mubr.bf16.mxu1 %v4438_v1  ;;  %v3707_v48 = vld [vmem:[#allocation7 + $0x4] ss:$16 sps:$4 sm:$0xff]   ;;  %v3709_v31 = vld [vmem:[#allocation7] ss:$16 sps:$4 sm:$0xff]   ;;  %v1606_v17 = vpack.c.bf16 %v4859_v47, %v4859_v47 }
 0x629   :  { %1830 = vmatprep.subr.bf16.mxu0 %v3707_v48  ;;  %v3710_v49 = vld [vmem:[#allocation7 + $0xc] ss:$16 sps:$4 sm:$0xff]   ;;  %v3712_v50 = vld [vmem:[#allocation7 + $0x24] ss:$16 sps:$4 sm:$0xff]   ;;  %v3714_v51 = vld [vmem:[#allocation7 + $0x8] ss:$16 sps:$4 sm:$0xff]  }
 0x62a   :  { %1831 = vmatpush1.bf16.msra.mxu0 %v3709_v31  ;;  %v3715_v52 = vld [vmem:[#allocation7 + $0x20] ss:$16 sps:$4 sm:$0xff]   ;;  %1871 = vmatprep.subr.bf16.mxu1 %v3710_v49  ;;  %v3716_v53 = vld [vmem:[#allocation7 + $0x2c] ss:$16 sps:$4 sm:$0xff]   ;;  %v3718_v54 = vld [vmem:[#allocation7 + $0x44] ss:$16 sps:$4 sm:$0xff]  }
 0x62b   :  { %1832 = vmatprep.subr.bf16.mxu0 %v3712_v50  ;;  %1872 = vmatpush1.bf16.msra.mxu1 %v3714_v51  ;;  %v3720_v55 = vld [vmem:[#allocation7 + $0x28] ss:$16 sps:$4 sm:$0xff]   ;;  %v3721_v56 = vld [vmem:[#allocation7 + $0x40] ss:$16 sps:$4 sm:$0xff]   ;;  %v3722_v57 = vld [vmem:[#allocation7 + $0x4c] ss:$16 sps:$4 sm:$0xff]  }
 0x62c   :  { %1873 = vmatprep.subr.bf16.mxu1 %v3716_v53  ;;  %v3724_v58 = vld [vmem:[#allocation7 + $0x64] ss:$16 sps:$4 sm:$0xff]   ;;  %v3726_v59 = vld [vmem:[#allocation7 + $0x48] ss:$16 sps:$4 sm:$0xff]   ;;  %v3728_v60 = vld [vmem:[#allocation7 + $0x6c] ss:$16 sps:$4 sm:$0xff]  }
 0x62d   :  { %v3727_v61 = vld [vmem:[#allocation7 + $0x60] ss:$16 sps:$4 sm:$0xff]   ;;  %v3730_v62 = vld [vmem:[#allocation7 + $0x84] ss:$16 sps:$4 sm:$0xff]   ;;  %v3732_v63 = vld [vmem:[#allocation7 + $0x68] ss:$16 sps:$4 sm:$0xff]  }
 0x62e   :  { %1833 = vmatpush1.bf16.msra.mxu0 %v3715_v52  ;;  %v3734_v0 = vld [vmem:[#allocation7 + $0x8c] ss:$16 sps:$4 sm:$0xff]   ;;  %v3733_v2 = vld [vmem:[#allocation7 + $0x80] ss:$16 sps:$4 sm:$0xff]   ;;  %v3736_v3 = vld [vmem:[#allocation7 + $0xa4] ss:$16 sps:$4 sm:$0xff]  }
 0x62f   :  { %1834 = vmatprep.subr.bf16.mxu0 %v3718_v54  ;;  %1874 = vmatpush1.bf16.msra.mxu1 %v3720_v55  ;;  %v3738_v4 = vld [vmem:[#allocation7 + $0x88] ss:$16 sps:$4 sm:$0xff]   ;;  %v3740_v5 = vld [vmem:[#allocation7 + $0xac] ss:$16 sps:$4 sm:$0xff]   ;;  %v3739_v6 = vld [vmem:[#allocation7 + $0xa0] ss:$16 sps:$4 sm:$0xff]  }
 0x630   :  { %1875 = vmatprep.subr.bf16.mxu1 %v3722_v57  ;;  %v3742_v7 = vld [vmem:[#allocation7 + $0xc4] ss:$16 sps:$4 sm:$0xff]   ;;  %v3744_v8 = vld [vmem:[#allocation7 + $0xa8] ss:$16 sps:$4 sm:$0xff]   ;;  %v3746_v9 = vld [vmem:[#allocation7 + $0xcc] ss:$16 sps:$4 sm:$0xff]  }
 0x631   :  { %v3745_v11 = vld [vmem:[#allocation7 + $0xc0] ss:$16 sps:$4 sm:$0xff]   ;;  %v3748_v12 = vld [vmem:[#allocation7 + $0xe4] ss:$16 sps:$4 sm:$0xff]   ;;  %v3750_v13 = vld [vmem:[#allocation7 + $0xc8] ss:$16 sps:$4 sm:$0xff]  }
 0x632   :  { %1835 = vmatpush1.bf16.msra.mxu0 %v3721_v56  ;;  %v3752_v14 = vld [vmem:[#allocation7 + $0xec] ss:$16 sps:$4 sm:$0xff]   ;;  %v3751_v15 = vld [vmem:[#allocation7 + $0xe0] ss:$16 sps:$4 sm:$0xff]   ;;  %v3754_v16 = vld [vmem:[#allocation7 + $0xe8] ss:$16 sps:$4 sm:$0xff]  }
 0x633   :  { %1836 = vmatprep.subr.bf16.mxu0 %v3724_v58  ;;  %1876 = vmatpush1.bf16.msra.mxu1 %v3726_v59  ;;  %v1603_v18 = vld [vmem:[#allocation2 + $0x4] ss:$8 sm:$0xf] }
 0x634   :  { %1877 = vmatprep.subr.bf16.mxu1 %v3728_v60  ;;  %v1605_v19 = vld [vmem:[#allocation2 + $0x24] ss:$8 sm:$0xf] }
 0x635   :  { %v1801_v20 = vcombine.low %v1603_v18, %v1605_v19 }
 0x636   :  { %1837 = vmatpush1.bf16.msra.mxu0 %v3727_v61 }
 0x637   :  { %1838 = vmatprep.subr.bf16.mxu0 %v3730_v62  ;;  %1878 = vmatpush1.bf16.msra.mxu1 %v3732_v63  ;;  %v1808_v22 = vrot.slane %v1801_v20, %v4812_v42 }
 0x638   :  { %1879 = vmatprep.subr.bf16.mxu1 %v3734_v0 }
 0x639   :  { %v1809_v23 = vcombine.high %v1808_v22, %v1808_v22  ;;  %v1816_v24 = vrot.slane %v1808_v22, %v4812_v42 }
 0x63a   :  { %1839 = vmatpush1.bf16.msra.mxu0 %v3733_v2 }
 0x63b   :  { %1840 = vmatprep.subr.bf16.mxu0 %v3736_v3  ;;  %1880 = vmatpush1.bf16.msra.mxu1 %v3738_v4  ;;  %v1823_v25 = vrot.slane %v1809_v23, %v4812_v42  ;;  %v1824_v38 = vcombine.high %v1816_v24, %v1816_v24 }
 0x63c   :  { %1881 = vmatprep.subr.bf16.mxu1 %v3740_v5 }
 0x63d   :  { %v1825_v27 = vcombine.high %v1823_v25, %v1823_v25 }
 0x63e   :  { %1841 = vmatpush1.bf16.msra.mxu0 %v3739_v6 }
 0x63f   :  { %1842 = vmatprep.subr.bf16.mxu0 %v3742_v7  ;;  %1882 = vmatpush1.bf16.msra.mxu1 %v3744_v8 }
 0x640   :  { %1883 = vmatprep.subr.bf16.mxu1 %v3746_v9 }
 0x642   :  { %1843 = vmatpush1.bf16.msra.mxu0 %v3745_v11 }
 0x643   :  { %1844 = vmatprep.subr.bf16.mxu0 %v3748_v12  ;;  %1884 = vmatpush1.bf16.msra.mxu1 %v3750_v13 }
 0x644   :  { %1885 = vmatprep.subr.bf16.mxu1 %v3752_v14 }
 0x646   :  { %1845 = vmatpush1.bf16.msra.mxu0 %v3751_v15 }
 0x647   :  { %1886 = vmatpush1.bf16.msra.mxu1 %v3754_v16 }
 0x649   :  { %1863 = vmatmul.mubr.bf16.vlgmr.msra.gmra.mrb[16].mxu0 %v1606_v17 }
 0x64a   :  { %1904 = vmatmul.mubr.bf16.vlgmr.msra.gmra.mrb[16].mxu1 %v1606_v17 }
 0x71c   :  { %v1864_v26 = vpop.f32.mrb[16].mxu0 }
 0x71d   :  { %v1865_v10 = vadd.f32 %v1864_v26, %v1816_v24  ;;  %v1866_v28 = vpop.f32.mrb[17].mxu0  ;;  %v1905_v32 = vpop.f32.mrb[16].mxu1 }
 0x71e   :  { %v1867_v29 = vadd.f32 %v1866_v28, %v1823_v25  ;;  %v1868_v30 = vpop.f32.mrb[18].mxu0  ;;  %v1907_v35 = vpop.f32.mrb[17].mxu1  ;;  %v1906_v40 = vadd.f32 %v1905_v32, %v1824_v38 }
 0x71f   :  { %v1912_v33 = vmul.f32 0.5, %v1865_v10  ;;  %v1869_v34 = vpop.f32.mrb[19].mxu0  ;;  %v1908_v37 = vadd.f32 %v1907_v35, %v1825_v27  ;;  %v1909_v21 = vpop.f32.mrb[18].mxu1 }
 0x720   :  { %v1913_v36 = vmul.f32 0.5, %v1867_v29  ;;  %v1910_v39 = vpop.f32.mrb[19].mxu1  ;;  %v1914_v43 = vmul.f32 0.5, %v1906_v40 }
 0x721   :  { %3755 = vtanh.f32 %v1912_v33 }
 0x722   :  { %3757 = vtanh.f32 %v1913_v36 }
 0x723   :  { %3759 = vtanh.f32 %v1908_v37 }
 0x724   :  { %3761 = vtanh.f32 %v1914_v43 }
 0x72b   :  { %v3756_v44 = vpop.eup %3755 }
 0x72c   :  { %v3758_v45 = vpop.eup %3757  ;;  %v1918_v46 = vadd.f32 1.0, %v3756_v44 }
 0x72d   :  { %v1919_v47 = vadd.f32 1.0, %v3758_v45  ;;  %v3760_v48 = vpop.eup %3759 }
 0x72e   :  { %v1921_v31 = vmul.f32 0.5, %v1918_v46  ;;  %v3762_v53 = vpop.eup %3761 }
 0x72f   :  { %v1922_v49 = vmul.f32 0.5, %v1919_v47  ;;  %v1920_v54 = vadd.f32 1.0, %v3762_v53 }
 0x730   :  { %v1926_v50 = vmul.f32 %v3760_v48, %v1921_v31 }
 0x731   :  { %v1925_v51 = vmul.f32 %v1922_v49, %v4856_v41  ;;  %v1923_v55 = vmul.f32 0.5, %v1920_v54 }
 0x733   :  { %v4869_v52 = vadd.f32 %v1926_v50, %v1925_v51 }
 0x735   :  { %3763 = vtanh.f32 %v4869_v52 }
 0x73f   :  { %v3764_v56 = vpop.eup %3763 }
 0x740   :  { %v4872_v57 = vmul.f32 %v3764_v56, %v1923_v55 }
 0x741   :  { %4403 = dma.done.wait [#allocation3 + $0xa], 64 }
 0x742   :  { %4404 = vsyncadd [#allocation3 + $0xa], 4294967232 }
 0x743   :  { %4405 = dma.done.wait [#allocation3 + $0xb], 64 }
 0x744   :  { %4406 = vsyncadd [#allocation3 + $0xb], 4294967232  ;;  %2194 = vmatprep.mubr.bf16.mxu0 %v4438_v1  ;;  %2235 = vmatprep.mubr.bf16.mxu1 %v4438_v1  ;;  %v3765_v58 = vld [vmem:[#allocation7 + $0x4] ss:$16 sps:$4 sm:$0xff]   ;;  %v3767_v41 = vld [vmem:[#allocation7] ss:$16 sps:$4 sm:$0xff]   ;;  %v1938_v10 = vpack.c.bf16 %v4872_v57, %v4872_v57 }
 0x745   :  { %2162 = vmatprep.subr.bf16.mxu0 %v3765_v58  ;;  %v3768_v59 = vld [vmem:[#allocation7 + $0xc] ss:$16 sps:$4 sm:$0xff]   ;;  %v3770_v60 = vld [vmem:[#allocation7 + $0x24] ss:$16 sps:$4 sm:$0xff]   ;;  %v3772_v61 = vld [vmem:[#allocation7 + $0x8] ss:$16 sps:$4 sm:$0xff]  }
 0x746   :  { %2163 = vmatpush1.bf16.msra.mxu0 %v3767_v41  ;;  %v3773_v62 = vld [vmem:[#allocation7 + $0x20] ss:$16 sps:$4 sm:$0xff]   ;;  %2203 = vmatprep.subr.bf16.mxu1 %v3768_v59  ;;  %v3774_v63 = vld [vmem:[#allocation7 + $0x2c] ss:$16 sps:$4 sm:$0xff]   ;;  %v3776_v0 = vld [vmem:[#allocation7 + $0x44] ss:$16 sps:$4 sm:$0xff]  }
 0x747   :  { %2164 = vmatprep.subr.bf16.mxu0 %v3770_v60  ;;  %2204 = vmatpush1.bf16.msra.mxu1 %v3772_v61  ;;  %v3778_v2 = vld [vmem:[#allocation7 + $0x28] ss:$16 sps:$4 sm:$0xff]   ;;  %v3779_v3 = vld [vmem:[#allocation7 + $0x40] ss:$16 sps:$4 sm:$0xff]   ;;  %v3780_v4 = vld [vmem:[#allocation7 + $0x4c] ss:$16 sps:$4 sm:$0xff]  }
 0x748   :  { %2205 = vmatprep.subr.bf16.mxu1 %v3774_v63  ;;  %v3782_v5 = vld [vmem:[#allocation7 + $0x64] ss:$16 sps:$4 sm:$0xff]   ;;  %v3784_v6 = vld [vmem:[#allocation7 + $0x48] ss:$16 sps:$4 sm:$0xff]   ;;  %v3786_v7 = vld [vmem:[#allocation7 + $0x6c] ss:$16 sps:$4 sm:$0xff]  }
 0x749   :  { %v3785_v8 = vld [vmem:[#allocation7 + $0x60] ss:$16 sps:$4 sm:$0xff]   ;;  %v3788_v9 = vld [vmem:[#allocation7 + $0x84] ss:$16 sps:$4 sm:$0xff]   ;;  %v3790_v11 = vld [vmem:[#allocation7 + $0x68] ss:$16 sps:$4 sm:$0xff]  }
 0x74a   :  { %2165 = vmatpush1.bf16.msra.mxu0 %v3773_v62  ;;  %v3792_v12 = vld [vmem:[#allocation7 + $0x8c] ss:$16 sps:$4 sm:$0xff]   ;;  %v3791_v13 = vld [vmem:[#allocation7 + $0x80] ss:$16 sps:$4 sm:$0xff]   ;;  %v3794_v14 = vld [vmem:[#allocation7 + $0xa4] ss:$16 sps:$4 sm:$0xff]  }
 0x74b   :  { %2166 = vmatprep.subr.bf16.mxu0 %v3776_v0  ;;  %2206 = vmatpush1.bf16.msra.mxu1 %v3778_v2  ;;  %v3796_v15 = vld [vmem:[#allocation7 + $0x88] ss:$16 sps:$4 sm:$0xff]   ;;  %v3798_v16 = vld [vmem:[#allocation7 + $0xac] ss:$16 sps:$4 sm:$0xff]   ;;  %v3797_v17 = vld [vmem:[#allocation7 + $0xa0] ss:$16 sps:$4 sm:$0xff]  }
 0x74c   :  { %2207 = vmatprep.subr.bf16.mxu1 %v3780_v4  ;;  %v3800_v18 = vld [vmem:[#allocation7 + $0xc4] ss:$16 sps:$4 sm:$0xff]   ;;  %v3802_v19 = vld [vmem:[#allocation7 + $0xa8] ss:$16 sps:$4 sm:$0xff]   ;;  %v3804_v20 = vld [vmem:[#allocation7 + $0xcc] ss:$16 sps:$4 sm:$0xff]  }
 0x74d   :  { %v3803_v22 = vld [vmem:[#allocation7 + $0xc0] ss:$16 sps:$4 sm:$0xff]   ;;  %v3806_v23 = vld [vmem:[#allocation7 + $0xe4] ss:$16 sps:$4 sm:$0xff]   ;;  %v3808_v24 = vld [vmem:[#allocation7 + $0xc8] ss:$16 sps:$4 sm:$0xff]  }
 0x74e   :  { %2167 = vmatpush1.bf16.msra.mxu0 %v3779_v3  ;;  %v3810_v25 = vld [vmem:[#allocation7 + $0xec] ss:$16 sps:$4 sm:$0xff]   ;;  %v3809_v26 = vld [vmem:[#allocation7 + $0xe0] ss:$16 sps:$4 sm:$0xff]   ;;  %v3812_v27 = vld [vmem:[#allocation7 + $0xe8] ss:$16 sps:$4 sm:$0xff]  }
 0x74f   :  { %2168 = vmatprep.subr.bf16.mxu0 %v3782_v5  ;;  %2208 = vmatpush1.bf16.msra.mxu1 %v3784_v6  ;;  %v1935_v28 = vld [vmem:[#allocation2 + $0x5] ss:$8 sm:$0xf] }
 0x750   :  { %2209 = vmatprep.subr.bf16.mxu1 %v3786_v7  ;;  %v1937_v29 = vld [vmem:[#allocation2 + $0x25] ss:$8 sm:$0xf] }
 0x751   :  { %v2133_v30 = vcombine.low %v1935_v28, %v1937_v29 }
 0x752   :  { %2169 = vmatpush1.bf16.msra.mxu0 %v3785_v8 }
 0x753   :  { %2170 = vmatprep.subr.bf16.mxu0 %v3788_v9  ;;  %2210 = vmatpush1.bf16.msra.mxu1 %v3790_v11  ;;  %v2140_v32 = vrot.slane %v2133_v30, %v4812_v42 }
 0x754   :  { %2211 = vmatprep.subr.bf16.mxu1 %v3792_v12 }
 0x755   :  { %v2141_v33 = vcombine.high %v2140_v32, %v2140_v32  ;;  %v2148_v34 = vrot.slane %v2140_v32, %v4812_v42 }
 0x756   :  { %2171 = vmatpush1.bf16.msra.mxu0 %v3791_v13 }
 0x757   :  { %2172 = vmatprep.subr.bf16.mxu0 %v3794_v14  ;;  %2212 = vmatpush1.bf16.msra.mxu1 %v3796_v15  ;;  %v2155_v35 = vrot.slane %v2141_v33, %v4812_v42  ;;  %v2156_v49 = vcombine.high %v2148_v34, %v2148_v34 }
 0x758   :  { %2213 = vmatprep.subr.bf16.mxu1 %v3798_v16 }
 0x759   :  { %v2157_v37 = vcombine.high %v2155_v35, %v2155_v35 }
 0x75a   :  { %2173 = vmatpush1.bf16.msra.mxu0 %v3797_v17 }
 0x75b   :  { %2174 = vmatprep.subr.bf16.mxu0 %v3800_v18  ;;  %2214 = vmatpush1.bf16.msra.mxu1 %v3802_v19 }
 0x75c   :  { %2215 = vmatprep.subr.bf16.mxu1 %v3804_v20 }
 0x75e   :  { %2175 = vmatpush1.bf16.msra.mxu0 %v3803_v22 }
 0x75f   :  { %2176 = vmatprep.subr.bf16.mxu0 %v3806_v23  ;;  %2216 = vmatpush1.bf16.msra.mxu1 %v3808_v24 }
 0x760   :  { %2217 = vmatprep.subr.bf16.mxu1 %v3810_v25 }
 0x762   :  { %2177 = vmatpush1.bf16.msra.mxu0 %v3809_v26 }
 0x763   :  { %2218 = vmatpush1.bf16.msra.mxu1 %v3812_v27 }
 0x765   :  { %2195 = vmatmul.mubr.bf16.vlgmr.msra.gmra.mrb[20].mxu0 %v1938_v10 }
 0x766   :  { %2236 = vmatmul.mubr.bf16.vlgmr.msra.gmra.mrb[20].mxu1 %v1938_v10 }
 0x838   :  { %v2196_v36 = vpop.f32.mrb[20].mxu0 }
 0x839   :  { %v2197_v21 = vadd.f32 %v2196_v36, %v2148_v34  ;;  %v2198_v38 = vpop.f32.mrb[21].mxu0  ;;  %v2237_v43 = vpop.f32.mrb[20].mxu1 }
 0x83a   :  { %v2199_v39 = vadd.f32 %v2198_v38, %v2155_v35  ;;  %v2200_v40 = vpop.f32.mrb[22].mxu0  ;;  %v2239_v46 = vpop.f32.mrb[21].mxu1  ;;  %v2238_v51 = vadd.f32 %v2237_v43, %v2156_v49 }
 0x83b   :  { %v2244_v44 = vmul.f32 0.5, %v2197_v21  ;;  %v2201_v45 = vpop.f32.mrb[23].mxu0  ;;  %v2240_v48 = vadd.f32 %v2239_v46, %v2157_v37  ;;  %v2241_v31 = vpop.f32.mrb[22].mxu1 }
 0x83c   :  { %v2245_v47 = vmul.f32 0.5, %v2199_v39  ;;  %v2242_v50 = vpop.f32.mrb[23].mxu1  ;;  %v2246_v53 = vmul.f32 0.5, %v2238_v51 }
 0x83d   :  { %3813 = vtanh.f32 %v2244_v44 }
 0x83e   :  { %3815 = vtanh.f32 %v2245_v47 }
 0x83f   :  { %3817 = vtanh.f32 %v2240_v48 }
 0x840   :  { %3819 = vtanh.f32 %v2246_v53 }
 0x847   :  { %v3814_v54 = vpop.eup %3813 }
 0x848   :  { %v3816_v55 = vpop.eup %3815  ;;  %v2250_v56 = vadd.f32 1.0, %v3814_v54 }
 0x849   :  { %v2251_v57 = vadd.f32 1.0, %v3816_v55  ;;  %v3818_v58 = vpop.eup %3817 }
 0x84a   :  { %v2253_v41 = vmul.f32 0.5, %v2250_v56  ;;  %v3820_v63 = vpop.eup %3819 }
 0x84b   :  { %v2254_v59 = vmul.f32 0.5, %v2251_v57  ;;  %v2252_v0 = vadd.f32 1.0, %v3820_v63 }
 0x84c   :  { %v2258_v60 = vmul.f32 %v3818_v58, %v2253_v41 }
 0x84d   :  { %v2257_v61 = vmul.f32 %v2254_v59, %v4869_v52  ;;  %v2255_v2 = vmul.f32 0.5, %v2252_v0 }
 0x84f   :  { %v4882_v62 = vadd.f32 %v2258_v60, %v2257_v61 }
 0x851   :  { %3821 = vtanh.f32 %v4882_v62 }
 0x85b   :  { %v3822_v3 = vpop.eup %3821 }
 0x85c   :  { %v4885_v4 = vmul.f32 %v3822_v3, %v2255_v2 }
 0x85d   :  { %4407 = dma.done.wait [#allocation3 + $0xc], 64 }
 0x85e   :  { %4408 = vsyncadd [#allocation3 + $0xc], 4294967232 }
 0x85f   :  { %4409 = dma.done.wait [#allocation3 + $0xd], 64 }
 0x860   :  { %4410 = vsyncadd [#allocation3 + $0xd], 4294967232  ;;  %2526 = vmatprep.mubr.bf16.mxu0 %v4438_v1  ;;  %2567 = vmatprep.mubr.bf16.mxu1 %v4438_v1  ;;  %v3823_v5 = vld [vmem:[#allocation7 + $0x4] ss:$16 sps:$4 sm:$0xff]   ;;  %v3825_v52 = vld [vmem:[#allocation7] ss:$16 sps:$4 sm:$0xff]   ;;  %v2270_v21 = vpack.c.bf16 %v4885_v4, %v4885_v4 }
 0x861   :  { %2494 = vmatprep.subr.bf16.mxu0 %v3823_v5  ;;  %v3826_v6 = vld [vmem:[#allocation7 + $0xc] ss:$16 sps:$4 sm:$0xff]   ;;  %v3828_v7 = vld [vmem:[#allocation7 + $0x24] ss:$16 sps:$4 sm:$0xff]   ;;  %v3830_v8 = vld [vmem:[#allocation7 + $0x8] ss:$16 sps:$4 sm:$0xff]  }
 0x862   :  { %2495 = vmatpush1.bf16.msra.mxu0 %v3825_v52  ;;  %v3831_v9 = vld [vmem:[#allocation7 + $0x20] ss:$16 sps:$4 sm:$0xff]   ;;  %2535 = vmatprep.subr.bf16.mxu1 %v3826_v6  ;;  %v3832_v11 = vld [vmem:[#allocation7 + $0x2c] ss:$16 sps:$4 sm:$0xff]   ;;  %v3834_v12 = vld [vmem:[#allocation7 + $0x44] ss:$16 sps:$4 sm:$0xff]  }
 0x863   :  { %2496 = vmatprep.subr.bf16.mxu0 %v3828_v7  ;;  %2536 = vmatpush1.bf16.msra.mxu1 %v3830_v8  ;;  %v3836_v13 = vld [vmem:[#allocation7 + $0x28] ss:$16 sps:$4 sm:$0xff]   ;;  %v3837_v14 = vld [vmem:[#allocation7 + $0x40] ss:$16 sps:$4 sm:$0xff]   ;;  %v3838_v15 = vld [vmem:[#allocation7 + $0x4c] ss:$16 sps:$4 sm:$0xff]  }
 0x864   :  { %2537 = vmatprep.subr.bf16.mxu1 %v3832_v11  ;;  %v3840_v16 = vld [vmem:[#allocation7 + $0x64] ss:$16 sps:$4 sm:$0xff]   ;;  %v3842_v17 = vld [vmem:[#allocation7 + $0x48] ss:$16 sps:$4 sm:$0xff]   ;;  %v3844_v18 = vld [vmem:[#allocation7 + $0x6c] ss:$16 sps:$4 sm:$0xff]  }
 0x865   :  { %v3843_v19 = vld [vmem:[#allocation7 + $0x60] ss:$16 sps:$4 sm:$0xff]   ;;  %v3846_v20 = vld [vmem:[#allocation7 + $0x84] ss:$16 sps:$4 sm:$0xff]   ;;  %v3848_v22 = vld [vmem:[#allocation7 + $0x68] ss:$16 sps:$4 sm:$0xff]  }
 0x866   :  { %2497 = vmatpush1.bf16.msra.mxu0 %v3831_v9  ;;  %v3850_v23 = vld [vmem:[#allocation7 + $0x8c] ss:$16 sps:$4 sm:$0xff]   ;;  %v3849_v24 = vld [vmem:[#allocation7 + $0x80] ss:$16 sps:$4 sm:$0xff]   ;;  %v3852_v25 = vld [vmem:[#allocation7 + $0xa4] ss:$16 sps:$4 sm:$0xff]  }
 0x867   :  { %2498 = vmatprep.subr.bf16.mxu0 %v3834_v12  ;;  %2538 = vmatpush1.bf16.msra.mxu1 %v3836_v13  ;;  %v3854_v26 = vld [vmem:[#allocation7 + $0x88] ss:$16 sps:$4 sm:$0xff]   ;;  %v3856_v27 = vld [vmem:[#allocation7 + $0xac] ss:$16 sps:$4 sm:$0xff]   ;;  %v3855_v10 = vld [vmem:[#allocation7 + $0xa0] ss:$16 sps:$4 sm:$0xff]  }
 0x868   :  { %2539 = vmatprep.subr.bf16.mxu1 %v3838_v15  ;;  %v3858_v28 = vld [vmem:[#allocation7 + $0xc4] ss:$16 sps:$4 sm:$0xff]   ;;  %v3860_v29 = vld [vmem:[#allocation7 + $0xa8] ss:$16 sps:$4 sm:$0xff]   ;;  %v3862_v30 = vld [vmem:[#allocation7 + $0xcc] ss:$16 sps:$4 sm:$0xff]  }
 0x869   :  { %v3861_v32 = vld [vmem:[#allocation7 + $0xc0] ss:$16 sps:$4 sm:$0xff]   ;;  %v3864_v33 = vld [vmem:[#allocation7 + $0xe4] ss:$16 sps:$4 sm:$0xff]   ;;  %v3866_v34 = vld [vmem:[#allocation7 + $0xc8] ss:$16 sps:$4 sm:$0xff]  }
 0x86a   :  { %2499 = vmatpush1.bf16.msra.mxu0 %v3837_v14  ;;  %v3868_v35 = vld [vmem:[#allocation7 + $0xec] ss:$16 sps:$4 sm:$0xff]   ;;  %v3867_v36 = vld [vmem:[#allocation7 + $0xe0] ss:$16 sps:$4 sm:$0xff]   ;;  %v3870_v37 = vld [vmem:[#allocation7 + $0xe8] ss:$16 sps:$4 sm:$0xff]  }
 0x86b   :  { %2500 = vmatprep.subr.bf16.mxu0 %v3840_v16  ;;  %2540 = vmatpush1.bf16.msra.mxu1 %v3842_v17  ;;  %v2267_v38 = vld [vmem:[#allocation2 + $0x6] ss:$8 sm:$0xf] }
 0x86c   :  { %2541 = vmatprep.subr.bf16.mxu1 %v3844_v18  ;;  %v2269_v39 = vld [vmem:[#allocation2 + $0x26] ss:$8 sm:$0xf] }
 0x86d   :  { %v2465_v40 = vcombine.low %v2267_v38, %v2269_v39 }
 0x86e   :  { %2501 = vmatpush1.bf16.msra.mxu0 %v3843_v19 }
 0x86f   :  { %2502 = vmatprep.subr.bf16.mxu0 %v3846_v20  ;;  %2542 = vmatpush1.bf16.msra.mxu1 %v3848_v22  ;;  %v2472_v43 = vrot.slane %v2465_v40, %v4812_v42 }
 0x870   :  { %2543 = vmatprep.subr.bf16.mxu1 %v3850_v23 }
 0x871   :  { %v2473_v44 = vcombine.high %v2472_v43, %v2472_v43  ;;  %v2480_v45 = vrot.slane %v2472_v43, %v4812_v42 }
 0x872   :  { %2503 = vmatpush1.bf16.msra.mxu0 %v3849_v24 }
 0x873   :  { %2504 = vmatprep.subr.bf16.mxu0 %v3852_v25  ;;  %2544 = vmatpush1.bf16.msra.mxu1 %v3854_v26  ;;  %v2487_v46 = vrot.slane %v2473_v44, %v4812_v42  ;;  %v2488_v59 = vcombine.high %v2480_v45, %v2480_v45 }
 0x874   :  { %2545 = vmatprep.subr.bf16.mxu1 %v3856_v27 }
 0x875   :  { %v2489_v48 = vcombine.high %v2487_v46, %v2487_v46 }
 0x876   :  { %2505 = vmatpush1.bf16.msra.mxu0 %v3855_v10 }
 0x877   :  { %2506 = vmatprep.subr.bf16.mxu0 %v3858_v28  ;;  %2546 = vmatpush1.bf16.msra.mxu1 %v3860_v29 }
 0x878   :  { %2547 = vmatprep.subr.bf16.mxu1 %v3862_v30 }
 0x87a   :  { %2507 = vmatpush1.bf16.msra.mxu0 %v3861_v32 }
 0x87b   :  { %2508 = vmatprep.subr.bf16.mxu0 %v3864_v33  ;;  %2548 = vmatpush1.bf16.msra.mxu1 %v3866_v34 }
 0x87c   :  { %2549 = vmatprep.subr.bf16.mxu1 %v3868_v35 }
 0x87e   :  { %2509 = vmatpush1.bf16.msra.mxu0 %v3867_v36 }
 0x87f   :  { %2550 = vmatpush1.bf16.msra.mxu1 %v3870_v37 }
 0x881   :  { %2527 = vmatmul.mubr.bf16.vlgmr.msra.gmra.mrb[24].mxu0 %v2270_v21 }
 0x882   :  { %2568 = vmatmul.mubr.bf16.vlgmr.msra.gmra.mrb[24].mxu1 %v2270_v21 }
 0x954   :  { %v2528_v47 = vpop.f32.mrb[24].mxu0 }
 0x955   :  { %v2529_v31 = vadd.f32 %v2528_v47, %v2480_v45  ;;  %v2530_v49 = vpop.f32.mrb[25].mxu0  ;;  %v2569_v53 = vpop.f32.mrb[24].mxu1 }
 0x956   :  { %v2531_v50 = vadd.f32 %v2530_v49, %v2487_v46  ;;  %v2532_v51 = vpop.f32.mrb[26].mxu0  ;;  %v2571_v56 = vpop.f32.mrb[25].mxu1  ;;  %v2570_v61 = vadd.f32 %v2569_v53, %v2488_v59 }
 0x957   :  { %v2576_v54 = vmul.f32 0.5, %v2529_v31  ;;  %v2533_v55 = vpop.f32.mrb[27].mxu0  ;;  %v2572_v58 = vadd.f32 %v2571_v56, %v2489_v48  ;;  %v2573_v41 = vpop.f32.mrb[26].mxu1 }
 0x958   :  { %v2577_v57 = vmul.f32 0.5, %v2531_v50  ;;  %v2574_v60 = vpop.f32.mrb[27].mxu1  ;;  %v2578_v63 = vmul.f32 0.5, %v2570_v61 }
 0x959   :  { %3871 = vtanh.f32 %v2576_v54 }
 0x95a   :  { %3873 = vtanh.f32 %v2577_v57 }
 0x95b   :  { %3875 = vtanh.f32 %v2572_v58 }
 0x95c   :  { %3877 = vtanh.f32 %v2578_v63 }
 0x963   :  { %v3872_v0 = vpop.eup %3871 }
 0x964   :  { %v3874_v2 = vpop.eup %3873  ;;  %v2582_v3 = vadd.f32 1.0, %v3872_v0 }
 0x965   :  { %v2583_v4 = vadd.f32 1.0, %v3874_v2  ;;  %v3876_v5 = vpop.eup %3875 }
 0x966   :  { %v2585_v52 = vmul.f32 0.5, %v2582_v3  ;;  %v3878_v11 = vpop.eup %3877 }
 0x967   :  { %v2586_v6 = vmul.f32 0.5, %v2583_v4  ;;  %v2584_v12 = vadd.f32 1.0, %v3878_v11 }
 0x968   :  { %v2590_v7 = vmul.f32 %v3876_v5, %v2585_v52 }
 0x969   :  { %v2589_v8 = vmul.f32 %v2586_v6, %v4882_v62  ;;  %v2587_v13 = vmul.f32 0.5, %v2584_v12 }
 0x96b   :  { %v4895_v9 = vadd.f32 %v2590_v7, %v2589_v8 }
 0x96d   :  { %3879 = vtanh.f32 %v4895_v9 }
 0x977   :  { %v3880_v14 = vpop.eup %3879 }
 0x978   :  { %v4898_v15 = vmul.f32 %v3880_v14, %v2587_v13 }
 0x979   :  { %4411 = dma.done.wait [#allocation3 + $0xe], 64 }
 0x97a   :  { %4412 = vsyncadd [#allocation3 + $0xe], 4294967232 }
 0x97b   :  { %4413 = dma.done.wait [#allocation3 + $0xf], 64 }
 0x97c   :  { %4414 = vsyncadd [#allocation3 + $0xf], 4294967232  ;;  %2858 = vmatprep.mubr.bf16.mxu0 %v4438_v1  ;;  %2899 = vmatprep.mubr.bf16.mxu1 %v4438_v1  ;;  %v3881_v16 = vld [vmem:[#allocation7 + $0x4] ss:$16 sps:$4 sm:$0xff]   ;;  %v3883_v62 = vld [vmem:[#allocation7] ss:$16 sps:$4 sm:$0xff]   ;;  %v2602_v48 = vpack.c.bf16 %v4898_v15, %v4898_v15 }
 0x97d   :  { %2826 = vmatprep.subr.bf16.mxu0 %v3881_v16  ;;  %v3884_v17 = vld [vmem:[#allocation7 + $0xc] ss:$16 sps:$4 sm:$0xff]   ;;  %v3886_v18 = vld [vmem:[#allocation7 + $0x24] ss:$16 sps:$4 sm:$0xff]   ;;  %v3888_v19 = vld [vmem:[#allocation7 + $0x8] ss:$16 sps:$4 sm:$0xff]  }
 0x97e   :  { %2827 = vmatpush1.bf16.msra.mxu0 %v3883_v62  ;;  %v3889_v20 = vld [vmem:[#allocation7 + $0x20] ss:$16 sps:$4 sm:$0xff]   ;;  %2867 = vmatprep.subr.bf16.mxu1 %v3884_v17  ;;  %v3890_v22 = vld [vmem:[#allocation7 + $0x2c] ss:$16 sps:$4 sm:$0xff]   ;;  %v3892_v23 = vld [vmem:[#allocation7 + $0x44] ss:$16 sps:$4 sm:$0xff]  }
 0x97f   :  { %2828 = vmatprep.subr.bf16.mxu0 %v3886_v18  ;;  %2868 = vmatpush1.bf16.msra.mxu1 %v3888_v19  ;;  %v3894_v24 = vld [vmem:[#allocation7 + $0x28] ss:$16 sps:$4 sm:$0xff]   ;;  %v3895_v25 = vld [vmem:[#allocation7 + $0x40] ss:$16 sps:$4 sm:$0xff]   ;;  %v3896_v26 = vld [vmem:[#allocation7 + $0x4c] ss:$16 sps:$4 sm:$0xff]  }
 0x980   :  { %2869 = vmatprep.subr.bf16.mxu1 %v3890_v22  ;;  %v3898_v1 = vld [vmem:[#allocation7 + $0x64] ss:$16 sps:$4 sm:$0xff]   ;;  %v3900_v27 = vld [vmem:[#allocation7 + $0x48] ss:$16 sps:$4 sm:$0xff]   ;;  %v3902_v10 = vld [vmem:[#allocation7 + $0x6c] ss:$16 sps:$4 sm:$0xff]  }
 0x981   :  { %v3901_v28 = vld [vmem:[#allocation7 + $0x60] ss:$16 sps:$4 sm:$0xff]   ;;  %v3904_v29 = vld [vmem:[#allocation7 + $0x84] ss:$16 sps:$4 sm:$0xff]   ;;  %v3906_v30 = vld [vmem:[#allocation7 + $0x68] ss:$16 sps:$4 sm:$0xff]  }
 0x982   :  { %2829 = vmatpush1.bf16.msra.mxu0 %v3889_v20  ;;  %v3908_v32 = vld [vmem:[#allocation7 + $0x8c] ss:$16 sps:$4 sm:$0xff]   ;;  %v3907_v33 = vld [vmem:[#allocation7 + $0x80] ss:$16 sps:$4 sm:$0xff]   ;;  %v3910_v34 = vld [vmem:[#allocation7 + $0xa4] ss:$16 sps:$4 sm:$0xff]  }
 0x983   :  { %2830 = vmatprep.subr.bf16.mxu0 %v3892_v23  ;;  %2870 = vmatpush1.bf16.msra.mxu1 %v3894_v24  ;;  %v3912_v35 = vld [vmem:[#allocation7 + $0x88] ss:$16 sps:$4 sm:$0xff]   ;;  %v3914_v36 = vld [vmem:[#allocation7 + $0xac] ss:$16 sps:$4 sm:$0xff]   ;;  %v3913_v37 = vld [vmem:[#allocation7 + $0xa0] ss:$16 sps:$4 sm:$0xff]  }
 0x984   :  { %2871 = vmatprep.subr.bf16.mxu1 %v3896_v26  ;;  %v3916_v21 = vld [vmem:[#allocation7 + $0xc4] ss:$16 sps:$4 sm:$0xff]   ;;  %v3918_v38 = vld [vmem:[#allocation7 + $0xa8] ss:$16 sps:$4 sm:$0xff]   ;;  %v3920_v39 = vld [vmem:[#allocation7 + $0xcc] ss:$16 sps:$4 sm:$0xff]  }
 0x985   :  { %v3919_v40 = vld [vmem:[#allocation7 + $0xc0] ss:$16 sps:$4 sm:$0xff]   ;;  %v3922_v43 = vld [vmem:[#allocation7 + $0xe4] ss:$16 sps:$4 sm:$0xff]   ;;  %v3924_v44 = vld [vmem:[#allocation7 + $0xc8] ss:$16 sps:$4 sm:$0xff]  }
 0x986   :  { %2831 = vmatpush1.bf16.msra.mxu0 %v3895_v25  ;;  %v3926_v45 = vld [vmem:[#allocation7 + $0xec] ss:$16 sps:$4 sm:$0xff]   ;;  %v3925_v46 = vld [vmem:[#allocation7 + $0xe0] ss:$16 sps:$4 sm:$0xff]   ;;  %v3928_v47 = vld [vmem:[#allocation7 + $0xe8] ss:$16 sps:$4 sm:$0xff]  }
 0x987   :  { %2832 = vmatprep.subr.bf16.mxu0 %v3898_v1  ;;  %2872 = vmatpush1.bf16.msra.mxu1 %v3900_v27  ;;  %v2599_v31 = vld [vmem:[#allocation2 + $0x7] ss:$8 sm:$0xf]  ;;  %v3432_v24 = vld [vmem:[#allocation9] ss:$0 sm:$0xff]  ;;  %vm2934_vm0 = vcmask 1041408  }
 0x988   :  { %2873 = vmatprep.subr.bf16.mxu1 %v3902_v10  ;;  %v2601_v49 = vld [vmem:[#allocation2 + $0x27] ss:$8 sm:$0xf]  ;;  %v3433_v27 = vld [vmem:[#allocation6] ss:$0 sm:$0xff]  ;;  %vm2946_vm1 = vcmask 1024  }
 0x989   :  { %v2797_v50 = vcombine.low %v2599_v31, %v2601_v49 }
 0x98a   :  { %2833 = vmatpush1.bf16.msra.mxu0 %v3901_v28 }
 0x98b   :  { %2834 = vmatprep.subr.bf16.mxu0 %v3904_v29  ;;  %2874 = vmatpush1.bf16.msra.mxu1 %v3906_v30  ;;  %v2804_v51 = vrot.slane %v2797_v50, %v4812_v42 }
 0x98c   :  { %2875 = vmatprep.subr.bf16.mxu1 %v3908_v32 }
 0x98d   :  { %v2805_v53 = vcombine.high %v2804_v51, %v2804_v51  ;;  %v2812_v54 = vrot.slane %v2804_v51, %v4812_v42 }
 0x98e   :  { %2835 = vmatpush1.bf16.msra.mxu0 %v3907_v33 }
 0x98f   :  { %2836 = vmatprep.subr.bf16.mxu0 %v3910_v34  ;;  %2876 = vmatpush1.bf16.msra.mxu1 %v3912_v35  ;;  %v2819_v55 = vrot.slane %v2805_v53, %v4812_v42  ;;  %v2820_v52 = vcombine.high %v2812_v54, %v2812_v54 }
 0x990   :  { %2877 = vmatprep.subr.bf16.mxu1 %v3914_v36 }
 0x991   :  { %v2821_v57 = vcombine.high %v2819_v55, %v2819_v55 }
 0x992   :  { %2837 = vmatpush1.bf16.msra.mxu0 %v3913_v37 }
 0x993   :  { %2838 = vmatprep.subr.bf16.mxu0 %v3916_v21  ;;  %2878 = vmatpush1.bf16.msra.mxu1 %v3918_v38 }
 0x994   :  { %2879 = vmatprep.subr.bf16.mxu1 %v3920_v39 }
 0x996   :  { %2839 = vmatpush1.bf16.msra.mxu0 %v3919_v40 }
 0x997   :  { %2840 = vmatprep.subr.bf16.mxu0 %v3922_v43  ;;  %2880 = vmatpush1.bf16.msra.mxu1 %v3924_v44 }
 0x998   :  { %2881 = vmatprep.subr.bf16.mxu1 %v3926_v45 }
 0x99a   :  { %2841 = vmatpush1.bf16.msra.mxu0 %v3925_v46 }
 0x99b   :  { %2882 = vmatpush1.bf16.msra.mxu1 %v3928_v47 }
 0x99d   :  { %2859 = vmatmul.mubr.bf16.vlgmr.msra.gmra.mrb[28].mxu0 %v2602_v48 }
 0x99e   :  { %2900 = vmatmul.mubr.bf16.vlgmr.msra.gmra.mrb[28].mxu1 %v2602_v48 }
 0xa70   :  { %v2860_v56 = vpop.f32.mrb[28].mxu0 }
 0xa71   :  { %v2861_v58 = vadd.f32 %v2860_v56, %v2812_v54  ;;  %v2862_v41 = vpop.f32.mrb[29].mxu0  ;;  %v2901_v61 = vpop.f32.mrb[28].mxu1 }
 0xa72   :  { %v2863_v59 = vadd.f32 %v2862_v41, %v2819_v55  ;;  %v2864_v60 = vpop.f32.mrb[30].mxu0  ;;  %v2903_v2 = vpop.f32.mrb[29].mxu1  ;;  %v2902_v7 = vadd.f32 %v2901_v61, %v2820_v52 }
 0xa73   :  { %v2908_v63 = vmul.f32 0.5, %v2861_v58  ;;  %v2865_v0 = vpop.f32.mrb[31].mxu0  ;;  %v2904_v4 = vadd.f32 %v2903_v2, %v2821_v57  ;;  %v2905_v5 = vpop.f32.mrb[30].mxu1 }
 0xa74   :  { %v2909_v3 = vmul.f32 0.5, %v2863_v59  ;;  %v2906_v6 = vpop.f32.mrb[31].mxu1  ;;  %v2910_v42 = vmul.f32 0.5, %v2902_v7 }
 0xa75   :  { %3929 = vtanh.f32 %v2908_v63 }
 0xa76   :  { %3931 = vtanh.f32 %v2909_v3 }
 0xa77   :  { %3933 = vtanh.f32 %v2904_v4 }
 0xa78   :  { %3935 = vtanh.f32 %v2910_v42 }
 0xa7f   :  { %v3930_v8 = vpop.eup %3929 }
 0xa80   :  { %v3932_v11 = vpop.eup %3931  ;;  %v2914_v12 = vadd.f32 1.0, %v3930_v8 }
 0xa81   :  { %v2915_v13 = vadd.f32 1.0, %v3932_v11  ;;  %v3934_v14 = vpop.eup %3933 }
 0xa82   :  { %v2917_v15 = vmul.f32 0.5, %v2914_v12  ;;  %v3936_v19 = vpop.eup %3935 }
 0xa83   :  { %v2918_v16 = vmul.f32 0.5, %v2915_v13  ;;  %v2916_v20 = vadd.f32 1.0, %v3936_v19 }
 0xa84   :  { %v2922_v62 = vmul.f32 %v3934_v14, %v2917_v15 }
 0xa85   :  { %v2921_v17 = vmul.f32 %v2918_v16, %v4895_v9  ;;  %v2919_v22 = vmul.f32 0.5, %v2916_v20 }
 0xa87   :  { %v2923_v18 = vadd.f32 %v2922_v62, %v2921_v17 }
 0xa89   :  { %3937 = vtanh.f32 %v2923_v18 }
 0xa93   :  { %v3938_v23 = vpop.eup %3937 }
 0xa94   :  { %v2925_v25 = vmul.f32 %v3938_v23, %v2919_v22 }
 0xa96   :  { %v2933_v26 = vmul.f32 %v3432_v24, %v2925_v25 }
 0xa98   :  { %v2935_v1 = vsel %vm2934_vm0, %v2933_v26, 0.0 }
 0xa99   :  { %2936 = vadd.xlane.f32.xlu0 %v2935_v1 }
 0xb26   :  { %v2937_v10 = vpop.xlane.xlu0 %2936 }
 0xb27   :  { %v2945_v28 = vadd.f32 %v3433_v27, %v2937_v10 }
 0xb29   :  { %2947 = vst.msk [vmem:[%s4915_s5] sm:$0x3] %vm2946_vm1, %v2945_v28 }
 0xb2a   :  { %2952 = vsyncpa [#allocation8], 1 }
 0xb2b   :  { %2953 = vsyncpa [#allocation10], 1 }
 0xb2c   :  { %2954 = vsyncmov [#allocation3] }
 0xb2f   :  { %s2955_s25 = vpop.sfrf %2954 }
 0xb30   :  { %p3434_p1 = scmp.ne.s32.totalorder %s2955_s25, 0 }
 0xb32   :  { %2959 = shalt.err (%p3434_p1)  }
 0xb33   :  { %2961 = vsyncmov [#allocation3 + $0x1] }
 0xb36   :  { %s2962_s28 = vpop.sfrf %2961 }
 0xb37   :  { %p3435_p2 = scmp.ne.s32.totalorder %s2962_s28, 0 }
 0xb39   :  { %2966 = shalt.err (%p3435_p2)  }
 0xb3a   :  { %2968 = vsyncmov [#allocation3 + $0x2] }
 0xb3d   :  { %s2969_s29 = vpop.sfrf %2968 }
 0xb3e   :  { %p3436_p3 = scmp.ne.s32.totalorder %s2969_s29, 0 }
 0xb40   :  { %2973 = shalt.err (%p3436_p3)  }
 0xb41   :  { %2975 = vsyncmov [#allocation3 + $0x3] }
 0xb44   :  { %s2976_s30 = vpop.sfrf %2975 }
 0xb45   :  { %p3437_p4 = scmp.ne.s32.totalorder %s2976_s30, 0 }
 0xb47   :  { %2980 = shalt.err (%p3437_p4)  }
 0xb48   :  { %2982 = vsyncmov [#allocation3 + $0x4] }
 0xb4b   :  { %s2983_s5 = vpop.sfrf %2982 }
 0xb4c   :  { %p3438_p5 = scmp.ne.s32.totalorder %s2983_s5, 0 }
 0xb4e   :  { %2987 = shalt.err (%p3438_p5)  }
 0xb4f   :  { %2989 = vsyncmov [#allocation3 + $0x5] }
 0xb52   :  { %s2990_s12 = vpop.sfrf %2989 }
 0xb53   :  { %p3439_p6 = scmp.ne.s32.totalorder %s2990_s12, 0 }
 0xb55   :  { %2994 = shalt.err (%p3439_p6)  }
 0xb56   :  { %2996 = vsyncmov [#allocation3 + $0x6] }
 0xb59   :  { %s2997_s10 = vpop.sfrf %2996 }
 0xb5a   :  { %p3440_p7 = scmp.ne.s32.totalorder %s2997_s10, 0 }
 0xb5c   :  { %3001 = shalt.err (%p3440_p7)  }
 0xb5d   :  { %3003 = vsyncmov [#allocation3 + $0x7] }
 0xb60   :  { %s3004_s21 = vpop.sfrf %3003 }
 0xb61   :  { %p3441_p8 = scmp.ne.s32.totalorder %s3004_s21, 0 }
 0xb63   :  { %3008 = shalt.err (%p3441_p8)  }
 0xb64   :  { %3010 = vsyncmov [#allocation3 + $0x8] }
 0xb67   :  { %s3011_s23 = vpop.sfrf %3010 }
 0xb68   :  { %p3442_p9 = scmp.ne.s32.totalorder %s3011_s23, 0 }
 0xb6a   :  { %3015 = shalt.err (%p3442_p9)  }
 0xb6b   :  { %3017 = vsyncmov [#allocation3 + $0x9] }
 0xb6e   :  { %s3018_s27 = vpop.sfrf %3017 }
 0xb6f   :  { %p3443_p10 = scmp.ne.s32.totalorder %s3018_s27, 0 }
 0xb71   :  { %3022 = shalt.err (%p3443_p10)  }
 0xb72   :  { %3024 = vsyncmov [#allocation3 + $0xa] }
 0xb75   :  { %s3025_s22 = vpop.sfrf %3024 }
 0xb76   :  { %p3444_p11 = scmp.ne.s32.totalorder %s3025_s22, 0 }
 0xb78   :  { %3029 = shalt.err (%p3444_p11)  }
 0xb79   :  { %3031 = vsyncmov [#allocation3 + $0xb] }
 0xb7c   :  { %s3032_s26 = vpop.sfrf %3031 }
 0xb7d   :  { %p3445_p12 = scmp.ne.s32.totalorder %s3032_s26, 0 }
 0xb7f   :  { %3036 = shalt.err (%p3445_p12)  }
 0xb80   :  { %3038 = vsyncmov [#allocation3 + $0xc] }
 0xb83   :  { %s3039_s13 = vpop.sfrf %3038 }
 0xb84   :  { %p3446_p13 = scmp.ne.s32.totalorder %s3039_s13, 0 }
 0xb86   :  { %3043 = shalt.err (%p3446_p13)  }
 0xb87   :  { %3045 = vsyncmov [#allocation3 + $0xd] }
 0xb8a   :  { %s3046_s11 = vpop.sfrf %3045 }
 0xb8b   :  { %p3447_p0 = scmp.ne.s32.totalorder %s3046_s11, 0 }
 0xb8d   :  { %3050 = shalt.err (%p3447_p0)  }
 0xb8e   :  { %3052 = vsyncmov [#allocation3 + $0xe] }
 0xb91   :  { %s3053_s7 = vpop.sfrf %3052 }
 0xb92   :  { %p3448_p1 = scmp.ne.s32.totalorder %s3053_s7, 0 }
 0xb94   :  { %3057 = shalt.err (%p3448_p1)  }
 0xb95   :  { %3059 = vsyncmov [#allocation3 + $0xf] }
 0xb98   :  { %s3060_s18 = vpop.sfrf %3059 }
 0xb99   :  { %p3449_p2 = scmp.ne.s32.totalorder %s3060_s18, 0 }
 0xb9b   :  { %3064 = shalt.err (%p3449_p2)  }

</bundles_post_ra>
